<compile_context>
chip_gen: v6e
topology: v6e:2x2x1
jax: 0.10.0
libtpu: 0.0.40
codegen_flags: <defaults>
</compile_context>

<pallas_src>
import functools

import jax
import jax.numpy as jnp
from jax.experimental import pallas as pl
from jax.experimental.pallas import tpu as pltpu

STATE_DIM = 14
HIDDEN_DIM = 500
INIT_W = 0.003

# Padded (TPU-friendly) sizes.
PAD_IN = 16       # state_dim 14 -> 16 (full-array block on the lane axis of x)
PAD_HID = 512     # hidden 500 -> 512 lanes
PAD_OUT = 128     # output 1 -> 128 lanes for the MXU
MAX_TILE_B = 512  # batch tile (multiple of 128; fits v5e 16 MiB scoped VMEM)
SUB_B = 256       # in-tile sub-block for MXU/EUP overlap


def _round_up(x, m):
    return ((x + m - 1) // m) * m


def _mish_bf16(x_f32):
    """mish(x) = min(x * tanh(softplus(x)), 6), computed in bf16.

    tanh(ln s) = (s^2 - 1) / (s^2 + 1) with s = 1 + exp(x): one EUP exp plus
    one divide instead of exp + log1p + tanh. exp arg clamped for overflow
    safety (the ratio saturates to 1 there anyway)."""
    x = x_f32.astype(jnp.bfloat16)
    e = jnp.exp(jnp.minimum(x, 20.0))
    s = 1.0 + e
    s2 = s * s
    t = (s2 - 1.0) / (s2 + 1.0)
    return jnp.minimum(x * t, 6.0)          # bf16, fed straight into next MXU op


def _value_net_kernel(x_ref, w1_ref, b1_ref, w2_ref, b2_ref,
                      w23_ref, b23_ref, w3_ref, b3_ref, o_ref,
                      *, sub_b, n_sub):
    # Weights loaded once per tile; bf16 operands into the MXU, f32 accumulation.
    w1, b1 = w1_ref[...], b1_ref[...]
    w2, b2 = w2_ref[...], b2_ref[...]
    w23, b23 = w23_ref[...], b23_ref[...]
    w3, b3 = w3_ref[...], b3_ref[...]

    # Unrolled sub-block loop: the chains are independent, so the scheduler can
    # co-issue sub-block j+1's matmuls (MXU) with sub-block j's mish (EUP/VPU).
    for j in range(n_sub):
        rows = slice(j * sub_b, (j + 1) * sub_b)
        x = x_ref[rows, :]                                   # bf16 (pre-cast)

        h = jnp.dot(x, w1, preferred_element_type=jnp.float32) + b1
        h = _mish_bf16(h)
        h = jnp.dot(h, w2, preferred_element_type=jnp.float32) + b2
        h = _mish_bf16(h)
        h = jnp.dot(h, w23, preferred_element_type=jnp.float32) + b23
        h = _mish_bf16(h)
        out = jnp.dot(h, w3, preferred_element_type=jnp.float32) + b3  # (sub_b, 128) f32

        # Only column 0 is real (padded w3 columns / b3 entries are zero).
        # Transpose on the otherwise-idle XLU and store a lane-dense (8, sub_b)
        # slab -> 16x less HBM writeback than the padded (sub_b, 128) tile.
        out_t = jnp.transpose(out)                           # (128, sub_b)
        o_ref[:, rows] = out_t[:8, :]


def prepare_params(params):
    """One-time preparation: pad to TPU-friendly shapes and cast weights to
    bf16 (biases stay f32). Call once after init / each optimizer step, NOT
    per forward call."""
    def pad_w(w, r, c):
        out = jnp.zeros((r, c), jnp.float32).at[:w.shape[0], :w.shape[1]].set(w)
        return out.astype(jnp.bfloat16)

    def pad_b(b, c):
        return jnp.zeros((1, c), jnp.float32).at[0, :b.shape[0]].set(b)

    return {
        "w1": pad_w(params["w1"], PAD_IN, PAD_HID),
        "b1": pad_b(params["b1"], PAD_HID),
        "w2": pad_w(params["w2"], PAD_HID, PAD_HID),
        "b2": pad_b(params["b2"], PAD_HID),
        "w23": pad_w(params["w23"], PAD_HID, PAD_HID),
        "b23": pad_b(params["b23"], PAD_HID),
        "w3": pad_w(params["w3"], PAD_HID, PAD_OUT),
        "b3": pad_b(params["b3"], PAD_OUT),
    }


@jax.jit
def value_network_forward(state, prepared):
    """state: (B, STATE_DIM) f32. prepared: output of prepare_params. -> (B, 1) f32."""
    B = state.shape[0]

    # Batch tiling: tiles are multiples of 128 (lane-dense, MXU-friendly).
    b128 = _round_up(B, 128)
    if b128 <= MAX_TILE_B:
        n_tiles, tile_b = 1, b128
    else:
        n_tiles = -(-b128 // MAX_TILE_B)
        if n_tiles % 2:          # even tile count keeps both v7x TensorCores busy
            n_tiles += 1
        tile_b = _round_up(-(-b128 // n_tiles), 128)
    b_pad = n_tiles * tile_b

    # Sub-blocking for MXU/EUP overlap inside a tile.
    if tile_b > SUB_B and tile_b % SUB_B == 0:
        sub_b = SUB_B
    else:
        sub_b = tile_b
    n_sub = tile_b // sub_b

    # Only the (tiny) input needs per-call padding; pre-cast to bf16.
    x = jnp.zeros((b_pad, PAD_IN), jnp.bfloat16)
    x = x.at[:B, :STATE_DIM].set(state.astype(jnp.bfloat16))

    batch_spec = pl.BlockSpec((tile_b, PAD_IN), lambda i: (i, 0))
    const_spec = lambda shape: pl.BlockSpec(shape, lambda i: (0, 0))
    out_spec = pl.BlockSpec((8, tile_b), lambda i: (0, i))

    kernel = functools.partial(_value_net_kernel, sub_b=sub_b, n_sub=n_sub)

    out_packed = pl.pallas_call(
        kernel,
        out_shape=jax.ShapeDtypeStruct((8, b_pad), jnp.float32),
        grid=(n_tiles,),
        in_specs=[
            batch_spec,
            const_spec((PAD_IN, PAD_HID)), const_spec((1, PAD_HID)),
            const_spec((PAD_HID, PAD_HID)), const_spec((1, PAD_HID)),
            const_spec((PAD_HID, PAD_HID)), const_spec((1, PAD_HID)),
            const_spec((PAD_HID, PAD_OUT)), const_spec((1, PAD_OUT)),
        ],
        out_specs=out_spec,
        compiler_params=pltpu.CompilerParams(
            dimension_semantics=("parallel",)),
    )(x, prepared["w1"], prepared["b1"], prepared["w2"], prepared["b2"],
      prepared["w23"], prepared["b23"], prepared["w3"], prepared["b3"])

    # Real values live in row 0, first B columns of the packed output.
    return out_packed[0, :B].reshape(B, 1)


def init_params(key):
    """Deterministic init matching nn.Linear(...).uniform_(-init_w, init_w),
    stored transposed as (in_features, out_features)."""
    ks = jax.random.split(key, 8)
    u = lambda k, shape: jax.random.uniform(
        k, shape, jnp.float32, minval=-INIT_W, maxval=INIT_W)
    return {
        "w1": u(ks[0], (STATE_DIM, HIDDEN_DIM)),
        "b1": u(ks[1], (HIDDEN_DIM,)),
        "w2": u(ks[2], (HIDDEN_DIM, HIDDEN_DIM)),
        "b2": u(ks[3], (HIDDEN_DIM,)),
        "w23": u(ks[4], (HIDDEN_DIM, HIDDEN_DIM)),
        "b23": u(ks[5], (HIDDEN_DIM,)),
        "w3": u(ks[6], (HIDDEN_DIM, 1)),
        "b3": u(ks[7], (1,)),
    }


def _reference_forward(state, params, weight_dtype=jnp.float32,
                       act_dtype=jnp.float32):
    """Pure-JAX reference of the PyTorch forward. weight_dtype/act_dtype=bf16
    reproduces the kernel's mixed-precision numerics."""
    def mish(x):
        x = x.astype(act_dtype)
        return jnp.minimum(x * jnp.tanh(jax.nn.softplus(x)), 6.0).astype(jnp.float32)

    def lin(x, w, b):
        return jnp.dot(x.astype(weight_dtype), w.astype(weight_dtype),
                       preferred_element_type=jnp.float32) + b

    h = mish(lin(state, params["w1"], params["b1"]))
    h = mish(lin(h, params["w2"], params["b2"]))
    h = mish(lin(h, params["w23"], params["b23"]))
    return lin(h, params["w3"], params["b3"])


if __name__ == "__main__":
    key = jax.random.PRNGKey(0)
    pkey, xkey = jax.random.split(key)
    params = init_params(pkey)
    prepared = prepare_params(params)   # one-time padding / bf16 cast

    B = 4
    state = jax.random.normal(xkey, (B, STATE_DIM), jnp.float32)

    out = jax.block_until_ready(value_network_forward(state, prepared))
    assert out.shape == (B, 1), out.shape

    # Check against a reference that matches the kernel's bf16 numerics.
    ref_bf16 = _reference_forward(state, params, jnp.bfloat16, jnp.bfloat16)
    assert jnp.allclose(out, ref_bf16, atol=2e-4, rtol=2e-2), (out, ref_bf16)

    # Looser sanity check against the exact-f32 PyTorch semantics.
    ref_f32 = _reference_forward(state, params)
    assert jnp.allclose(out, ref_f32, atol=5e-4, rtol=5e-2), (out, ref_f32)

    print("KERNEL_OK")
</pallas_src>

<mosaic_0001>
module attributes {stable_mosaic.version = 11 : i64} {
  func.func @_value_net_kernel(%arg0: i32, %arg1: memref<128x16xbf16, #tpu.memory_space<vmem>>, %arg2: memref<16x512xbf16, #tpu.memory_space<vmem>>, %arg3: memref<1x512xf32, #tpu.memory_space<vmem>>, %arg4: memref<512x512xbf16, #tpu.memory_space<vmem>>, %arg5: memref<1x512xf32, #tpu.memory_space<vmem>>, %arg6: memref<512x512xbf16, #tpu.memory_space<vmem>>, %arg7: memref<1x512xf32, #tpu.memory_space<vmem>>, %arg8: memref<512x128xbf16, #tpu.memory_space<vmem>>, %arg9: memref<1x128xf32, #tpu.memory_space<vmem>>, %arg10: memref<8x128xf32, #tpu.memory_space<vmem>>) attributes {dimension_semantics = [#tpu.dimension_semantics<parallel>], iteration_bounds = array<i64: 1>, scalar_prefetch = 0 : i64, scratch_operands = 0 : i64, tpu.core_type = #tpu.core_type<tc>, window_params = [{transform_indices = @transform_0, window_bounds = array<i64: 128, 16>}, {pipeline_mode = #tpu.pipeline_mode<synchronous>, transform_indices = @transform_1, window_bounds = array<i64: 16, 512>}, {pipeline_mode = #tpu.pipeline_mode<synchronous>, transform_indices = @transform_2, window_bounds = array<i64: 1, 512>}, {pipeline_mode = #tpu.pipeline_mode<synchronous>, transform_indices = @transform_3, window_bounds = array<i64: 512, 512>}, {pipeline_mode = #tpu.pipeline_mode<synchronous>, transform_indices = @transform_4, window_bounds = array<i64: 1, 512>}, {pipeline_mode = #tpu.pipeline_mode<synchronous>, transform_indices = @transform_5, window_bounds = array<i64: 512, 512>}, {pipeline_mode = #tpu.pipeline_mode<synchronous>, transform_indices = @transform_6, window_bounds = array<i64: 1, 512>}, {pipeline_mode = #tpu.pipeline_mode<synchronous>, transform_indices = @transform_7, window_bounds = array<i64: 512, 128>}, {pipeline_mode = #tpu.pipeline_mode<synchronous>, transform_indices = @transform_8, window_bounds = array<i64: 1, 128>}, {transform_indices = @transform_9, window_bounds = array<i64: 8, 128>}]} {
    %c0 = arith.constant 0 : index
    %c0_0 = arith.constant 0 : index
    %0 = vector.load %arg2[%c0, %c0_0] : memref<16x512xbf16, #tpu.memory_space<vmem>>, vector<16x512xbf16>
    %c0_1 = arith.constant 0 : index
    %c0_2 = arith.constant 0 : index
    %1 = vector.load %arg3[%c0_1, %c0_2] : memref<1x512xf32, #tpu.memory_space<vmem>>, vector<1x512xf32>
    %c0_3 = arith.constant 0 : index
    %c0_4 = arith.constant 0 : index
    %2 = vector.load %arg4[%c0_3, %c0_4] : memref<512x512xbf16, #tpu.memory_space<vmem>>, vector<512x512xbf16>
    %c0_5 = arith.constant 0 : index
    %c0_6 = arith.constant 0 : index
    %3 = vector.load %arg5[%c0_5, %c0_6] : memref<1x512xf32, #tpu.memory_space<vmem>>, vector<1x512xf32>
    %c0_7 = arith.constant 0 : index
    %c0_8 = arith.constant 0 : index
    %4 = vector.load %arg6[%c0_7, %c0_8] : memref<512x512xbf16, #tpu.memory_space<vmem>>, vector<512x512xbf16>
    %c0_9 = arith.constant 0 : index
    %c0_10 = arith.constant 0 : index
    %5 = vector.load %arg7[%c0_9, %c0_10] : memref<1x512xf32, #tpu.memory_space<vmem>>, vector<1x512xf32>
    %c0_11 = arith.constant 0 : index
    %c0_12 = arith.constant 0 : index
    %6 = vector.load %arg8[%c0_11, %c0_12] : memref<512x128xbf16, #tpu.memory_space<vmem>>, vector<512x128xbf16>
    %c0_13 = arith.constant 0 : index
    %c0_14 = arith.constant 0 : index
    %7 = vector.load %arg9[%c0_13, %c0_14] : memref<1x128xf32, #tpu.memory_space<vmem>>, vector<1x128xf32>
    %c0_15 = arith.constant 0 : index
    %c0_16 = arith.constant 0 : index
    %8 = vector.load %arg1[%c0_15, %c0_16] : memref<128x16xbf16, #tpu.memory_space<vmem>>, vector<128x16xbf16>
    %cst = arith.constant dense<0.000000e+00> : vector<128x512xf32>
    %9 = tpu.matmul %8, %0, %cst {dimension_numbers = #tpu.dot_dimension_numbers<[1], [0], [0], [1], [0, 0, 1, 1], [], []>} : vector<128x16xbf16>, vector<16x512xbf16>, vector<128x512xf32> -> vector<128x512xf32>
    %10 = vector.broadcast %1 : vector<1x512xf32> to vector<128x512xf32>
    %11 = arith.addf %9, %10 : vector<128x512xf32>
    %12 = arith.truncf %11 : vector<128x512xf32> to vector<128x512xbf16>
    %cst_17 = arith.constant 2.000000e+01 : bf16
    %13 = vector.broadcast %cst_17 : bf16 to vector<128x512xbf16>
    %14 = arith.minimumf %12, %13 : vector<128x512xbf16>
    %15 = math.exp %14 : vector<128x512xbf16>
    %cst_18 = arith.constant 1.000000e+00 : bf16
    %16 = vector.broadcast %cst_18 : bf16 to vector<128x512xbf16>
    %17 = arith.addf %16, %15 : vector<128x512xbf16>
    %18 = arith.mulf %17, %17 : vector<128x512xbf16>
    %cst_19 = arith.constant 1.000000e+00 : bf16
    %19 = vector.broadcast %cst_19 : bf16 to vector<128x512xbf16>
    %20 = arith.subf %18, %19 : vector<128x512xbf16>
    %cst_20 = arith.constant 1.000000e+00 : bf16
    %21 = vector.broadcast %cst_20 : bf16 to vector<128x512xbf16>
    %22 = arith.addf %18, %21 : vector<128x512xbf16>
    %23 = arith.divf %20, %22 : vector<128x512xbf16>
    %24 = arith.mulf %12, %23 : vector<128x512xbf16>
    %cst_21 = arith.constant 6.000000e+00 : bf16
    %25 = vector.broadcast %cst_21 : bf16 to vector<128x512xbf16>
    %26 = arith.minimumf %24, %25 : vector<128x512xbf16>
    %cst_22 = arith.constant dense<0.000000e+00> : vector<128x512xf32>
    %27 = tpu.matmul %26, %2, %cst_22 {dimension_numbers = #tpu.dot_dimension_numbers<[1], [0], [0], [1], [0, 0, 1, 1], [], []>} : vector<128x512xbf16>, vector<512x512xbf16>, vector<128x512xf32> -> vector<128x512xf32>
    %28 = vector.broadcast %3 : vector<1x512xf32> to vector<128x512xf32>
    %29 = arith.addf %27, %28 : vector<128x512xf32>
    %30 = arith.truncf %29 : vector<128x512xf32> to vector<128x512xbf16>
    %cst_23 = arith.constant 2.000000e+01 : bf16
    %31 = vector.broadcast %cst_23 : bf16 to vector<128x512xbf16>
    %32 = arith.minimumf %30, %31 : vector<128x512xbf16>
    %33 = math.exp %32 : vector<128x512xbf16>
    %cst_24 = arith.constant 1.000000e+00 : bf16
    %34 = vector.broadcast %cst_24 : bf16 to vector<128x512xbf16>
    %35 = arith.addf %34, %33 : vector<128x512xbf16>
    %36 = arith.mulf %35, %35 : vector<128x512xbf16>
    %cst_25 = arith.constant 1.000000e+00 : bf16
    %37 = vector.broadcast %cst_25 : bf16 to vector<128x512xbf16>
    %38 = arith.subf %36, %37 : vector<128x512xbf16>
    %cst_26 = arith.constant 1.000000e+00 : bf16
    %39 = vector.broadcast %cst_26 : bf16 to vector<128x512xbf16>
    %40 = arith.addf %36, %39 : vector<128x512xbf16>
    %41 = arith.divf %38, %40 : vector<128x512xbf16>
    %42 = arith.mulf %30, %41 : vector<128x512xbf16>
    %cst_27 = arith.constant 6.000000e+00 : bf16
    %43 = vector.broadcast %cst_27 : bf16 to vector<128x512xbf16>
    %44 = arith.minimumf %42, %43 : vector<128x512xbf16>
    %cst_28 = arith.constant dense<0.000000e+00> : vector<128x512xf32>
    %45 = tpu.matmul %44, %4, %cst_28 {dimension_numbers = #tpu.dot_dimension_numbers<[1], [0], [0], [1], [0, 0, 1, 1], [], []>} : vector<128x512xbf16>, vector<512x512xbf16>, vector<128x512xf32> -> vector<128x512xf32>
    %46 = vector.broadcast %5 : vector<1x512xf32> to vector<128x512xf32>
    %47 = arith.addf %45, %46 : vector<128x512xf32>
    %48 = arith.truncf %47 : vector<128x512xf32> to vector<128x512xbf16>
    %cst_29 = arith.constant 2.000000e+01 : bf16
    %49 = vector.broadcast %cst_29 : bf16 to vector<128x512xbf16>
    %50 = arith.minimumf %48, %49 : vector<128x512xbf16>
    %51 = math.exp %50 : vector<128x512xbf16>
    %cst_30 = arith.constant 1.000000e+00 : bf16
    %52 = vector.broadcast %cst_30 : bf16 to vector<128x512xbf16>
    %53 = arith.addf %52, %51 : vector<128x512xbf16>
    %54 = arith.mulf %53, %53 : vector<128x512xbf16>
    %cst_31 = arith.constant 1.000000e+00 : bf16
    %55 = vector.broadcast %cst_31 : bf16 to vector<128x512xbf16>
    %56 = arith.subf %54, %55 : vector<128x512xbf16>
    %cst_32 = arith.constant 1.000000e+00 : bf16
    %57 = vector.broadcast %cst_32 : bf16 to vector<128x512xbf16>
    %58 = arith.addf %54, %57 : vector<128x512xbf16>
    %59 = arith.divf %56, %58 : vector<128x512xbf16>
    %60 = arith.mulf %48, %59 : vector<128x512xbf16>
    %cst_33 = arith.constant 6.000000e+00 : bf16
    %61 = vector.broadcast %cst_33 : bf16 to vector<128x512xbf16>
    %62 = arith.minimumf %60, %61 : vector<128x512xbf16>
    %cst_34 = arith.constant dense<0.000000e+00> : vector<128x128xf32>
    %63 = tpu.matmul %62, %6, %cst_34 {dimension_numbers = #tpu.dot_dimension_numbers<[1], [0], [0], [1], [0, 0, 1, 1], [], []>} : vector<128x512xbf16>, vector<512x128xbf16>, vector<128x128xf32> -> vector<128x128xf32>
    %64 = vector.broadcast %7 : vector<1x128xf32> to vector<128x128xf32>
    %65 = arith.addf %63, %64 : vector<128x128xf32>
    %66 = tpu.transpose %65, [1, 0] : vector<128x128xf32> -> vector<128x128xf32>
    %67 = vector.extract_strided_slice %66 {offsets = [0, 0], sizes = [8, 128], strides = [1, 1]} : vector<128x128xf32> to vector<8x128xf32>
    %c0_35 = arith.constant 0 : index
    %c0_36 = arith.constant 0 : index
    %68 = vector.load %arg10[%c0_35, %c0_36] : memref<8x128xf32, #tpu.memory_space<vmem>>, vector<8x128xf32>
    tpu.vector_store %arg10[%c0_35, %c0_36], %67 {strides = array<i32>} : memref<8x128xf32, #tpu.memory_space<vmem>>, vector<8x128xf32>,
    return
  }
  func.func @transform_0(%arg0: i32) -> (i32, i32) {
    %c0_i32 = arith.constant 0 : i32
    %c0_i32_0 = arith.constant 0 : i32
    return %arg0, %c0_i32 : i32, i32
  }
  func.func @transform_1(%arg0: i32) -> (i32, i32) {
    %c0_i32 = arith.constant 0 : i32
    %c0_i32_0 = arith.constant 0 : i32
    %c0_i32_1 = arith.constant 0 : i32
    return %c0_i32, %c0_i32_0 : i32, i32
  }
  func.func @transform_2(%arg0: i32) -> (i32, i32) {
    %c0_i32 = arith.constant 0 : i32
    %c0_i32_0 = arith.constant 0 : i32
    %c0_i32_1 = arith.constant 0 : i32
    return %c0_i32, %c0_i32_0 : i32, i32
  }
  func.func @transform_3(%arg0: i32) -> (i32, i32) {
    %c0_i32 = arith.constant 0 : i32
    %c0_i32_0 = arith.constant 0 : i32
    %c0_i32_1 = arith.constant 0 : i32
    return %c0_i32, %c0_i32_0 : i32, i32
  }
  func.func @transform_4(%arg0: i32) -> (i32, i32) {
    %c0_i32 = arith.constant 0 : i32
    %c0_i32_0 = arith.constant 0 : i32
    %c0_i32_1 = arith.constant 0 : i32
    return %c0_i32, %c0_i32_0 : i32, i32
  }
  func.func @transform_5(%arg0: i32) -> (i32, i32) {
    %c0_i32 = arith.constant 0 : i32
    %c0_i32_0 = arith.constant 0 : i32
    %c0_i32_1 = arith.constant 0 : i32
    return %c0_i32, %c0_i32_0 : i32, i32
  }
  func.func @transform_6(%arg0: i32) -> (i32, i32) {
    %c0_i32 = arith.constant 0 : i32
    %c0_i32_0 = arith.constant 0 : i32
    %c0_i32_1 = arith.constant 0 : i32
    return %c0_i32, %c0_i32_0 : i32, i32
  }
  func.func @transform_7(%arg0: i32) -> (i32, i32) {
    %c0_i32 = arith.constant 0 : i32
    %c0_i32_0 = arith.constant 0 : i32
    %c0_i32_1 = arith.constant 0 : i32
    return %c0_i32, %c0_i32_0 : i32, i32
  }
  func.func @transform_8(%arg0: i32) -> (i32, i32) {
    %c0_i32 = arith.constant 0 : i32
    %c0_i32_0 = arith.constant 0 : i32
    %c0_i32_1 = arith.constant 0 : i32
    return %c0_i32, %c0_i32_0 : i32, i32
  }
  func.func @transform_9(%arg0: i32) -> (i32, i32) {
    %c0_i32 = arith.constant 0 : i32
    %c0_i32_0 = arith.constant 0 : i32
    return %c0_i32, %arg0 : i32, i32
  }
}

</mosaic_0001>

<bundles_post_ra>
// kernel: value_network_forward.1
= control target key start
LH: loop header
LB: loop body
LE: loop exit
PB: predicated region body
PF: predicated region fallthrough
CT: control target
= control target key end

     0   :  { %14 = vsyncpa [#allocation3], 0  ;;  %s7961_s0 = inlined_call_operand.vmem [shape: bf16[128,16], index: 0, kind: input, shape index: {}]   ;;  %s7962_s1 = inlined_call_operand.vmem [shape: bf16[16,512], index: 1, kind: input, shape index: {}]   ;;  %s7963_s2 = inlined_call_operand.vmem [shape: f32[1,512], index: 2, kind: input, shape index: {}]   ;;  %s7964_s3 = inlined_call_operand.hbm [shape: bf16[512,512], index: 3, kind: input, shape index: {}]   ;;  %s7965_s4 = inlined_call_operand.vmem [shape: f32[1,512], index: 4, kind: input, shape index: {}]   ;;  %s7966_s5 = inlined_call_operand.hbm [shape: bf16[512,512], index: 5, kind: input, shape index: {}]   ;;  %s7967_s6 = inlined_call_operand.vmem [shape: f32[1,512], index: 6, kind: input, shape index: {}]   ;;  %s7968_s7 = inlined_call_operand.hbm [shape: bf16[512,128], index: 7, kind: input, shape index: {}]   ;;  %s7969_s8 = inlined_call_operand.vmem [shape: f32[1,128], index: 8, kind: input, shape index: {}]   ;;  %s7970_s9 = inlined_call_operand.vmem [shape: f32[8,128], index: 9, kind: output, shape index: {}]  }
   0x1   :  { %15 = vsyncpa [#allocation5], 0  ;;  %s5992_s30 = smov [#allocation4]   ;;  %s5993_s11 = smov [#allocation2]  }
   0x2   :  { %s41_s10 = sshll.u32 %s5992_s30, 4  ;;  %s27_s12 = sshll.u32 %s5993_s11, 4  ;;  %s42_s10 = int_to_ptr.vmem [resolvable:$true] %s41_s10  ;;  %s28_s12 = int_to_ptr.vmem [resolvable:$true] %s27_s12 }
   0x3   :  { %s5936_s13 = scalar_lea.vmem %s42_s10, 16384  ;;  %p5941_p1 = scmp.lt.s32.totalorder %s42_s10, %s42_s10 }
   0x4   :  { %p5937_p0 = scmp.ne.s32.totalorder %s42_s10, %s5936_s13  ;;  %p5942_p2 = scmp.lt.s32.totalorder %s5936_s13, %s5936_s13 }
   0x6   :  { %p5943_p3 = por %p5942_p2, %p5941_p1 }
   0x8   :  { %p5944_p4 = pnand %p5943_p3, %p5937_p0 }
   0xa   :  { %5947 = shalt.err (!%p5944_p4)
}
   0xb   :  { %s5994_s14 = smov 256   ;;  %s5995_s15 = smov 16  }
   0xc   :  { %47 = dma.hbm_to_vmem [thread:$0]  %s7966_s5, 16384, %s42_s10, [#allocation5], %s5994_s14, %s5994_s14, %s5995_s15  }
   0xd   :  { %s5956_s18 = scalar_lea.vmem %s28_s12, 16384  ;;  %p5961_p6 = scmp.lt.s32.totalorder %s28_s12, %s28_s12 }
   0xe   :  { %p5957_p5 = scmp.ne.s32.totalorder %s28_s12, %s5956_s18  ;;  %p5962_p7 = scmp.lt.s32.totalorder %s5956_s18, %s5956_s18 }
  0x10   :  { %p5963_p8 = por %p5962_p7, %p5961_p6 }
  0x12   :  { %p5964_p9 = pnand %p5963_p8, %p5957_p5 }
  0x14   :  { %5967 = shalt.err (!%p5964_p9)
}
  0x15   :  { %33 = dma.hbm_to_vmem [thread:$0]  %s7964_s3, 16384, %s28_s12, [#allocation3], %s5994_s14, %s5994_s14, %s5995_s15  }
  0x16   :  { %s5996_s21 = smov [#allocation6]  }
  0x17   :  { %s55_s22 = sshll.u32 %s5996_s21, 4  ;;  %s56_s22 = int_to_ptr.vmem [resolvable:$true] %s55_s22 }
  0x18   :  { %s5976_s23 = scalar_lea.vmem %s56_s22, 4096  ;;  %p5981_p11 = scmp.lt.s32.totalorder %s56_s22, %s56_s22 }
  0x19   :  { %p5977_p10 = scmp.ne.s32.totalorder %s56_s22, %s5976_s23  ;;  %p5982_p12 = scmp.lt.s32.totalorder %s5976_s23, %s5976_s23 }
  0x1b   :  { %p5983_p13 = por %p5982_p12, %p5981_p11 }
  0x1d   :  { %p5984_p0 = pnand %p5983_p13, %p5977_p10 }
  0x1f   :  { %5987 = shalt.err (!%p5984_p0)
}
  0x20   :  { %s5997_s5 = smov 64   ;;  %s5998_s24 = smov 4  }
  0x21   :  { %61 = dma.hbm_to_vmem [thread:$0]  %s7968_s7, 4096, %s56_s22, [#allocation5], %s5997_s5, %s5997_s5, %s5998_s24  }
  0x22   :  { %5988 = dma.done.wait [#allocation3], 16384  }
  0x23   :  { %5989 = vsyncadd [#allocation3], 4294950912 }
  0x24   :  { %5990 = dma.done.wait [#allocation5], 20480  }
  0x25   :  { %5991 = vsyncadd [#allocation5], 4294946816  ;;  %v5999_v0 = vmov 0   ;;  %v5114_v1 = vld [vmem:[%s7962_s1 + $0x4] ss:$16 sps:$4 sm:$0xff]   ;;  %vm502_vm0 = vcmask 130048  }
  0x26   :  { %559 = vmatprep.mubr.bf16.mxu0 %v5999_v0  ;;  %672 = vmatprep.mubr.bf16.mxu1 %v5999_v0  ;;  %v5116_v2 = vld [vmem:[%s7962_s1 + $0xc] ss:$16 sps:$4 sm:$0xff]   ;;  %v5118_v3 = vld [vmem:[%s7962_s1] ss:$16 sps:$4 sm:$0xff]   ;;  %v5119_v4 = vld [vmem:[%s7962_s1 + $0x8] ss:$16 sps:$4 sm:$0xff]  }
  0x27   :  { %541 = vmatprep.subr.bf16.mxu0 %v5114_v1  ;;  %654 = vmatprep.subr.bf16.mxu1 %v5116_v2  ;;  %v5120_v5 = vld [vmem:[%s7961_s0] sm:$0xff]   ;;  %v5121_v6 = vld [vmem:[%s7961_s0 + $0x8] sm:$0xff]   ;;  %v5122_v15 = vld [vmem:[%s7961_s0 + $0x10] sm:$0xff]  }
  0x28   :  { %542 = vmatpush1.bf16.msra.mxu0 %v5118_v3  ;;  %655 = vmatpush1.bf16.msra.mxu1 %v5119_v4  ;;  %v5128_v7 = vld [vmem:[#allocation2 + $0xe0] ss:$16 sps:$4 sm:$0xff]   ;;  %v5130_v8 = vld [vmem:[#allocation2 + $0xe4] ss:$16 sps:$4 sm:$0xff]   ;;  %v5123_v16 = vld [vmem:[%s7961_s0 + $0x18] sm:$0xff]  }
  0x29   :  { %v5131_v9 = vld [vmem:[#allocation2 + $0x2e0] ss:$16 sps:$4 sm:$0xff]   ;;  %1830 = vmatprep.subr.bf16.mxu0 %v5130_v8  ;;  %v5133_v10 = vld [vmem:[#allocation2 + $0x2e4] ss:$16 sps:$4 sm:$0xff]   ;;  %v5125_v18 = vld [vmem:[%s7961_s0 + $0x28] sm:$0xff]  }
  0x2a   :  { %v5134_v11 = vld [vmem:[#allocation2 + $0xc0] ss:$16 sps:$4 sm:$0xff]   ;;  %v5136_v12 = vld [vmem:[#allocation2 + $0xc4] ss:$16 sps:$4 sm:$0xff]   ;;  %1943 = vmatprep.subr.bf16.mxu1 %v5133_v10  ;;  %v5127_v20 = vld [vmem:[%s7961_s0 + $0x38] sm:$0xff]  }
  0x2b   :  { %4670 = vmatmul.mubr.msk.bf16.vlgmr.msra.gmra.mxu0 %vm502_vm0, %v5120_v5  ;;  %4678 = vmatmul.mubr.msk.bf16.vlgmr.msra.gmra.mxu1 %vm502_vm0, %v5120_v5  ;;  %v5139_v13 = vld [vmem:[#allocation2 + $0x2c4] ss:$16 sps:$4 sm:$0xff]   ;;  %v5137_v14 = vld [vmem:[#allocation2 + $0x2c0] ss:$16 sps:$4 sm:$0xff]  }
  0x2c   :  { %569 = vmatprep.mubr.bf16.mxu0 %v5999_v0  ;;  %682 = vmatprep.mubr.bf16.mxu1 %v5999_v0  ;;  %v5124_v17 = vld [vmem:[%s7961_s0 + $0x20] sm:$0xff]   ;;  %v5126_v19 = vld [vmem:[%s7961_s0 + $0x30] sm:$0xff]  }
  0x2d   :  { %1831 = vmatpush1.bf16.msra.mxu0 %v5128_v7  ;;  %1944 = vmatpush1.bf16.msra.mxu1 %v5131_v9  ;;  %v5142_v21 = vld [vmem:[#allocation2 + $0xa4] ss:$16 sps:$4 sm:$0xff]   ;;  %v5140_v23 = vld [vmem:[#allocation2 + $0xa0] ss:$16 sps:$4 sm:$0xff]  }
  0x2e   :  { %1832 = vmatprep.subr.bf16.mxu0 %v5136_v12  ;;  %1945 = vmatprep.subr.bf16.mxu1 %v5139_v13  ;;  %v5145_v22 = vld [vmem:[#allocation2 + $0x2a4] ss:$16 sps:$4 sm:$0xff]   ;;  %v5143_v24 = vld [vmem:[#allocation2 + $0x2a0] ss:$16 sps:$4 sm:$0xff]   ;;  %v5226_v13 = vld [vmem:[#allocation2 + $0xec] ss:$16 sps:$4 sm:$0xff]  }
  0x2f   :  { %v5148_v25 = vld [vmem:[#allocation2 + $0x84] ss:$16 sps:$4 sm:$0xff]   ;;  %v5146_v27 = vld [vmem:[#allocation2 + $0x80] ss:$16 sps:$4 sm:$0xff]  }
  0x30   :  { %v5151_v26 = vld [vmem:[#allocation2 + $0x284] ss:$16 sps:$4 sm:$0xff]   ;;  %v5149_v28 = vld [vmem:[#allocation2 + $0x280] ss:$16 sps:$4 sm:$0xff]  }
  0x31   :  { %1833 = vmatpush1.bf16.msra.mxu0 %v5134_v11  ;;  %1946 = vmatpush1.bf16.msra.mxu1 %v5137_v14  ;;  %v5154_v29 = vld [vmem:[#allocation2 + $0x64] ss:$16 sps:$4 sm:$0xff]   ;;  %v5152_v31 = vld [vmem:[#allocation2 + $0x60] ss:$16 sps:$4 sm:$0xff]   ;;  %v5229_v14 = vld [vmem:[#allocation2 + $0x2ec] ss:$16 sps:$4 sm:$0xff]  }
  0x32   :  { %1834 = vmatprep.subr.bf16.mxu0 %v5142_v21  ;;  %1947 = vmatprep.subr.bf16.mxu1 %v5145_v22  ;;  %v5157_v30 = vld [vmem:[#allocation2 + $0x264] ss:$16 sps:$4 sm:$0xff]   ;;  %v5155_v32 = vld [vmem:[#allocation2 + $0x260] ss:$16 sps:$4 sm:$0xff]  }
  0x33   :  { %4671 = vmatmul.mubr.msk.bf16.gmra.mxu0 %vm502_vm0, %v5121_v6  ;;  %4679 = vmatmul.mubr.msk.bf16.gmra.mxu1 %vm502_vm0, %v5121_v6  ;;  %v5160_v33 = vld [vmem:[#allocation2 + $0x44] ss:$16 sps:$4 sm:$0xff]   ;;  %v5158_v35 = vld [vmem:[#allocation2 + $0x40] ss:$16 sps:$4 sm:$0xff]  }
  0x34   :  { %579 = vmatprep.mubr.bf16.mxu0 %v5999_v0  ;;  %692 = vmatprep.mubr.bf16.mxu1 %v5999_v0  ;;  %v5163_v34 = vld [vmem:[#allocation2 + $0x244] ss:$16 sps:$4 sm:$0xff]   ;;  %v5161_v36 = vld [vmem:[#allocation2 + $0x240] ss:$16 sps:$4 sm:$0xff]  }
  0x35   :  { %1835 = vmatpush1.bf16.msra.mxu0 %v5140_v23  ;;  %1948 = vmatpush1.bf16.msra.mxu1 %v5143_v24  ;;  %v5166_v37 = vld [vmem:[#allocation2 + $0x24] ss:$16 sps:$4 sm:$0xff]   ;;  %v5164_v39 = vld [vmem:[#allocation2 + $0x20] ss:$16 sps:$4 sm:$0xff]  }
  0x36   :  { %1836 = vmatprep.subr.bf16.mxu0 %v5148_v25  ;;  %1949 = vmatprep.subr.bf16.mxu1 %v5151_v26  ;;  %v5169_v38 = vld [vmem:[#allocation2 + $0x224] ss:$16 sps:$4 sm:$0xff]   ;;  %v5167_v40 = vld [vmem:[#allocation2 + $0x220] ss:$16 sps:$4 sm:$0xff]  }
  0x37   :  { %v5172_v41 = vld [vmem:[#allocation2 + $0x4] ss:$16 sps:$4 sm:$0xff]   ;;  %v5170_v42 = vld [vmem:[#allocation2] ss:$16 sps:$4 sm:$0xff]  }
  0x38   :  { %v5175_v43 = vld [vmem:[#allocation2 + $0x204] ss:$16 sps:$4 sm:$0xff]   ;;  %v5173_v44 = vld [vmem:[#allocation2 + $0x200] ss:$16 sps:$4 sm:$0xff]  }
  0x39   :  { %1837 = vmatpush1.bf16.msra.mxu0 %v5146_v27  ;;  %1950 = vmatpush1.bf16.msra.mxu1 %v5149_v28  ;;  %v5178_v45 = vld [vmem:[#allocation2 + $0x1e4] ss:$16 sps:$4 sm:$0xff]   ;;  %v5176_v47 = vld [vmem:[#allocation2 + $0x1e0] ss:$16 sps:$4 sm:$0xff]  }
  0x3a   :  { %1838 = vmatprep.subr.bf16.mxu0 %v5154_v29  ;;  %1951 = vmatprep.subr.bf16.mxu1 %v5157_v30  ;;  %v5181_v46 = vld [vmem:[#allocation2 + $0x3e4] ss:$16 sps:$4 sm:$0xff]   ;;  %v5179_v48 = vld [vmem:[#allocation2 + $0x3e0] ss:$16 sps:$4 sm:$0xff]  }
  0x3b   :  { %4672 = vmatmul.mubr.msk.bf16.gmra.mxu0 %vm502_vm0, %v5122_v15  ;;  %4680 = vmatmul.mubr.msk.bf16.gmra.mxu1 %vm502_vm0, %v5122_v15  ;;  %v5184_v49 = vld [vmem:[#allocation2 + $0x1c4] ss:$16 sps:$4 sm:$0xff]   ;;  %v5182_v50 = vld [vmem:[#allocation2 + $0x1c0] ss:$16 sps:$4 sm:$0xff]   ;;  %v422_v15 = vlaneseq }
  0x3c   :  { %589 = vmatprep.mubr.bf16.mxu0 %v5999_v0  ;;  %702 = vmatprep.mubr.bf16.mxu1 %v5999_v0  ;;  %v5187_v51 = vld [vmem:[#allocation2 + $0x3c4] ss:$16 sps:$4 sm:$0xff]   ;;  %v5185_v52 = vld [vmem:[#allocation2 + $0x3c0] ss:$16 sps:$4 sm:$0xff]  }
  0x3d   :  { %1839 = vmatpush1.bf16.msra.mxu0 %v5152_v31  ;;  %1952 = vmatpush1.bf16.msra.mxu1 %v5155_v32  ;;  %v5190_v53 = vld [vmem:[#allocation2 + $0x1a4] ss:$16 sps:$4 sm:$0xff]   ;;  %v5188_v55 = vld [vmem:[#allocation2 + $0x1a0] ss:$16 sps:$4 sm:$0xff]  }
  0x3e   :  { %1840 = vmatprep.subr.bf16.mxu0 %v5160_v33  ;;  %1953 = vmatprep.subr.bf16.mxu1 %v5163_v34  ;;  %v5193_v54 = vld [vmem:[#allocation2 + $0x3a4] ss:$16 sps:$4 sm:$0xff]   ;;  %v5191_v56 = vld [vmem:[#allocation2 + $0x3a0] ss:$16 sps:$4 sm:$0xff]  }
  0x3f   :  { %v5196_v57 = vld [vmem:[#allocation2 + $0x184] ss:$16 sps:$4 sm:$0xff]   ;;  %v5194_v58 = vld [vmem:[#allocation2 + $0x180] ss:$16 sps:$4 sm:$0xff]  }
  0x40   :  { %v5199_v59 = vld [vmem:[#allocation2 + $0x384] ss:$16 sps:$4 sm:$0xff]   ;;  %v5197_v60 = vld [vmem:[#allocation2 + $0x380] ss:$16 sps:$4 sm:$0xff]  }
  0x41   :  { %1841 = vmatpush1.bf16.msra.mxu0 %v5158_v35  ;;  %1954 = vmatpush1.bf16.msra.mxu1 %v5161_v36  ;;  %v5202_v61 = vld [vmem:[#allocation2 + $0x164] ss:$16 sps:$4 sm:$0xff]   ;;  %v5200_v63 = vld [vmem:[#allocation2 + $0x160] ss:$16 sps:$4 sm:$0xff]  }
  0x42   :  { %1842 = vmatprep.subr.bf16.mxu0 %v5166_v37  ;;  %1955 = vmatprep.subr.bf16.mxu1 %v5169_v38  ;;  %v5205_v62 = vld [vmem:[#allocation2 + $0x364] ss:$16 sps:$4 sm:$0xff]   ;;  %v5206_v2 = vld [vmem:[#allocation2 + $0x140] ss:$16 sps:$4 sm:$0xff]  }
  0x43   :  { %4673 = vmatmul.mubr.msk.bf16.gmra.mxu0 %vm502_vm0, %v5123_v16  ;;  %4681 = vmatmul.mubr.msk.bf16.gmra.mxu1 %vm502_vm0, %v5123_v16  ;;  %v5208_v1 = vld [vmem:[#allocation2 + $0x144] ss:$16 sps:$4 sm:$0xff]   ;;  %v5209_v4 = vld [vmem:[#allocation2 + $0x340] ss:$16 sps:$4 sm:$0xff]   ;;  %v423_v16 = vshrl.u32 %v422_v15, 7 }
  0x44   :  { %599 = vmatprep.mubr.bf16.mxu0 %v5999_v0  ;;  %712 = vmatprep.mubr.bf16.mxu1 %v5999_v0  ;;  %v5211_v3 = vld [vmem:[#allocation2 + $0x344] ss:$16 sps:$4 sm:$0xff]   ;;  %v5212_v7 = vld [vmem:[#allocation2 + $0x120] ss:$16 sps:$4 sm:$0xff]  }
  0x45   :  { %1843 = vmatpush1.bf16.msra.mxu0 %v5164_v39  ;;  %1956 = vmatpush1.bf16.msra.mxu1 %v5167_v40  ;;  %v5214_v5 = vld [vmem:[#allocation2 + $0x124] ss:$16 sps:$4 sm:$0xff]   ;;  %v5215_v8 = vld [vmem:[#allocation2 + $0x320] ss:$16 sps:$4 sm:$0xff]   ;;  %v6123_v21 = vsub.s32 3, %v423_v16 }
  0x46   :  { %1844 = vmatprep.subr.bf16.mxu0 %v5172_v41  ;;  %1957 = vmatprep.subr.bf16.mxu1 %v5175_v43  ;;  %v5217_v6 = vld [vmem:[#allocation2 + $0x324] ss:$16 sps:$4 sm:$0xff]   ;;  %v5218_v10 = vld [vmem:[#allocation2 + $0x100] ss:$16 sps:$4 sm:$0xff]  }
  0x47   :  { %v5220_v9 = vld [vmem:[#allocation2 + $0x104] ss:$16 sps:$4 sm:$0xff]   ;;  %v5221_v12 = vld [vmem:[#allocation2 + $0x300] ss:$16 sps:$4 sm:$0xff]   ;;  %8002 = vst [vmem:[#allocation12_spill] sm:$0xff] %v6123_v21 }
  0x48   :  { %v5223_v11 = vld [vmem:[#allocation2 + $0x304] ss:$16 sps:$4 sm:$0xff]  }
  0x49   :  { %1845 = vmatpush1.bf16.msra.mxu0 %v5170_v42  ;;  %1958 = vmatpush1.bf16.msra.mxu1 %v5173_v44 }
  0x4a   :  { %1846 = vmatprep.subr.bf16.mxu0 %v5178_v45  ;;  %1959 = vmatprep.subr.bf16.mxu1 %v5181_v46  ;;  %v7971_v46 = vmov 1101021600  }
  0x4b   :  { %4674 = vmatmul.mubr.msk.bf16.gmra.mxu0 %vm502_vm0, %v5124_v17  ;;  %4682 = vmatmul.mubr.msk.bf16.gmra.mxu1 %vm502_vm0, %v5124_v17  ;;  %v6114_v17 = vsub.s32 0, %v423_v16 }
  0x4c   :  { %609 = vmatprep.mubr.bf16.mxu0 %v5999_v0  ;;  %722 = vmatprep.mubr.bf16.mxu1 %v5999_v0 }
  0x4d   :  { %1847 = vmatpush2.bf16.msra.mxu0 %v5176_v47  ;;  %1960 = vmatpush2.bf16.msra.mxu1 %v5179_v48  ;;  %7999 = vst [vmem:[#allocation9_spill] sm:$0xff] %v6114_v17 }
  0x4e   :  { %1848 = vmatprep.subr.bf16.mxu0 %v5184_v49  ;;  %1961 = vmatprep.subr.bf16.mxu1 %v5187_v51 }
  0x51   :  { %1849 = vmatpush2.bf16.msra.mxu0 %v5182_v50  ;;  %1962 = vmatpush2.bf16.msra.mxu1 %v5185_v52 }
  0x52   :  { %1850 = vmatprep.subr.bf16.mxu0 %v5190_v53  ;;  %1963 = vmatprep.subr.bf16.mxu1 %v5193_v54 }
  0x53   :  { %4675 = vmatmul.mubr.msk.bf16.gmra.mxu0 %vm502_vm0, %v5125_v18  ;;  %4683 = vmatmul.mubr.msk.bf16.gmra.mxu1 %vm502_vm0, %v5125_v18  ;;  %v6116_v18 = vsub.s32 2, %v423_v16 }
  0x54   :  { %619 = vmatprep.mubr.bf16.mxu0 %v5999_v0  ;;  %732 = vmatprep.mubr.bf16.mxu1 %v5999_v0 }
  0x55   :  { %1851 = vmatpush2.bf16.msra.mxu0 %v5188_v55  ;;  %1964 = vmatpush2.bf16.msra.mxu1 %v5191_v56  ;;  %8000 = vst [vmem:[#allocation10_spill] sm:$0xff] %v6116_v18 }
  0x56   :  { %1852 = vmatprep.subr.bf16.mxu0 %v5196_v57  ;;  %1965 = vmatprep.subr.bf16.mxu1 %v5199_v59 }
  0x59   :  { %1853 = vmatpush2.bf16.msra.mxu0 %v5194_v58  ;;  %1966 = vmatpush2.bf16.msra.mxu1 %v5197_v60 }
  0x5a   :  { %1854 = vmatprep.subr.bf16.mxu0 %v5202_v61  ;;  %1967 = vmatprep.subr.bf16.mxu1 %v5205_v62 }
  0x5b   :  { %4676 = vmatmul.mubr.msk.bf16.gmra.mxu0 %vm502_vm0, %v5126_v19  ;;  %4684 = vmatmul.mubr.msk.bf16.gmra.mxu1 %vm502_vm0, %v5126_v19  ;;  %v81_v19 = vld [vmem:[%s7963_s2] sm:$0xf] }
  0x5c   :  { %629 = vmatprep.mubr.bf16.mxu0 %v5999_v0  ;;  %742 = vmatprep.mubr.bf16.mxu1 %v5999_v0  ;;  %v5203_v0 = vld [vmem:[#allocation2 + $0x360] ss:$16 sps:$4 sm:$0xff]   ;;  %v6126_v24 = vrot.slane %v81_v19, %v6114_v17  ;;  %v6129_v25 = vrot.slane %v81_v19, %v6116_v18  ;;  %v6135_v28 = vrot.slane %v81_v19, %v6123_v21 }
  0x5d   :  { %1855 = vmatpush2.bf16.msra.mxu0 %v5200_v63  ;;  %1968 = vmatpush2.bf16.msra.mxu1 %v5203_v0 }
  0x5e   :  { %1856 = vmatprep.subr.bf16.mxu0 %v5208_v1  ;;  %1969 = vmatprep.subr.bf16.mxu1 %v5211_v3 }
  0x61   :  { %1857 = vmatpush2.bf16.msra.mxu0 %v5206_v2  ;;  %1970 = vmatpush2.bf16.msra.mxu1 %v5209_v4 }
  0x62   :  { %1858 = vmatprep.subr.bf16.mxu0 %v5214_v5  ;;  %1971 = vmatprep.subr.bf16.mxu1 %v5217_v6 }
  0x63   :  { %4677 = vmatmul.mubr.msk.bf16.gmra.mxu0 %vm502_vm0, %v5127_v20  ;;  %4685 = vmatmul.mubr.msk.bf16.gmra.mxu1 %vm502_vm0, %v5127_v20  ;;  %v6121_v20 = vsub.s32 1, %v423_v16 }
  0x65   :  { %1859 = vmatpush2.bf16.msra.mxu0 %v5212_v7  ;;  %1972 = vmatpush2.bf16.msra.mxu1 %v5215_v8  ;;  %8001 = vst [vmem:[#allocation11_spill] sm:$0xff] %v6121_v20  ;;  %v6132_v26 = vrot.slane %v81_v19, %v6121_v20 }
  0x66   :  { %1860 = vmatprep.subr.bf16.mxu0 %v5220_v9  ;;  %1973 = vmatprep.subr.bf16.mxu1 %v5223_v11 }
  0x69   :  { %1861 = vmatpush2.bf16.msra.mxu0 %v5218_v10  ;;  %1974 = vmatpush2.bf16.msra.mxu1 %v5221_v12 }
  0x6a   :  { %2056 = vmatprep.subr.bf16.mxu0 %v5226_v13  ;;  %2169 = vmatprep.subr.bf16.mxu1 %v5229_v14 }
  0xeb   :  { %v561_v22 = vpop.f32.mrf.mxu0  ;;  %v674_v23 = vpop.f32.mrf.mxu1 }
  0xec   :  { %v562_v32 = vadd.f32 %v561_v22, %v6126_v24  ;;  %v675_v33 = vadd.f32 %v674_v23, %v6129_v25 }
  0xed   :  { %v563_v27 = vpop.f32.mrf.mxu0  ;;  %v676_v29 = vpop.f32.mrf.mxu1 }
  0xee   :  { %v564_v36 = vadd.f32 %v563_v27, %v6132_v26  ;;  %v677_v37 = vadd.f32 %v676_v29, %v6135_v28 }
  0xef   :  { %v565_v30 = vpop.f32.mrf.mxu0  ;;  %v678_v31 = vpop.f32.mrf.mxu1 }
  0xf0   :  { %v566_v34 = vadd.f32 %v565_v30, %v6126_v24  ;;  %v679_v35 = vadd.f32 %v678_v31, %v6129_v25 }
  0xf1   :  { %v567_v38 = vpop.f32.mrf.mxu0  ;;  %v680_v39 = vpop.f32.mrf.mxu1 }
  0xf2   :  { %v6143_v40 = vpack.c.bf16 %v566_v34, %v562_v32  ;;  %v6145_v41 = vpack.c.bf16 %v679_v35, %v675_v33  ;;  %v568_v42 = vadd.f32 %v567_v38, %v6132_v26  ;;  %v681_v43 = vadd.f32 %v680_v39, %v6135_v28 }
  0xf3   :  { %v571_v44 = vpop.f32.mrf.mxu0  ;;  %v684_v45 = vpop.f32.mrf.mxu1 }
  0xf4   :  { %v785_v47 = vmin.bf16 %v7971_v46, %v6143_v40  ;;  %v787_v48 = vmin.bf16 %v7971_v46, %v6145_v41  ;;  %v6153_v49 = vpack.c.bf16 %v568_v42, %v564_v36  ;;  %v6155_v50 = vpack.c.bf16 %v681_v43, %v677_v37 }
  0xf5   :  { %v573_v51 = vpop.f32.mrf.mxu0  ;;  %v686_v52 = vpop.f32.mrf.mxu1  ;;  %v572_v57 = vadd.f32 %v571_v44, %v6126_v24  ;;  %v685_v61 = vadd.f32 %v684_v45, %v6129_v25 }
  0xf6   :  { %v818_v53 = vmul.bf16 1069105081, %v785_v47  ;;  %v824_v54 = vmul.bf16 1069105081, %v787_v48  ;;  %v786_v55 = vmin.bf16 %v7971_v46, %v6153_v49  ;;  %v788_v56 = vmin.bf16 %v7971_v46, %v6155_v50 }
  0xf7   :  { %v575_v58 = vpop.f32.mrf.mxu0  ;;  %v688_v59 = vpop.f32.mrf.mxu1  ;;  %v574_v0 = vadd.f32 %v573_v51, %v6132_v26  ;;  %v687_v4 = vadd.f32 %v686_v52, %v6135_v28 }
  0xf8   :  { %5544 = vpow.bf16 %v818_v53  ;;  %v821_v60 = vmul.bf16 1069105081, %v786_v55  ;;  %v576_v62 = vadd.f32 %v575_v58, %v6126_v24  ;;  %v827_v63 = vmul.bf16 1069105081, %v788_v56 }
  0xf9   :  { %5546 = vpow.bf16 %v824_v54  ;;  %v689_v1 = vadd.f32 %v688_v59, %v6129_v25  ;;  %v577_v2 = vpop.f32.mrf.mxu0  ;;  %v690_v3 = vpop.f32.mrf.mxu1 }
  0xfa   :  { %v6167_v5 = vpack.c.bf16 %v576_v62, %v572_v57  ;;  %v578_v6 = vadd.f32 %v577_v2, %v6132_v26  ;;  %v691_v7 = vadd.f32 %v690_v3, %v6135_v28  ;;  %5548 = vpow.bf16 %v821_v60 }
  0xfb   :  { %v6171_v8 = vpack.c.bf16 %v689_v1, %v685_v61  ;;  %v581_v9 = vpop.f32.mrf.mxu0  ;;  %v694_v10 = vpop.f32.mrf.mxu1  ;;  %5550 = vpow.bf16 %v827_v63 }
  0xfc   :  { %v789_v11 = vmin.bf16 %v7971_v46, %v6167_v5  ;;  %v6175_v12 = vpack.c.bf16 %v578_v6, %v574_v0  ;;  %v6177_v13 = vpack.c.bf16 %v691_v7, %v687_v4  ;;  %v582_v30 = vadd.f32 %v581_v9, %v6126_v24 }
  0xfd   :  { %v791_v14 = vmin.bf16 %v7971_v46, %v6171_v8  ;;  %v583_v15 = vpop.f32.mrf.mxu0  ;;  %v696_v16 = vpop.f32.mrf.mxu1  ;;  %v695_v31 = vadd.f32 %v694_v10, %v6129_v25 }
  0xfe   :  { %v830_v19 = vmul.bf16 1069105081, %v789_v11  ;;  %v790_v22 = vmin.bf16 %v7971_v46, %v6175_v12  ;;  %v792_v23 = vmin.bf16 %v7971_v46, %v6177_v13  ;;  %v584_v32 = vadd.f32 %v583_v15, %v6132_v26 }
  0xff   :  { %v585_v27 = vpop.f32.mrf.mxu0  ;;  %v698_v29 = vpop.f32.mrf.mxu1  ;;  %v836_v34 = vmul.bf16 1069105081, %v791_v14  ;;  %v697_v35 = vadd.f32 %v696_v16, %v6135_v28 }
 0x100   :  { %v586_v33 = vadd.f32 %v585_v27, %v6126_v24  ;;  %5552 = vpow.bf16 %v830_v19  ;;  %v699_v36 = vadd.f32 %v698_v29, %v6129_v25  ;;  %v833_v39 = vmul.bf16 1069105081, %v790_v22 }
 0x101   :  { %v587_v37 = vpop.f32.mrf.mxu0  ;;  %v700_v38 = vpop.f32.mrf.mxu1  ;;  %v839_v45 = vmul.bf16 1069105081, %v792_v23  ;;  %5554 = vpow.bf16 %v836_v34 }
 0x102   :  { %v6191_v42 = vpack.c.bf16 %v586_v33, %v582_v30  ;;  %v588_v43 = vadd.f32 %v587_v37, %v6132_v26  ;;  %v701_v44 = vadd.f32 %v700_v38, %v6135_v28  ;;  %v6195_v47 = vpack.c.bf16 %v699_v36, %v695_v31 }
 0x103   :  { %v591_v48 = vpop.f32.mrf.mxu0  ;;  %v704_v51 = vpop.f32.mrf.mxu1  ;;  %5556 = vpow.bf16 %v833_v39 }
 0x104   :  { %v793_v52 = vmin.bf16 %v7971_v46, %v6191_v42  ;;  %v6199_v53 = vpack.c.bf16 %v588_v43, %v584_v32  ;;  %v6201_v54 = vpack.c.bf16 %v701_v44, %v697_v35  ;;  %v795_v55 = vmin.bf16 %v7971_v46, %v6195_v47 }
 0x105   :  { %v593_v56 = vpop.f32.mrf.mxu0  ;;  %v706_v57 = vpop.f32.mrf.mxu1  ;;  %5558 = vpow.bf16 %v839_v45  ;;  %v592_v27 = vadd.f32 %v591_v48, %v6126_v24  ;;  %v705_v39 = vadd.f32 %v704_v51, %v6129_v25 }
 0x106   :  { %v5545_v58 = vpop.eup %5544  ;;  %v842_v59 = vmul.bf16 1069105081, %v793_v52  ;;  %v794_v62 = vmin.bf16 %v7971_v46, %v6199_v53  ;;  %v848_v1 = vmul.bf16 1069105081, %v795_v55  ;;  %v796_v2 = vmin.bf16 %v7971_v46, %v6201_v54 }
 0x107   :  { %v5547_v60 = vpop.eup %5546  ;;  %v913_v61 = vadd.bf16 1065369472, %v5545_v58  ;;  %v595_v63 = vpop.f32.mrf.mxu0  ;;  %v594_v55 = vadd.f32 %v593_v56, %v6132_v26 }
 0x108   :  { %v708_v0 = vpop.f32.mrf.mxu1  ;;  %v5549_v3 = vpop.eup %5548  ;;  %v915_v4 = vadd.bf16 1065369472, %v5547_v60  ;;  %5560 = vpow.bf16 %v842_v59  ;;  %v845_v11 = vmul.bf16 1069105081, %v794_v62  ;;  %v596_v14 = vadd.f32 %v595_v63, %v6126_v24 }
 0x109   :  { %v597_v6 = vpop.f32.mrf.mxu0  ;;  %v5551_v9 = vpop.eup %5550  ;;  %v945_v10 = vmul.bf16 %v913_v61, %v913_v61  ;;  %v914_v19 = vadd.bf16 1065369472, %v5549_v3  ;;  %5562 = vpow.bf16 %v848_v1  ;;  %v851_v22 = vmul.bf16 1069105081, %v796_v2 }
 0x10a   :  { %v710_v7 = vpop.f32.mrf.mxu1  ;;  %v947_v23 = vmul.bf16 %v915_v4, %v915_v4  ;;  %v916_v31 = vadd.bf16 1065369472, %v5551_v9  ;;  %v709_v32 = vadd.f32 %v708_v0, %v6129_v25  ;;  %5564 = vpow.bf16 %v845_v11 }
 0x10b   :  { %v6210_v15 = vpop.f32.mrf.mxu0  ;;  %v1009_v34 = vadd.bf16 1065369472, %v945_v10  ;;  %v6220_v35 = vpack.c.bf16 %v596_v14, %v592_v27  ;;  %v946_v38 = vmul.bf16 %v914_v19, %v914_v19  ;;  %5566 = vpow.bf16 %v851_v22 }
 0x10c   :  { %v6212_v16 = vpop.f32.mrf.mxu1  ;;  %v598_v43 = vadd.f32 %v597_v6, %v6132_v26  ;;  %v1011_v44 = vadd.bf16 1065369472, %v947_v23  ;;  %v711_v45 = vadd.f32 %v710_v7, %v6135_v28  ;;  %v948_v52 = vmul.bf16 %v916_v31, %v916_v31 }
 0x10d   :  { %v6215_v29 = vpop.f32.mrf.mxu0  ;;  %v6232_v58 = vpack.c.bf16 %v709_v32, %v705_v39  ;;  %5568 = vrcp.bf16 %v1009_v34  ;;  %v707_v62 = vadd.f32 %v706_v57, %v6135_v28  ;;  %v797_v51 = vmin.bf16 %v7971_v46, %v6220_v35 }
 0x10e   :  { %v6217_v30 = vpop.f32.mrf.mxu1  ;;  %v5553_v33 = vpop.eup %5552  ;;  %v1010_v0 = vadd.bf16 1065369472, %v946_v38  ;;  %v6239_v1 = vpack.c.bf16 %v598_v43, %v594_v55  ;;  %5570 = vrcp.bf16 %v1011_v44  ;;  %v1012_v4 = vadd.bf16 1065369472, %v948_v52 }
 0x10f   :  { %v6222_v36 = vpop.f32.mrf.mxu0  ;;  %8003 = vst [vmem:[#allocation13_spill] sm:$0xff] %v6232_v58  ;;  %v5555_v60 = vpop.eup %5554  ;;  %v917_v61 = vadd.bf16 1065369472, %v5553_v33  ;;  %v6243_v56 = vpack.c.bf16 %v711_v45, %v707_v62  ;;  %v799_v7 = vmin.bf16 %v7971_v46, %v6232_v58  ;;  %v854_v14 = vmul.bf16 1069105081, %v797_v51 }
 0x110   :  { %v6224_v37 = vpop.f32.mrf.mxu1  ;;  %v919_v6 = vadd.bf16 1065369472, %v5555_v60  ;;  %5572 = vrcp.bf16 %v1010_v0  ;;  %v798_v27 = vmin.bf16 %v7971_v46, %v6239_v1  ;;  %v7973_v34 = vmov 1065369472  }
 0x111   :  { %v6229_v48 = vpop.f32.mrf.mxu0  ;;  %v5557_v63 = vpop.eup %5556  ;;  %v949_v57 = vmul.bf16 %v917_v61, %v917_v61  ;;  %v800_v32 = vmin.bf16 %v7971_v46, %v6243_v56  ;;  %v6256_v39 = vsub.bf16 %v945_v10, %v7973_v34  ;;  %5574 = vrcp.bf16 %v1012_v4 }
 0x112   :  { %v6234_v59 = vpop.f32.mrf.mxu1  ;;  %v918_v11 = vadd.bf16 1065369472, %v5557_v63  ;;  %v951_v43 = vmul.bf16 %v919_v6, %v919_v6  ;;  %v860_v44 = vmul.bf16 1069105081, %v799_v7  ;;  %5576 = vpow.bf16 %v854_v14 }
 0x113   :  { %v6241_v2 = vpop.f32.mrf.mxu0  ;;  %v5559_v3 = vpop.eup %5558  ;;  %v1013_v55 = vadd.bf16 1065369472, %v949_v57  ;;  %v6261_v62 = vsub.bf16 %v947_v23, %v7973_v34  ;;  %v6264_v51 = vsub.bf16 %v946_v38, %v7973_v34  ;;  %v857_v0 = vmul.bf16 1069105081, %v798_v27 }
 0x114   :  { %v6247_v9 = vpop.f32.mrf.mxu1  ;;  %v920_v22 = vadd.bf16 1065369472, %v5559_v3  ;;  %v950_v60 = vmul.bf16 %v918_v11, %v918_v11  ;;  %v6269_v4 = vsub.bf16 %v948_v52, %v7973_v34  ;;  %v6272_v6 = vsub.bf16 %v949_v57, %v7973_v34 }
 0x115   :  { %v6251_v31 = vpop.f32.mrf.mxu0  ;;  %v863_v11 = vmul.bf16 1069105081, %v800_v32  ;;  %v6275_v23 = vsub.bf16 %v951_v43, %v7973_v34  ;;  %5578 = vpow.bf16 %v860_v44  ;;  %v606_v38 = vadd.f32 %v6222_v36, %v6126_v24 }
 0x116   :  { %v5561_v19 = vpop.eup %5560  ;;  %v6258_v45 = vpop.f32.mrf.mxu1  ;;  %v952_v63 = vmul.bf16 %v920_v22, %v920_v22  ;;  %5580 = vrcp.bf16 %v1013_v55  ;;  %v1014_v27 = vadd.bf16 1065369472, %v950_v60  ;;  %v719_v57 = vadd.f32 %v6224_v37, %v6129_v25 }
 0x117   :  { %v5563_v33 = vpop.eup %5562  ;;  %v921_v61 = vadd.bf16 1065369472, %v5561_v19  ;;  %v6266_v3 = vpop.f32.mrf.mxu0  ;;  %v1015_v19 = vadd.bf16 1065369472, %v951_v43  ;;  %5582 = vpow.bf16 %v857_v0  ;;  %v602_v32 = vadd.f32 %v6210_v15, %v6126_v24 }
 0x118   :  { %v5565_v10 = vpop.eup %5564  ;;  %v923_v7 = vadd.bf16 1065369472, %v5563_v33  ;;  %v6279_v22 = vpop.f32.mrf.mxu1  ;;  %v1016_v46 = vadd.bf16 1065369472, %v952_v63  ;;  %5584 = vpow.bf16 %v863_v11  ;;  %v715_v36 = vadd.f32 %v6212_v16, %v6129_v25 }
 0x119   :  { %v5567_v14 = vpop.eup %5566  ;;  %v953_v52 = vmul.bf16 %v921_v61, %v921_v61  ;;  %v922_v33 = vadd.bf16 1065369472, %v5565_v10  ;;  %v6285_v34 = vpop.f32.mrf.mxu0  ;;  %5586 = vrcp.bf16 %v1015_v19  ;;  %v8004_v55 = vmov 1065369472  }
 0x11a   :  { %v955_v44 = vmul.bf16 %v923_v7, %v923_v7  ;;  %v924_v21 = vadd.bf16 1065369472, %v5567_v14  ;;  %v6290_v61 = vsub.bf16 %v950_v60, %v8004_v55  ;;  %v6292_v37 = vpack.c.bf16 %v606_v38, %v602_v32  ;;  %v6296_v10 = vpop.f32.mrf.mxu1 }
 0x11b   :  { %v5569_v43 = vpop.eup %5568  ;;  %v608_v0 = vadd.f32 %v6229_v48, %v6132_v26  ;;  %v6299_v18 = vsub.bf16 %v952_v63, %v8004_v55  ;;  %v1017_v7 = vadd.bf16 1065369472, %v953_v52  ;;  %v604_v11 = vadd.f32 %v6215_v29, %v6132_v26  ;;  %v6308_v48 = vpop.f32.mrf.mxu0 }
 0x11c   :  { %8005 = vst [vmem:[#allocation14_spill] sm:$0xff] %v6292_v37  ;;  %v5571_v15 = vpop.eup %5570  ;;  %v6303_v16 = vpack.c.bf16 %v719_v57, %v715_v36  ;;  %v1042_v60 = vmul.bf16 %v5569_v43, %v6256_v39  ;;  %5588 = vrcp.bf16 %v1014_v27  ;;  %v954_v14 = vmul.bf16 %v922_v33, %v922_v33 }
 0x11d   :  { %v721_v19 = vadd.f32 %v6234_v59, %v6135_v28  ;;  %5590 = vrcp.bf16 %v1016_v46  ;;  %v1019_v38 = vadd.bf16 1065369472, %v955_v44  ;;  %v956_v32 = vmul.bf16 %v924_v21, %v924_v21  ;;  %v6320_v59 = vpop.f32.mrf.mxu1 }
 0x11e   :  { %8006 = vst [vmem:[#allocation15_spill] sm:$0xff] %v6303_v16  ;;  %v6310_v63 = vpack.c.bf16 %v608_v0, %v604_v11  ;;  %v5573_v20 = vpop.eup %5572  ;;  %v1046_v17 = vmul.bf16 %v5571_v15, %v6261_v62  ;;  %v6314_v29 = vsub.bf16 %v953_v52, %v8004_v55  ;;  %v717_v39 = vadd.f32 %v6217_v30, %v6135_v28  ;;  %v6337_v0 = vpop.f32.mrf.mxu0 }
 0x11f   :  { %v8008_v27 = vmov 1101021600   ;;  %5592 = vrcp.bf16 %v1017_v7  ;;  %v6323_v46 = vsub.bf16 %v955_v44, %v8004_v55  ;;  %v6329_v52 = vpop.eup %5574  ;;  %v1105_v33 = vmul.bf16 %v1042_v60, %v6143_v40 }
 0x120   :  { %8007 = vst [vmem:[#allocation16_spill] sm:$0xff] %v6310_v63  ;;  %v801_v57 = vmin.bf16 %v8008_v27, %v6292_v37  ;;  %v803_v21 = vmin.bf16 %v8008_v27, %v6303_v16  ;;  %v802_v62 = vmin.bf16 %v8008_v27, %v6310_v63  ;;  %v6333_v30 = vsub.bf16 %v954_v14, %v8004_v55  ;;  %v5577_v44 = vpop.eup %5576 }
 0x121   :  { %v1018_v43 = vadd.bf16 1065369472, %v954_v14  ;;  %v6335_v36 = vpack.c.bf16 %v721_v19, %v717_v39  ;;  %v1044_v15 = vmul.bf16 %v5573_v20, %v6264_v51  ;;  %5594 = vrcp.bf16 %v1019_v38  ;;  %v6346_v14 = vpop.f32.mrf.mxu1 }
 0x122   :  { %v1020_v7 = vadd.bf16 1065369472, %v956_v32  ;;  %v869_v11 = vmul.bf16 1069105081, %v802_v62  ;;  %v1107_v16 = vmul.bf16 %v1046_v17, %v6145_v41  ;;  %v6342_v37 = vsub.bf16 %v956_v32, %v8004_v55  ;;  %v625_v32 = vpop.f32.mrf.mxu0 }
 0x123   :  { %8009 = vst [vmem:[#allocation17_spill] sm:$0xff] %v6335_v36  ;;  %v866_v40 = vmul.bf16 1069105081, %v801_v57  ;;  %v804_v60 = vmin.bf16 %v8008_v27, %v6335_v36  ;;  %v872_v19 = vmul.bf16 1069105081, %v803_v21  ;;  %v612_v39 = vadd.f32 %v6241_v2, %v6126_v24  ;;  %v6352_v51 = vpop.eup %5578 }
 0x124   :  { %5596 = vpow.bf16 %v869_v11  ;;  %v616_v20 = vadd.f32 %v6266_v3, %v6126_v24  ;;  %v925_v41 = vadd.bf16 1065369472, %v5577_v44  ;;  %v6356_v57 = vpop.eup %5580  ;;  %v7986_v62 = vmov 1086341312  }
 0x125   :  { %5598 = vrcp.bf16 %v1018_v43  ;;  %v875_v38 = vmul.bf16 1069105081, %v804_v60  ;;  %v6359_v21 = vmin.bf16 %v7986_v62, %v1105_v33  ;;  %v6362_v2 = vmul.bf16 %v1044_v15, %v6153_v49  ;;  %v5583_v11 = vpop.eup %5582  ;;  %v738_v60 = vpop.f32.mrf.mxu1 }
 0x126   :  { %5600 = vrcp.bf16 %v1020_v7  ;;  %v6364_v3 = vpack.c.bf16 %v616_v20, %v612_v39  ;;  %v6367_v58 = vmin.bf16 %v7986_v62, %v1107_v16  ;;  %v725_v43 = vadd.f32 %v6247_v9, %v6129_v25  ;;  %v5585_v33 = vpop.eup %5584  ;;  %v627_v39 = vpop.f32.mrf.mxu0 }
 0x127   :  { %5602 = vpow.bf16 %v866_v40  ;;  %v729_v44 = vadd.f32 %v6279_v22, %v6129_v25  ;;  %v614_v49 = vadd.f32 %v6251_v31, %v6132_v26  ;;  %v618_v16 = vadd.f32 %v6285_v34, %v6132_v26  ;;  %v6379_v7 = vpop.eup %5586 }
 0x128   :  { %8010 = vst [vmem:[#allocation18_spill] sm:$0xff] %v6364_v3  ;;  %5604 = vpow.bf16 %v872_v19  ;;  %v805_v15 = vmin.bf16 %v8008_v27, %v6364_v3  ;;  %v6381_v40 = vmul.bf16 %v925_v41, %v925_v41  ;;  %v927_v9 = vadd.bf16 1065369472, %v6352_v51 }
 0x129   :  { %5606 = vpow.bf16 %v875_v38  ;;  %v6384_v22 = vpack.c.bf16 %v729_v44, %v725_v43  ;;  %v926_v19 = vadd.bf16 1065369472, %v5583_v11  ;;  %v727_v31 = vadd.f32 %v6258_v45, %v6135_v28  ;;  %v740_v43 = vpop.f32.mrf.mxu1 }
 0x12a   :  { %v6388_v20 = vpack.c.bf16 %v618_v16, %v614_v49  ;;  %v731_v62 = vadd.f32 %v6296_v10, %v6135_v28  ;;  %v6392_v34 = vpop.eup %5588  ;;  %v1050_v41 = vmul.bf16 %v6356_v57, %v6272_v6  ;;  %v928_v17 = vadd.bf16 1065369472, %v5585_v33  ;;  %v631_v16 = vpop.f32.mrf.mxu0 }
 0x12b   :  { %8011 = vst [vmem:[#allocation19_spill] sm:$0xff] %v6384_v22  ;;  %v878_v51 = vmul.bf16 1069105081, %v805_v15  ;;  %v807_v38 = vmin.bf16 %v8008_v27, %v6384_v22  ;;  %v6398_v11 = vpop.eup %5590  ;;  %v622_v10 = vadd.f32 %v6308_v48, %v6126_v24  ;;  %v735_v49 = vadd.f32 %v6320_v59, %v6129_v25 }
 0x12c   :  { %8012 = vst [vmem:[#allocation20_spill] sm:$0xff] %v6388_v20  ;;  %v806_v45 = vmin.bf16 %v8008_v27, %v6388_v20  ;;  %v6402_v44 = vpack.c.bf16 %v731_v62, %v727_v31  ;;  %v626_v57 = vadd.f32 %v625_v32, %v6126_v24  ;;  %v739_v33 = vadd.f32 %v738_v60, %v6129_v25 }
 0x12d   :  { %v884_v6 = vmul.bf16 1069105081, %v807_v38  ;;  %v628_v15 = vadd.f32 %v627_v39, %v6132_v26  ;;  %v6411_v22 = vpop.eup %5592  ;;  %v6413_v3 = vmul.bf16 %v926_v19, %v926_v19  ;;  %v624_v48 = vadd.f32 %v6337_v0, %v6132_v26  ;;  %v744_v39 = vpop.f32.mrf.mxu1 }
 0x12e   :  { %8013 = vst [vmem:[#allocation21_spill] sm:$0xff] %v6402_v44  ;;  %v881_v62 = vmul.bf16 1069105081, %v806_v45  ;;  %v808_v31 = vmin.bf16 %v8008_v27, %v6402_v44  ;;  %v6419_v59 = vmul.bf16 %v928_v17, %v928_v17  ;;  %5608 = vpow.bf16 %v878_v51  ;;  %v6436_v51 = vpop.f32.mrf.mxu0 }
 0x12f   :  { %v6421_v32 = vpack.c.bf16 %v626_v57, %v622_v10  ;;  %v6423_v60 = vpack.c.bf16 %v739_v33, %v735_v49  ;;  %v6425_v38 = vpop.eup %5594  ;;  %v6427_v20 = vpack.c.bf16 %v628_v15, %v624_v48  ;;  %v741_v45 = vadd.f32 %v740_v43, %v6135_v28  ;;  %v6450_v15 = vpop.f32.mrf.mxu1 }
 0x130   :  { %5610 = vpow.bf16 %v881_v62  ;;  %v887_v19 = vmul.bf16 1069105081, %v808_v31  ;;  %v1054_v44 = vmul.bf16 %v6379_v7, %v6275_v23  ;;  %v6432_v0 = vmul.bf16 %v927_v9, %v927_v9 }
 0x131   :  { %8014 = vst [vmem:[#allocation22_spill] sm:$0xff] %v6421_v32  ;;  %8015 = vst [vmem:[#allocation23_spill] sm:$0xff] %v6423_v60  ;;  %5612 = vpow.bf16 %v884_v6  ;;  %v809_v17 = vmin.bf16 %v8008_v27, %v6421_v32  ;;  %v1022_v49 = vadd.bf16 1065369472, %v6413_v3  ;;  %v737_v57 = vadd.f32 %v6346_v14, %v6135_v28 }
 0x132   :  { %8016 = vst [vmem:[#allocation24_spill] sm:$0xff] %v6427_v20  ;;  %v5597_v10 = vpop.eup %5596  ;;  %5614 = vpow.bf16 %v887_v19  ;;  %v810_v43 = vmin.bf16 %v8008_v27, %v6427_v20  ;;  %v1052_v23 = vmul.bf16 %v6392_v34, %v6290_v61  ;;  %v1024_v7 = vadd.bf16 1065369472, %v6419_v59 }
 0x133   :  { %v6443_v33 = vpop.eup %5598  ;;  %v930_v9 = vadd.bf16 1065369472, %v5597_v10  ;;  %v811_v6 = vmin.bf16 %v8008_v27, %v6423_v60  ;;  %v8017_v14 = vmul.bf16 %v6329_v52, %v6269_v4  ;;  %v6460_v48 = vsub.bf16 %v6381_v40, %v8004_v55 }
 0x134   :  { %v6452_v62 = vpop.eup %5600  ;;  %v1021_v61 = vadd.bf16 1065369472, %v6381_v40  ;;  %v6463_v34 = vpack.c.bf16 %v741_v45, %v737_v57  ;;  %v6466_v10 = vmul.bf16 %v1050_v41, %v6167_v5  ;;  %v6470_v60 = vsub.bf16 %v6432_v0, %v8004_v55 }
 0x135   :  { %v1108_v31 = vmul.bf16 %v8017_v14, %v6155_v50  ;;  %v5603_v19 = vpop.eup %5602  ;;  %v1023_v32 = vadd.bf16 1065369472, %v6432_v0  ;;  %v890_v4 = vmul.bf16 1069105081, %v809_v17  ;;  %v635_v50 = vpop.f32.mrf.mxu0  ;;  %v6474_v14 = vmul.bf16 %v1054_v44, %v6171_v8 }
 0x136   :  { %v5605_v52 = vpop.eup %5604  ;;  %v1056_v40 = vmul.bf16 %v6398_v11, %v6299_v18  ;;  %5616 = vrcp.bf16 %v1022_v49  ;;  %v893_v45 = vmul.bf16 1069105081, %v810_v43  ;;  %v6479_v5 = vmul.bf16 %v1052_v23, %v6175_v12  ;;  %v748_v0 = vpop.f32.mrf.mxu1  ;;  %v5224_v49 = vld [vmem:[#allocation2 + $0xe8] ss:$16 sps:$4 sm:$0xff]  }
 0x137   :  { %v5607_v57 = vpop.eup %5606  ;;  %5618 = vrcp.bf16 %v1024_v7  ;;  %v6481_v41 = vmul.bf16 %v930_v9, %v930_v9  ;;  %v896_v20 = vmul.bf16 1069105081, %v811_v6  ;;  %v929_v17 = vadd.bf16 1065369472, %v5603_v19  ;;  %v5227_v43 = vld [vmem:[#allocation2 + $0x2e8] ss:$16 sps:$4 sm:$0xff]   ;;  %v637_v23 = vpop.f32.mrf.mxu0 }
 0x138   :  { %v932_v36 = vadd.bf16 1065369472, %v5607_v57  ;;  %v812_v8 = vmin.bf16 %v8008_v27, %v6463_v34  ;;  %v632_v44 = vadd.f32 %v631_v16, %v6126_v24  ;;  %v931_v63 = vadd.bf16 1065369472, %v5605_v52  ;;  %v5232_v19 = vld [vmem:[#allocation2 + $0xcc] ss:$16 sps:$4 sm:$0xff]   ;;  %v750_v52 = vpop.f32.mrf.mxu1 }
 0x139   :  { %5620 = vpow.bf16 %v890_v4  ;;  %v8018_v18 = vmov 1086341312   ;;  %v745_v6 = vadd.f32 %v744_v39, %v6129_v25  ;;  %v5235_v16 = vld [vmem:[#allocation2 + $0x2cc] ss:$16 sps:$4 sm:$0xff]   ;;  %v1026_v4 = vadd.bf16 1065369472, %v6481_v41 }
 0x13a   :  { %v6488_v11 = vmin.bf16 %v8018_v18, %v6362_v2  ;;  %v6491_v12 = vmin.bf16 %v8018_v18, %v1108_v31  ;;  %v6493_v7 = vmul.bf16 %v932_v36, %v932_v36  ;;  %5622 = vpow.bf16 %v893_v45 }
 0x13b   :  { %v899_v9 = vmul.bf16 1069105081, %v812_v8  ;;  %5624 = vpow.bf16 %v896_v20  ;;  %v636_v2 = vadd.f32 %v635_v50, %v6126_v24  ;;  %v749_v31 = vadd.f32 %v748_v0, %v6129_v25  ;;  %v5233_v50 = vld [vmem:[#allocation2 + $0x2c8] ss:$16 sps:$4 sm:$0xff]  }
 0x13c   :  { %1862 = vmatprep.mubr.bf16.mxu0 %v6488_v11  ;;  %1975 = vmatprep.mubr.bf16.mxu1 %v6491_v12  ;;  %v6502_v36 = vmul.bf16 %v1056_v40, %v6177_v13  ;;  %v1028_v45 = vadd.bf16 1065369472, %v6493_v7  ;;  %v638_v20 = vadd.f32 %v637_v23, %v6132_v26  ;;  %v5609_v39 = vpop.eup %5608  ;;  %v1058_v57 = vmul.bf16 %v6411_v22, %v6314_v29  ;;  %v5230_v13 = vld [vmem:[#allocation2 + $0xc8] ss:$16 sps:$4 sm:$0xff]  }
 0x13d   :  { %5626 = vpow.bf16 %v899_v9  ;;  %1863 = vmatmul.mubr.bf16.vlgmr.msra.gmra.mxu0 %v6359_v21  ;;  %1976 = vmatmul.mubr.bf16.vlgmr.msra.gmra.mxu1 %v6367_v58  ;;  %v6510_v24 = vpack.c.bf16 %v636_v2, %v632_v44  ;;  %v6512_v25 = vpack.c.bf16 %v749_v31, %v745_v6  ;;  %v6514_v0 = vmul.bf16 %v929_v17, %v929_v17 }
 0x13e   :  { %5628 = vrcp.bf16 %v1021_v61  ;;  %2057 = vmatpush1.bf16.msra.mxu0 %v5224_v49  ;;  %2170 = vmatpush1.bf16.msra.mxu1 %v5227_v43  ;;  %v5611_v40 = vpop.eup %5610  ;;  %v634_v8 = vadd.f32 %v6436_v51, %v6132_v26  ;;  %v751_v23 = vadd.f32 %v750_v52, %v6135_v28  ;;  %v5238_v61 = vld [vmem:[#allocation2 + $0xac] ss:$16 sps:$4 sm:$0xff]   ;;  %v6519_v44 = vmul.bf16 %v931_v63, %v931_v63 }
 0x13f   :  { %5630 = vrcp.bf16 %v1023_v32  ;;  %2058 = vmatprep.subr.bf16.mxu0 %v5232_v19  ;;  %2171 = vmatprep.subr.bf16.mxu1 %v5235_v16  ;;  %v5241_v49 = vld [vmem:[#allocation2 + $0x2ac] ss:$16 sps:$4 sm:$0xff]   ;;  %v5613_v43 = vpop.eup %5612  ;;  %v934_v9 = vadd.bf16 1065369472, %v5611_v40  ;;  %v813_v6 = vmin.bf16 %v8008_v27, %v6510_v24  ;;  %v747_v17 = vadd.f32 %v6450_v15, %v6135_v28  ;;  %v5236_v19 = vld [vmem:[#allocation2 + $0xa8] ss:$16 sps:$4 sm:$0xff]  }
 0x140   :  { %5632 = vrcp.bf16 %v1026_v4  ;;  %v5615_v32 = vpop.eup %5614  ;;  %v815_v26 = vmin.bf16 %v8008_v27, %v6512_v25  ;;  %v6527_v51 = vpack.c.bf16 %v638_v20, %v634_v8  ;;  %v5239_v16 = vld [vmem:[#allocation2 + $0x2a8] ss:$16 sps:$4 sm:$0xff]   ;;  %v933_v2 = vadd.bf16 1065369472, %v5609_v39  ;;  %v5244_v20 = vld [vmem:[#allocation2 + $0x8c] ss:$16 sps:$4 sm:$0xff]  }
 0x141   :  { %5634 = vrcp.bf16 %v1028_v45  ;;  %v6529_v63 = vmul.bf16 %v934_v9, %v934_v9  ;;  %v936_v4 = vadd.bf16 1065369472, %v5615_v32  ;;  %v902_v31 = vmul.bf16 1069105081, %v813_v6  ;;  %v5245_v32 = vld [vmem:[#allocation2 + $0x288] ss:$16 sps:$4 sm:$0xff]  }
 0x142   :  { %2059 = vmatpush1.bf16.msra.mxu0 %v5230_v13  ;;  %2172 = vmatpush1.bf16.msra.mxu1 %v5233_v50  ;;  %v6533_v52 = vsub.bf16 %v6413_v3, %v8004_v55  ;;  %v935_v45 = vadd.bf16 1065369472, %v5613_v43  ;;  %v908_v28 = vmul.bf16 1069105081, %v815_v26  ;;  %v6535_v15 = vpack.c.bf16 %v751_v23, %v747_v17  ;;  %v5247_v13 = vld [vmem:[#allocation2 + $0x28c] ss:$16 sps:$4 sm:$0xff]  }
 0x143   :  { %2060 = vmatprep.subr.bf16.mxu0 %v5238_v61  ;;  %2173 = vmatprep.subr.bf16.mxu1 %v5241_v49  ;;  %v1060_v39 = vmul.bf16 %v6443_v33, %v6333_v30  ;;  %v1030_v40 = vadd.bf16 1065369472, %v6529_v63  ;;  %v6540_v8 = vmul.bf16 %v936_v4, %v936_v4  ;;  %5636 = vpow.bf16 %v902_v31  ;;  %v5250_v17 = vld [vmem:[#allocation2 + $0x6c] ss:$16 sps:$4 sm:$0xff]  }
 0x144   :  { %v5617_v50 = vpop.eup %5616  ;;  %v1064_v3 = vmul.bf16 %v6452_v62, %v6342_v37  ;;  %v1025_v43 = vadd.bf16 1065369472, %v6514_v0  ;;  %v814_v23 = vmin.bf16 %v8008_v27, %v6527_v51  ;;  %v6549_v61 = vmin.bf16 %v8018_v18, %v6479_v5  ;;  %v5242_v37 = vld [vmem:[#allocation2 + $0x88] ss:$16 sps:$4 sm:$0xff]  }
 0x145   :  { %v5619_v30 = vpop.eup %5618  ;;  %v1027_v33 = vadd.bf16 1065369472, %v6519_v44  ;;  %v6552_v49 = vmul.bf16 %v933_v2, %v933_v2  ;;  %5638 = vrcp.bf16 %v1030_v40  ;;  %v1032_v9 = vadd.bf16 1065369472, %v6540_v8 }
 0x146   :  { %2061 = vmatpush1.bf16.msra.mxu0 %v5236_v19  ;;  %2174 = vmatpush1.bf16.msra.mxu1 %v5239_v16  ;;  %v1062_v62 = vmul.bf16 %v6425_v38, %v6323_v46  ;;  %v6557_v6 = vmul.bf16 %v935_v45, %v935_v45  ;;  %5640 = vpow.bf16 %v908_v28  ;;  %v816_v5 = vmin.bf16 %v8008_v27, %v6535_v15  ;;  %v5253_v38 = vld [vmem:[#allocation2 + $0x26c] ss:$16 sps:$4 sm:$0xff]   ;;  %v5248_v28 = vld [vmem:[#allocation2 + $0x68] ss:$16 sps:$4 sm:$0xff]  }
 0x147   :  { %1872 = vmatprep.mubr.bf16.mxu0 %v6549_v61  ;;  %2062 = vmatprep.subr.bf16.mxu0 %v5244_v20  ;;  %v6562_v26 = vpop.eup %5620  ;;  %v1114_v19 = vmul.bf16 %v1060_v39, %v6199_v53  ;;  %v992_v16 = vsub.bf16 %v6419_v59, %v8004_v55  ;;  %5642 = vrcp.bf16 %v1032_v9  ;;  %v6569_v46 = vmin.bf16 %v8018_v18, %v6502_v36  ;;  %v5251_v36 = vld [vmem:[#allocation2 + $0x268] ss:$16 sps:$4 sm:$0xff]  }
 0x148   :  { %2175 = vmatprep.subr.bf16.mxu1 %v5247_v13  ;;  %v5623_v2 = vpop.eup %5622  ;;  %v1116_v4 = vmul.bf16 %v1064_v3, %v6201_v54  ;;  %v1068_v31 = vmul.bf16 %v5617_v50, %v6533_v52  ;;  %5644 = vrcp.bf16 %v1025_v43  ;;  %v905_v45 = vmul.bf16 1069105081, %v814_v23  ;;  %v5256_v50 = vld [vmem:[#allocation2 + $0x4c] ss:$16 sps:$4 sm:$0xff]  }
 0x149   :  { %v5625_v20 = vpop.eup %5624  ;;  %v1072_v53 = vmul.bf16 %v5619_v30, %v992_v16  ;;  %5646 = vrcp.bf16 %v1027_v33  ;;  %v1029_v59 = vadd.bf16 1065369472, %v6552_v49  ;;  %v938_v39 = vadd.bf16 1065369472, %v5623_v2  ;;  %1985 = vmatprep.mubr.bf16.mxu1 %v6569_v46 }
 0x14a   :  { %2063 = vmatpush1.bf16.msra.mxu0 %v5242_v37  ;;  %v1031_v13 = vadd.bf16 1065369472, %v6557_v6  ;;  %v911_v9 = vmul.bf16 1069105081, %v816_v5  ;;  %v6578_v54 = vmin.bf16 %v8018_v18, %v6466_v10  ;;  %v6582_v52 = vmin.bf16 %v8018_v18, %v6474_v14  ;;  %2176 = vmatpush1.bf16.msra.mxu1 %v5245_v32  ;;  %v5259_v10 = vld [vmem:[#allocation2 + $0x24c] ss:$16 sps:$4 sm:$0xff]  }
 0x14b   :  { %v5627_v40 = vpop.eup %5626  ;;  %2064 = vmatprep.subr.bf16.mxu0 %v5250_v17  ;;  %v937_v43 = vadd.bf16 1065369472, %v6562_v26  ;;  %v6587_v23 = vmul.bf16 %v938_v39, %v938_v39  ;;  %v6590_v33 = vmin.bf16 %v8018_v18, %v1114_v19  ;;  %2177 = vmatprep.subr.bf16.mxu1 %v5253_v38  ;;  %v1118_v14 = vmul.bf16 %v1068_v31, %v6239_v1  ;;  %v5254_v1 = vld [vmem:[#allocation2 + $0x48] ss:$16 sps:$4 sm:$0xff]  }
 0x14c   :  { %v6584_v3 = vpop.eup %5628  ;;  %v940_v30 = vadd.bf16 1065369472, %v5627_v40  ;;  %v939_v5 = vadd.bf16 1065369472, %v5625_v20  ;;  %5648 = vpow.bf16 %v905_v45  ;;  %1873 = vmatmul.mubr.bf16.gmra.mxu0 %v6578_v54  ;;  %1986 = vmatmul.mubr.bf16.gmra.mxu1 %v6582_v52  ;;  %v6598_v32 = vmin.bf16 %v8018_v18, %v1116_v4  ;;  %v5257_v31 = vld [vmem:[#allocation2 + $0x248] ss:$16 sps:$4 sm:$0xff]  }
 0x14d   :  { %v6592_v37 = vpop.eup %5630  ;;  %v1120_v26 = vmul.bf16 %v1072_v53, %v6243_v56  ;;  %5650 = vrcp.bf16 %v1029_v59  ;;  %v1034_v19 = vadd.bf16 1065369472, %v6587_v23  ;;  %1882 = vmatprep.mubr.bf16.mxu0 %v6590_v33  ;;  %v1113_v2 = vmul.bf16 %v1058_v57, %v6191_v42  ;;  %v5262_v45 = vld [vmem:[#allocation2 + $0x2c] ss:$16 sps:$4 sm:$0xff]   ;;  %v5263_v40 = vld [vmem:[#allocation2 + $0x228] ss:$16 sps:$4 sm:$0xff]  }
 0x14e   :  { %v5633_v17 = vpop.eup %5632  ;;  %v6602_v16 = vmul.bf16 %v940_v30, %v940_v30  ;;  %2065 = vmatpush1.bf16.msra.mxu0 %v5248_v28  ;;  %v1115_v4 = vmul.bf16 %v1062_v62, %v6195_v47  ;;  %v994_v56 = vsub.bf16 %v6481_v41, %v8004_v55  ;;  %5652 = vpow.bf16 %v911_v9  ;;  %1995 = vmatprep.mubr.bf16.mxu1 %v6598_v32  ;;  %v5265_v42 = vld [vmem:[#allocation2 + $0x22c] ss:$16 sps:$4 sm:$0xff]  }
 0x14f   :  { %v5635_v38 = vpop.eup %5634  ;;  %2178 = vmatpush1.bf16.msra.mxu1 %v5251_v36  ;;  %v996_v28 = vsub.bf16 %v6493_v7, %v8004_v55  ;;  %5654 = vrcp.bf16 %v1031_v13  ;;  %v6615_v20 = vmul.bf16 %v937_v43, %v937_v43  ;;  %2066 = vmatprep.subr.bf16.mxu0 %v5256_v50  ;;  %v1066_v47 = vmul.bf16 %v6584_v3, %v6460_v48  ;;  %v5260_v36 = vld [vmem:[#allocation2 + $0x28] ss:$16 sps:$4 sm:$0xff]   ;;  %v5268_v13 = vld [vmem:[#allocation2 + $0xc] ss:$16 sps:$4 sm:$0xff]  }
 0x150   :  { %v1036_v29 = vadd.bf16 1065369472, %v6602_v16  ;;  %2179 = vmatprep.subr.bf16.mxu1 %v5259_v10  ;;  %v1076_v22 = vmul.bf16 %v5633_v17, %v994_v56  ;;  %v6620_v41 = vmul.bf16 %v939_v5, %v939_v5  ;;  %5656 = vrcp.bf16 %v1034_v19  ;;  %v5271_v43 = vld [vmem:[#allocation2 + $0x20c] ss:$16 sps:$4 sm:$0xff]   ;;  %v8020_v17 = vld [vmem:[#allocation17_spill] sm:$0xff] }
 0x151   :  { %v5637_v57 = vpop.eup %5636  ;;  %v1080_v62 = vmul.bf16 %v5635_v38, %v996_v28  ;;  %v6623_v7 = vmin.bf16 %v8018_v18, %v1118_v14  ;;  %v6626_v53 = vmin.bf16 %v8018_v18, %v1120_v26  ;;  %v1070_v59 = vmul.bf16 %v6592_v37, %v6470_v60  ;;  %v8019_v14 = vld [vmem:[#allocation16_spill] sm:$0xff]  ;;  %v8021_v38 = vld [vmem:[#allocation13_spill] sm:$0xff] }
 0x152   :  { %5658 = vrcp.bf16 %v1036_v29  ;;  %2067 = vmatpush1.bf16.msra.mxu0 %v5254_v1  ;;  %v6631_v39 = vmin.bf16 %v8018_v18, %v1113_v2  ;;  %v6634_v48 = vmin.bf16 %v8018_v18, %v1115_v4  ;;  %v1033_v50 = vadd.bf16 1065369472, %v6615_v20 }
 0x153   :  { %2180 = vmatpush1.bf16.msra.mxu1 %v5257_v31  ;;  %2068 = vmatprep.subr.bf16.mxu0 %v5262_v45  ;;  %v5639_v9 = vpop.eup %5638  ;;  %v941_v3 = vadd.bf16 1065369472, %v5637_v57  ;;  %v1035_v60 = vadd.bf16 1065369472, %v6620_v41  ;;  %v1117_v37 = vmul.bf16 %v1066_v47, %v6220_v35  ;;  %v1122_v5 = vmul.bf16 %v1076_v22, %v8019_v14  ;;  %v5266_v35 = vld [vmem:[#allocation2 + $0x8] ss:$16 sps:$4 sm:$0xff]  }
 0x154   :  { %2181 = vmatprep.subr.bf16.mxu1 %v5265_v42  ;;  %v5641_v30 = vpop.eup %5640  ;;  %1883 = vmatmul.mubr.bf16.gmra.mxu0 %v6631_v39  ;;  %v1124_v26 = vmul.bf16 %v1080_v62, %v8020_v17  ;;  %v1119_v2 = vmul.bf16 %v1070_v59, %v8021_v38  ;;  %v998_v4 = vsub.bf16 %v6529_v63, %v8004_v55  ;;  %v5269_v31 = vld [vmem:[#allocation2 + $0x208] ss:$16 sps:$4 sm:$0xff]   ;;  %5660 = vrcp.bf16 %v1033_v50  ;;  %v5274_v63 = vld [vmem:[#allocation2 + $0x1ec] ss:$16 sps:$4 sm:$0xff]   ;;  %v8023_v17 = vld [vmem:[#allocation21_spill] sm:$0xff] }
 0x155   :  { %1996 = vmatmul.mubr.bf16.gmra.mxu1 %v6634_v48  ;;  %v5643_v10 = vpop.eup %5642  ;;  %v943_v19 = vadd.bf16 1065369472, %v5641_v30  ;;  %1892 = vmatprep.mubr.bf16.mxu0 %v6623_v7  ;;  %v1000_v56 = vsub.bf16 %v6540_v8, %v8004_v55  ;;  %v993_v28 = vsub.bf16 %v6514_v0, %v8004_v55  ;;  %v995_v29 = vsub.bf16 %v6519_v44, %v8004_v55  ;;  %v5277_v47 = vld [vmem:[#allocation2 + $0x3ec] ss:$16 sps:$4 sm:$0xff]   ;;  %v5275_v50 = vld [vmem:[#allocation2 + $0x3e8] ss:$16 sps:$4 sm:$0xff]  }
 0x156   :  { %2005 = vmatprep.mubr.bf16.mxu1 %v6626_v53  ;;  %v5645_v1 = vpop.eup %5644  ;;  %2069 = vmatpush1.bf16.msra.mxu0 %v5260_v36  ;;  %v6654_v42 = vmul.bf16 %v941_v3, %v941_v3  ;;  %v1084_v22 = vmul.bf16 %v5639_v9, %v998_v4  ;;  %5662 = vrcp.bf16 %v1035_v60  ;;  %v6659_v59 = vmin.bf16 %v8018_v18, %v1122_v5  ;;  %v5272_v9 = vld [vmem:[#allocation2 + $0x1e8] ss:$16 sps:$4 sm:$0xff]   ;;  %v5280_v3 = vld [vmem:[#allocation2 + $0x1cc] ss:$16 sps:$4 sm:$0xff]  }
 0x157   :  { %2182 = vmatpush1.bf16.msra.mxu1 %v5263_v40  ;;  %v5647_v45 = vpop.eup %5646  ;;  %2070 = vmatprep.subr.bf16.mxu0 %v5268_v13  ;;  %v1088_v8 = vmul.bf16 %v5643_v10, %v1000_v56  ;;  %v6656_v57 = vmul.bf16 %v943_v19, %v943_v19  ;;  %v1074_v62 = vmul.bf16 %v5645_v1, %v993_v28  ;;  %v5283_v10 = vld [vmem:[#allocation2 + $0x3cc] ss:$16 sps:$4 sm:$0xff]   ;;  %v8025_v28 = vld [vmem:[#allocation15_spill] sm:$0xff] }
 0x158   :  { %2183 = vmatprep.subr.bf16.mxu1 %v5271_v43  ;;  %v6662_v0 = vmin.bf16 %v8018_v18, %v1124_v26  ;;  %v1078_v36 = vmul.bf16 %v5647_v45, %v995_v29  ;;  %v6665_v40 = vmin.bf16 %v8018_v18, %v1117_v37  ;;  %v6668_v13 = vmin.bf16 %v8018_v18, %v1119_v2  ;;  %v8022_v5 = vld [vmem:[#allocation20_spill] sm:$0xff] }
 0x159   :  { %v1037_v30 = vadd.bf16 1065369472, %v6654_v42  ;;  %v1126_v37 = vmul.bf16 %v1084_v22, %v8022_v5  ;;  %v1128_v26 = vmul.bf16 %v1088_v8, %v8023_v17  ;;  %v1039_v19 = vadd.bf16 1065369472, %v6656_v57  ;;  %v5287_v5 = vld [vmem:[#allocation2 + $0x3a8] ss:$16 sps:$4 sm:$0xff]  }
 0x15a   :  { %v5649_v44 = vpop.eup %5648  ;;  %2071 = vmatpush1.bf16.msra.mxu0 %v5266_v35  ;;  %v997_v38 = vsub.bf16 %v6552_v49, %v8004_v55  ;;  %v999_v2 = vsub.bf16 %v6557_v6, %v8004_v55  ;;  %v1123_v29 = vmul.bf16 %v1078_v36, %v8025_v28  ;;  %v5278_v49 = vld [vmem:[#allocation2 + $0x1c8] ss:$16 sps:$4 sm:$0xff]   ;;  %v1004_v22 = vsub.bf16 %v6602_v16, %v8004_v55  ;;  %v5289_v36 = vld [vmem:[#allocation2 + $0x3ac] ss:$16 sps:$4 sm:$0xff]  }
 0x15b   :  { %2184 = vmatpush1.bf16.msra.mxu1 %v5269_v31  ;;  %v6670_v43 = vpop.eup %5650  ;;  %v942_v60 = vadd.bf16 1065369472, %v5649_v44  ;;  %2072 = vmatprep.subr.bf16.mxu0 %v5274_v63  ;;  %v8024_v31 = vld [vmem:[#allocation14_spill] sm:$0xff]  ;;  %v1002_v63 = vsub.bf16 %v6587_v23, %v8004_v55  ;;  %5664 = vrcp.bf16 %v1037_v30  ;;  %v6697_v23 = vmin.bf16 %v8018_v18, %v1126_v37 }
 0x15c   :  { %2185 = vmatprep.subr.bf16.mxu1 %v5277_v47  ;;  %v5653_v14 = vpop.eup %5652  ;;  %1893 = vmatmul.mubr.bf16.gmra.mxu0 %v6665_v40  ;;  %v1121_v45 = vmul.bf16 %v1074_v62, %v8024_v31  ;;  %v5281_v47 = vld [vmem:[#allocation2 + $0x3c8] ss:$16 sps:$4 sm:$0xff]   ;;  %v5286_v62 = vld [vmem:[#allocation2 + $0x1ac] ss:$16 sps:$4 sm:$0xff]   ;;  %5666 = vrcp.bf16 %v1039_v19  ;;  %v8028_v31 = vld [vmem:[#allocation19_spill] sm:$0xff] }
 0x15d   :  { %2006 = vmatmul.mubr.bf16.gmra.mxu1 %v6668_v13  ;;  %v5655_v1 = vpop.eup %5654  ;;  %v6682_v4 = vmul.bf16 %v942_v60, %v942_v60  ;;  %v944_v56 = vadd.bf16 1065369472, %v5653_v14  ;;  %1902 = vmatprep.mubr.bf16.mxu0 %v6659_v59  ;;  %v1082_v60 = vmul.bf16 %v6670_v43, %v997_v38  ;;  %v5284_v43 = vld [vmem:[#allocation2 + $0x1a8] ss:$16 sps:$4 sm:$0xff]   ;;  %v5292_v37 = vld [vmem:[#allocation2 + $0x18c] ss:$16 sps:$4 sm:$0xff]  }
 0x15e   :  { %2015 = vmatprep.mubr.bf16.mxu1 %v6662_v0  ;;  %v5657_v35 = vpop.eup %5656  ;;  %2073 = vmatpush2.bf16.msra.mxu0 %v5272_v9  ;;  %v6700_v9 = vmin.bf16 %v8018_v18, %v1128_v26  ;;  %v1086_v14 = vmul.bf16 %v5655_v1, %v999_v2  ;;  %v5295_v17 = vld [vmem:[#allocation2 + $0x38c] ss:$16 sps:$4 sm:$0xff]   ;;  %v5290_v28 = vld [vmem:[#allocation2 + $0x188] ss:$16 sps:$4 sm:$0xff]  }
 0x15f   :  { %2186 = vmatpush2.bf16.msra.mxu1 %v5275_v50  ;;  %v1038_v8 = vadd.bf16 1065369472, %v6682_v4  ;;  %v6693_v44 = vmul.bf16 %v944_v56, %v944_v56  ;;  %2074 = vmatprep.subr.bf16.mxu0 %v5280_v3  ;;  %v1092_v50 = vmul.bf16 %v5657_v35, %v1002_v63  ;;  %v6704_v3 = vmin.bf16 %v8018_v18, %v1121_v45  ;;  %v8026_v19 = vld [vmem:[#allocation24_spill] sm:$0xff]  ;;  %v8027_v56 = vld [vmem:[#allocation18_spill] sm:$0xff] }
 0x160   :  { %v5659_v6 = vpop.eup %5658  ;;  %2187 = vmatprep.subr.bf16.mxu1 %v5283_v10  ;;  %v6707_v10 = vmin.bf16 %v8018_v18, %v1123_v29  ;;  %v1125_v35 = vmul.bf16 %v1082_v60, %v8027_v56  ;;  %v1127_v45 = vmul.bf16 %v1086_v14, %v8028_v31  ;;  %v5293_v29 = vld [vmem:[#allocation2 + $0x388] ss:$16 sps:$4 sm:$0xff]   ;;  %v1001_v63 = vsub.bf16 %v6615_v20, %v8004_v55  ;;  %v5310_v56 = vld [vmem:[#allocation2 + $0x12c] ss:$16 sps:$4 sm:$0xff]  }
 0x161   :  { %v1096_v16 = vmul.bf16 %v5659_v6, %v1004_v22  ;;  %5668 = vrcp.bf16 %v1038_v8  ;;  %v1040_v30 = vadd.bf16 1065369472, %v6693_v44  ;;  %v1130_v1 = vmul.bf16 %v1092_v50, %v8026_v19  ;;  %v5299_v60 = vld [vmem:[#allocation2 + $0x368] ss:$16 sps:$4 sm:$0xff]   ;;  %v5304_v50 = vld [vmem:[#allocation2 + $0x14c] ss:$16 sps:$4 sm:$0xff]  }
 0x162   :  { %2075 = vmatpush2.bf16.msra.mxu0 %v5278_v49  ;;  %v5661_v26 = vpop.eup %5660  ;;  %v1003_v49 = vsub.bf16 %v6620_v41, %v8004_v55  ;;  %v6731_v20 = vmin.bf16 %v8018_v18, %v1127_v45  ;;  %v5296_v41 = vld [vmem:[#allocation2 + $0x168] ss:$16 sps:$4 sm:$0xff]   ;;  %v1007_v31 = vsub.bf16 %v6656_v57, %v8004_v55 }
 0x163   :  { %2188 = vmatpush2.bf16.msra.mxu1 %v5281_v47  ;;  %5670 = vrcp.bf16 %v1040_v30  ;;  %2076 = vmatprep.subr.bf16.mxu0 %v5286_v62  ;;  %v1132_v38 = vmul.bf16 %v1096_v16, %v6463_v34  ;;  %v5298_v34 = vld [vmem:[#allocation2 + $0x16c] ss:$16 sps:$4 sm:$0xff]   ;;  %v1090_v6 = vmul.bf16 %v5661_v26, %v1001_v63  ;;  %v6722_v8 = vmin.bf16 %v8018_v18, %v1130_v1  ;;  %v5302_v19 = vld [vmem:[#allocation2 + $0x148] ss:$16 sps:$4 sm:$0xff]  }
 0x164   :  { %2189 = vmatprep.subr.bf16.mxu1 %v5289_v36  ;;  %1903 = vmatmul.mubr.bf16.gmra.mxu0 %v6704_v3  ;;  %v5663_v2 = vpop.eup %5662  ;;  %v5301_v47 = vld [vmem:[#allocation2 + $0x36c] ss:$16 sps:$4 sm:$0xff]   ;;  %v6728_v36 = vmin.bf16 %v8018_v18, %v1125_v35  ;;  %v1006_v26 = vsub.bf16 %v6682_v4, %v8004_v55  ;;  %v5305_v1 = vld [vmem:[#allocation2 + $0x348] ss:$16 sps:$4 sm:$0xff]  }
 0x165   :  { %2016 = vmatmul.mubr.bf16.gmra.mxu1 %v6707_v10  ;;  %1912 = vmatprep.mubr.bf16.mxu0 %v6697_v23  ;;  %v1094_v22 = vmul.bf16 %v5663_v2, %v1003_v49  ;;  %v6725_v62 = vmin.bf16 %v8018_v18, %v1132_v38  ;;  %v5307_v16 = vld [vmem:[#allocation2 + $0x34c] ss:$16 sps:$4 sm:$0xff]   ;;  %v1005_v2 = vsub.bf16 %v6654_v42, %v8004_v55  ;;  %v5311_v57 = vld [vmem:[#allocation2 + $0x328] ss:$16 sps:$4 sm:$0xff]  }
 0x166   :  { %2025 = vmatprep.mubr.bf16.mxu1 %v6700_v9  ;;  %2077 = vmatpush2.bf16.msra.mxu0 %v5284_v43  ;;  %v8029_v14 = vld [vmem:[#allocation22_spill] sm:$0xff] }
 0x167   :  { %2190 = vmatpush2.bf16.msra.mxu1 %v5287_v5  ;;  %2078 = vmatprep.subr.bf16.mxu0 %v5292_v37  ;;  %v1129_v43 = vmul.bf16 %v1090_v6, %v8029_v14  ;;  %v8030_v5 = vld [vmem:[#allocation23_spill] sm:$0xff]  ;;  %v5313_v35 = vld [vmem:[#allocation2 + $0x32c] ss:$16 sps:$4 sm:$0xff]   ;;  %v5308_v6 = vld [vmem:[#allocation2 + $0x128] ss:$16 sps:$4 sm:$0xff]  }
 0x168   :  { %2191 = vmatprep.subr.bf16.mxu1 %v5295_v17  ;;  %v1131_v37 = vmul.bf16 %v1094_v22, %v8030_v5  ;;  %v5316_v22 = vld [vmem:[#allocation2 + $0x10c] ss:$16 sps:$4 sm:$0xff]   ;;  %v5322_v14 = vld [vmem:[#allocation4 + $0xe4] ss:$16 sps:$4 sm:$0xff]  }
 0x169   :  { %v5665_v30 = vpop.eup %5664  ;;  %v6748_v63 = vmin.bf16 %v8018_v18, %v1129_v43  ;;  %v5325_v5 = vld [vmem:[#allocation4 + $0xc4] ss:$16 sps:$4 sm:$0xff]  }
 0x16a   :  { %2079 = vmatpush2.bf16.msra.mxu0 %v5290_v28  ;;  %v5667_v17 = vpop.eup %5666  ;;  %v1008_v28 = vsub.bf16 %v6693_v44, %v8004_v55  ;;  %v6751_v49 = vmin.bf16 %v8018_v18, %v1131_v37  ;;  %v5323_v37 = vld [vmem:[#allocation4 + $0xc0] ss:$16 sps:$4 sm:$0xff]  }
 0x16b   :  { %2192 = vmatpush2.bf16.msra.mxu1 %v5293_v29  ;;  %2080 = vmatprep.subr.bf16.mxu0 %v5298_v34  ;;  %v1098_v29 = vmul.bf16 %v5665_v30, %v1005_v2  ;;  %v1102_v42 = vmul.bf16 %v5667_v17, %v1007_v31  ;;  %v5314_v30 = vld [vmem:[#allocation2 + $0x108] ss:$16 sps:$4 sm:$0xff]   ;;  %v5328_v17 = vld [vmem:[#allocation4 + $0xa4] ss:$16 sps:$4 sm:$0xff]   ;;  %v5380_v31 = vld [vmem:[#allocation4 + $0x2a0] ss:$16 sps:$4 sm:$0xff]  }
 0x16c   :  { %2193 = vmatprep.subr.bf16.mxu1 %v5301_v47  ;;  %1913 = vmatmul.mubr.bf16.gmra.mxu0 %v6728_v36  ;;  %v5376_v2 = vld [vmem:[#allocation4 + $0x2c4] ss:$16 sps:$4 sm:$0xff]  }
 0x16d   :  { %2026 = vmatmul.mubr.bf16.gmra.mxu1 %v6731_v20  ;;  %1922 = vmatprep.mubr.bf16.mxu0 %v6722_v8 }
 0x16e   :  { %2035 = vmatprep.mubr.bf16.mxu1 %v6725_v62  ;;  %2081 = vmatpush2.bf16.msra.mxu0 %v5296_v41 }
 0x16f   :  { %2194 = vmatpush2.bf16.msra.mxu1 %v5299_v60  ;;  %v5669_v38 = vpop.eup %5668  ;;  %2082 = vmatprep.subr.bf16.mxu0 %v5304_v50  ;;  %v5319_v60 = vld [vmem:[#allocation2 + $0x30c] ss:$16 sps:$4 sm:$0xff]   ;;  %v1135_v50 = vmul.bf16 %v1102_v42, %v6512_v25  ;;  %v5320_v25 = vld [vmem:[#allocation4 + $0xe0] ss:$16 sps:$4 sm:$0xff]   ;;  %v5406_v42 = vld [vmem:[#allocation4 + $0x224] ss:$16 sps:$4 sm:$0xff]  }
 0x170   :  { %2195 = vmatprep.subr.bf16.mxu1 %v5307_v16  ;;  %v1100_v45 = vmul.bf16 %v5669_v38, %v1006_v26  ;;  %v5326_v26 = vld [vmem:[#allocation4 + $0xa0] ss:$16 sps:$4 sm:$0xff]  }
 0x171   :  { %v5671_v4 = vpop.eup %5670  ;;  %v5368_v38 = vld [vmem:[#allocation4 + $0x2e0] ss:$16 sps:$4 sm:$0xff]  }
 0x172   :  { %v1134_v34 = vmul.bf16 %v1100_v45, %v6527_v51  ;;  %v1104_v47 = vmul.bf16 %v5671_v4, %v1008_v28  ;;  %2083 = vmatpush2.bf16.msra.mxu0 %v5302_v19  ;;  %v1133_v51 = vmul.bf16 %v1098_v29, %v6510_v24  ;;  %v6771_v24 = vmin.bf16 %v8018_v18, %v1135_v50  ;;  %v5370_v19 = vld [vmem:[#allocation4 + $0x2e4] ss:$16 sps:$4 sm:$0xff]   ;;  %v5386_v28 = vld [vmem:[#allocation4 + $0x280] ss:$16 sps:$4 sm:$0xff]  }
 0x173   :  { %2196 = vmatpush2.bf16.msra.mxu1 %v5305_v1  ;;  %2084 = vmatprep.subr.bf16.mxu0 %v5310_v56  ;;  %v5373_v1 = vld [vmem:[#allocation4 + $0xec] ss:$16 sps:$4 sm:$0xff]   ;;  %v5374_v56 = vld [vmem:[#allocation4 + $0x2c0] ss:$16 sps:$4 sm:$0xff]   ;;  %v5388_v45 = vld [vmem:[#allocation4 + $0x284] ss:$16 sps:$4 sm:$0xff]  }
 0x174   :  { %2197 = vmatprep.subr.bf16.mxu1 %v5313_v35  ;;  %v1136_v44 = vmul.bf16 %v1104_v47, %v6535_v15  ;;  %1923 = vmatmul.mubr.bf16.gmra.mxu0 %v6748_v63  ;;  %v6758_v41 = vmin.bf16 %v8018_v18, %v1134_v34  ;;  %v5317_v15 = vld [vmem:[#allocation2 + $0x308] ss:$16 sps:$4 sm:$0xff]   ;;  %v6768_v43 = vmin.bf16 %v8018_v18, %v1133_v51  ;;  %v5382_v35 = vld [vmem:[#allocation4 + $0x2a4] ss:$16 sps:$4 sm:$0xff]   ;;  %v5392_v29 = vld [vmem:[#allocation4 + $0x260] ss:$16 sps:$4 sm:$0xff]  }
 0x175   :  { %2036 = vmatmul.mubr.bf16.gmra.mxu1 %v6751_v49  ;;  %v5394_v4 = vld [vmem:[#allocation4 + $0x264] ss:$16 sps:$4 sm:$0xff]   ;;  %v5404_v34 = vld [vmem:[#allocation4 + $0x220] ss:$16 sps:$4 sm:$0xff]  }
 0x176   :  { %1932 = vmatprep.mubr.bf16.mxu0 %v6758_v41  ;;  %v6764_v16 = vmin.bf16 %v8018_v18, %v1136_v44  ;;  %2085 = vmatpush2.bf16.msra.mxu0 %v5308_v6  ;;  %v5412_v47 = vld [vmem:[#allocation4 + $0x204] ss:$16 sps:$4 sm:$0xff]   ;;  %v5410_v6 = vld [vmem:[#allocation4 + $0x200] ss:$16 sps:$4 sm:$0xff]  }
 0x177   :  { %2198 = vmatpush2.bf16.msra.mxu1 %v5311_v57  ;;  %2086 = vmatprep.subr.bf16.mxu0 %v5316_v22  ;;  %v5418_v57 = vld [vmem:[#allocation4 + $0x3e4] ss:$16 sps:$4 sm:$0xff]   ;;  %v5416_v22 = vld [vmem:[#allocation4 + $0x3e0] ss:$16 sps:$4 sm:$0xff]  }
 0x178   :  { %2045 = vmatprep.mubr.bf16.mxu1 %v6764_v16  ;;  %2199 = vmatprep.subr.bf16.mxu1 %v5319_v60  ;;  %v5424_v44 = vld [vmem:[#allocation4 + $0x3c4] ss:$16 sps:$4 sm:$0xff]   ;;  %v5428_v51 = vld [vmem:[#allocation4 + $0x3a0] ss:$16 sps:$4 sm:$0xff]  }
 0x179   :  { %v5430_v60 = vld [vmem:[#allocation4 + $0x3a4] ss:$16 sps:$4 sm:$0xff]  }
 0x17a   :  { %2087 = vmatpush2.bf16.msra.mxu0 %v5314_v30  ;;  %v5436_v50 = vld [vmem:[#allocation4 + $0x384] ss:$16 sps:$4 sm:$0xff]  }
 0x17b   :  { %2200 = vmatpush2.bf16.msra.mxu1 %v5317_v15  ;;  %3359 = vmatprep.subr.bf16.mxu0 %v5322_v14  ;;  %v5442_v30 = vld [vmem:[#allocation4 + $0x364] ss:$16 sps:$4 sm:$0xff]   ;;  %v5440_v15 = vld [vmem:[#allocation4 + $0x360] ss:$16 sps:$4 sm:$0xff]  }
 0x17c   :  { %1933 = vmatmul.mubr.bf16.gmra.mxu0 %v6768_v43  ;;  %3472 = vmatprep.subr.bf16.mxu1 %v5370_v19  ;;  %v6810_v14 = vld [vmem:[%s7965_s4] sm:$0xf] }
 0x17d   :  { %2046 = vmatmul.mubr.bf16.gmra.mxu1 %v6771_v24  ;;  %2088 = vmatprep.mubr.bf16.mxu0 %v6488_v11  ;;  %v5334_v11 = vld [vmem:[#allocation4 + $0x64] ss:$16 sps:$4 sm:$0xff]  }
 0x17e   :  { %2201 = vmatprep.mubr.bf16.mxu1 %v6491_v12  ;;  %v5332_v12 = vld [vmem:[#allocation4 + $0x60] ss:$16 sps:$4 sm:$0xff]  }
 0x184   :  { %2089 = vmatmul.mubr.bf16.vlgmr.msra.gmra.mxu0 %v6359_v21  ;;  %v5329_v21 = vld [vmem:[#allocation4 + $0x80] ss:$16 sps:$4 sm:$0xff]  }
 0x185   :  { %2202 = vmatmul.mubr.bf16.vlgmr.msra.gmra.mxu1 %v6367_v58  ;;  %2098 = vmatprep.mubr.bf16.mxu0 %v6549_v61  ;;  %v5331_v58 = vld [vmem:[#allocation4 + $0x84] ss:$16 sps:$4 sm:$0xff]  }
 0x186   :  { %2211 = vmatprep.mubr.bf16.mxu1 %v6569_v46  ;;  %3360 = vmatpush1.bf16.msra.mxu0 %v5320_v25  ;;  %v5337_v61 = vld [vmem:[#allocation4 + $0x44] ss:$16 sps:$4 sm:$0xff]   ;;  %v5335_v46 = vld [vmem:[#allocation4 + $0x40] ss:$16 sps:$4 sm:$0xff]  }
 0x187   :  { %3361 = vmatprep.subr.bf16.mxu0 %v5325_v5  ;;  %3473 = vmatpush1.bf16.msra.mxu1 %v5368_v38  ;;  %v8031_v25 = vld [vmem:[#allocation9_spill] sm:$0xff] }
 0x188   :  { %3474 = vmatprep.subr.bf16.mxu1 %v5376_v2  ;;  %v6814_v5 = vrot.slane %v6810_v14, %v8031_v25 }
 0x18a   :  { %3362 = vmatpush1.bf16.msra.mxu0 %v5323_v37 }
 0x18b   :  { %3363 = vmatprep.subr.bf16.mxu0 %v5328_v17  ;;  %3475 = vmatpush1.bf16.msra.mxu1 %v5374_v56 }
 0x18c   :  { %2099 = vmatmul.mubr.bf16.gmra.mxu0 %v6578_v54  ;;  %v5340_v54 = vld [vmem:[#allocation4 + $0x24] ss:$16 sps:$4 sm:$0xff]   ;;  %3476 = vmatprep.subr.bf16.mxu1 %v5382_v35 }
 0x18d   :  { %2212 = vmatmul.mubr.bf16.gmra.mxu1 %v6582_v52  ;;  %2108 = vmatprep.mubr.bf16.mxu0 %v6590_v33  ;;  %v5338_v52 = vld [vmem:[#allocation4 + $0x20] ss:$16 sps:$4 sm:$0xff]   ;;  %v5343_v33 = vld [vmem:[#allocation4 + $0x4] ss:$16 sps:$4 sm:$0xff]  }
 0x18e   :  { %2221 = vmatprep.mubr.bf16.mxu1 %v6598_v32  ;;  %3364 = vmatpush1.bf16.msra.mxu0 %v5326_v26  ;;  %v5341_v32 = vld [vmem:[#allocation4] ss:$16 sps:$4 sm:$0xff]  }
 0x18f   :  { %3365 = vmatprep.subr.bf16.mxu0 %v5331_v58  ;;  %3477 = vmatpush1.bf16.msra.mxu1 %v5380_v31  ;;  %v8032_v26 = vld [vmem:[#allocation11_spill] sm:$0xff] }
 0x190   :  { %3478 = vmatprep.subr.bf16.mxu1 %v5388_v45  ;;  %v6818_v58 = vrot.slane %v6810_v14, %v8032_v26 }
 0x192   :  { %3366 = vmatpush1.bf16.msra.mxu0 %v5329_v21  ;;  %v5454_v21 = vld [vmem:[#allocation4 + $0x324] ss:$16 sps:$4 sm:$0xff]  }
 0x193   :  { %3367 = vmatprep.subr.bf16.mxu0 %v5334_v11  ;;  %3479 = vmatpush1.bf16.msra.mxu1 %v5386_v28 }
 0x194   :  { %2109 = vmatmul.mubr.bf16.gmra.mxu0 %v6631_v39  ;;  %v5349_v39 = vld [vmem:[#allocation4 + $0x1c4] ss:$16 sps:$4 sm:$0xff]   ;;  %3480 = vmatprep.subr.bf16.mxu1 %v5394_v4 }
 0x195   :  { %2222 = vmatmul.mubr.bf16.gmra.mxu1 %v6634_v48  ;;  %2118 = vmatprep.mubr.bf16.mxu0 %v6623_v7  ;;  %v5346_v7 = vld [vmem:[#allocation4 + $0x1e4] ss:$16 sps:$4 sm:$0xff]   ;;  %v5347_v48 = vld [vmem:[#allocation4 + $0x1c0] ss:$16 sps:$4 sm:$0xff]  }
 0x196   :  { %2231 = vmatprep.mubr.bf16.mxu1 %v6626_v53  ;;  %3368 = vmatpush1.bf16.msra.mxu0 %v5332_v12  ;;  %v5344_v53 = vld [vmem:[#allocation4 + $0x1e0] ss:$16 sps:$4 sm:$0xff]  }
 0x197   :  { %3369 = vmatprep.subr.bf16.mxu0 %v5337_v61  ;;  %3481 = vmatpush1.bf16.msra.mxu1 %v5392_v29  ;;  %v5452_v61 = vld [vmem:[#allocation4 + $0x320] ss:$16 sps:$4 sm:$0xff]  }
 0x19a   :  { %3370 = vmatpush1.bf16.msra.mxu0 %v5335_v46 }
 0x19b   :  { %3371 = vmatprep.subr.bf16.mxu0 %v5340_v54 }
 0x19c   :  { %2119 = vmatmul.mubr.bf16.gmra.mxu0 %v6665_v40  ;;  %v5355_v40 = vld [vmem:[#allocation4 + $0x184] ss:$16 sps:$4 sm:$0xff]  }
 0x19d   :  { %2232 = vmatmul.mubr.bf16.gmra.mxu1 %v6668_v13  ;;  %2128 = vmatprep.mubr.bf16.mxu0 %v6659_v59  ;;  %v5352_v59 = vld [vmem:[#allocation4 + $0x1a4] ss:$16 sps:$4 sm:$0xff]   ;;  %v5353_v13 = vld [vmem:[#allocation4 + $0x180] ss:$16 sps:$4 sm:$0xff]  }
 0x19e   :  { %2241 = vmatprep.mubr.bf16.mxu1 %v6662_v0  ;;  %3372 = vmatpush1.bf16.msra.mxu0 %v5338_v52  ;;  %v5350_v0 = vld [vmem:[#allocation4 + $0x1a0] ss:$16 sps:$4 sm:$0xff]  }
 0x19f   :  { %3373 = vmatprep.subr.bf16.mxu0 %v5343_v33 }
 0x1a2   :  { %3374 = vmatpush1.bf16.msra.mxu0 %v5341_v32 }
 0x1a3   :  { %3375 = vmatprep.subr.bf16.mxu0 %v5346_v7  ;;  %v5460_v7 = vld [vmem:[#allocation4 + $0x304] ss:$16 sps:$4 sm:$0xff]  }
 0x1a4   :  { %2129 = vmatmul.mubr.bf16.gmra.mxu0 %v6704_v3  ;;  %v5361_v3 = vld [vmem:[#allocation4 + $0x144] ss:$16 sps:$4 sm:$0xff]  }
 0x1a5   :  { %2242 = vmatmul.mubr.bf16.gmra.mxu1 %v6707_v10  ;;  %2138 = vmatprep.mubr.bf16.mxu0 %v6697_v23  ;;  %v5358_v23 = vld [vmem:[#allocation4 + $0x164] ss:$16 sps:$4 sm:$0xff]   ;;  %v5359_v10 = vld [vmem:[#allocation4 + $0x140] ss:$16 sps:$4 sm:$0xff]  }
 0x1a6   :  { %2251 = vmatprep.mubr.bf16.mxu1 %v6700_v9  ;;  %3376 = vmatpush2.bf16.msra.mxu0 %v5344_v53  ;;  %v5356_v9 = vld [vmem:[#allocation4 + $0x160] ss:$16 sps:$4 sm:$0xff]  }
 0x1a7   :  { %3377 = vmatprep.subr.bf16.mxu0 %v5349_v39  ;;  %v5458_v39 = vld [vmem:[#allocation4 + $0x300] ss:$16 sps:$4 sm:$0xff]  }
 0x1aa   :  { %3378 = vmatpush2.bf16.msra.mxu0 %v5347_v48 }
 0x1ab   :  { %3379 = vmatprep.subr.bf16.mxu0 %v5352_v59 }
 0x1ac   :  { %2139 = vmatmul.mubr.bf16.gmra.mxu0 %v6728_v36  ;;  %v5367_v36 = vld [vmem:[#allocation4 + $0x104] ss:$16 sps:$4 sm:$0xff]  }
 0x1ad   :  { %2252 = vmatmul.mubr.bf16.gmra.mxu1 %v6731_v20  ;;  %2148 = vmatprep.mubr.bf16.mxu0 %v6722_v8  ;;  %v5364_v8 = vld [vmem:[#allocation4 + $0x124] ss:$16 sps:$4 sm:$0xff]   ;;  %v5365_v20 = vld [vmem:[#allocation4 + $0x100] ss:$16 sps:$4 sm:$0xff]  }
 0x1ae   :  { %2261 = vmatprep.mubr.bf16.mxu1 %v6725_v62  ;;  %3380 = vmatpush2.bf16.msra.mxu0 %v5350_v0  ;;  %v5362_v62 = vld [vmem:[#allocation4 + $0x120] ss:$16 sps:$4 sm:$0xff]  }
 0x1af   :  { %3381 = vmatprep.subr.bf16.mxu0 %v5355_v40 }
 0x1b2   :  { %3382 = vmatpush2.bf16.msra.mxu0 %v5353_v13 }
 0x1b3   :  { %3383 = vmatprep.subr.bf16.mxu0 %v5358_v23 }
 0x1b4   :  { %2149 = vmatmul.mubr.bf16.gmra.mxu0 %v6748_v63  ;;  %v5400_v63 = vld [vmem:[#allocation4 + $0x244] ss:$16 sps:$4 sm:$0xff]  }
 0x1b5   :  { %2262 = vmatmul.mubr.bf16.gmra.mxu1 %v6751_v49  ;;  %2158 = vmatprep.mubr.bf16.mxu0 %v6758_v41  ;;  %v5398_v49 = vld [vmem:[#allocation4 + $0x240] ss:$16 sps:$4 sm:$0xff]  }
 0x1b6   :  { %2271 = vmatprep.mubr.bf16.mxu1 %v6764_v16  ;;  %3384 = vmatpush2.bf16.msra.mxu0 %v5356_v9  ;;  %v5422_v41 = vld [vmem:[#allocation4 + $0x3c0] ss:$16 sps:$4 sm:$0xff]  }
 0x1b7   :  { %3385 = vmatprep.subr.bf16.mxu0 %v5361_v3  ;;  %3482 = vmatprep.subr.bf16.mxu1 %v5400_v63  ;;  %v5434_v16 = vld [vmem:[#allocation4 + $0x380] ss:$16 sps:$4 sm:$0xff]   ;;  %v5466_v3 = vld [vmem:[#allocation4 + $0x2ec] ss:$16 sps:$4 sm:$0xff]  }
 0x1b8   :  { %3483 = vmatpush1.bf16.msra.mxu1 %v5398_v49 }
 0x1b9   :  { %3484 = vmatprep.subr.bf16.mxu1 %v5406_v42 }
 0x1ba   :  { %3386 = vmatpush2.bf16.msra.mxu0 %v5359_v10 }
 0x1bb   :  { %3387 = vmatprep.subr.bf16.mxu0 %v5364_v8 }
 0x1bc   :  { %2159 = vmatmul.mubr.bf16.gmra.mxu0 %v6768_v43  ;;  %3485 = vmatpush1.bf16.msra.mxu1 %v5404_v34  ;;  %v5448_v43 = vld [vmem:[#allocation4 + $0x344] ss:$16 sps:$4 sm:$0xff]  }
 0x1bd   :  { %2272 = vmatmul.mubr.bf16.gmra.mxu1 %v6771_v24  ;;  %3486 = vmatprep.subr.bf16.mxu1 %v5412_v47  ;;  %v5446_v24 = vld [vmem:[#allocation4 + $0x340] ss:$16 sps:$4 sm:$0xff]  }
 0x1be   :  { %3388 = vmatpush2.bf16.msra.mxu0 %v5362_v62 }
 0x1bf   :  { %3389 = vmatprep.subr.bf16.mxu0 %v5367_v36 }
 0x1c0   :  { %3487 = vmatpush1.bf16.msra.mxu1 %v5410_v6 }
 0x1c1   :  { %3488 = vmatprep.subr.bf16.mxu1 %v5418_v57 }
 0x1c2   :  { %3390 = vmatpush2.bf16.msra.mxu0 %v5365_v20 }
 0x1c3   :  { %3585 = vmatprep.subr.bf16.mxu0 %v5373_v1 }
 0x1c4   :  { %3489 = vmatpush2.bf16.msra.mxu1 %v5416_v22 }
 0x1c5   :  { %3490 = vmatprep.subr.bf16.mxu1 %v5424_v44 }
 0x1c8   :  { %3491 = vmatpush2.bf16.msra.mxu1 %v5422_v41 }
 0x1c9   :  { %3492 = vmatprep.subr.bf16.mxu1 %v5430_v60 }
 0x1cc   :  { %3493 = vmatpush2.bf16.msra.mxu1 %v5428_v51 }
 0x1cd   :  { %3494 = vmatprep.subr.bf16.mxu1 %v5436_v50 }
 0x1d0   :  { %3495 = vmatpush2.bf16.msra.mxu1 %v5434_v16 }
 0x1d1   :  { %3496 = vmatprep.subr.bf16.mxu1 %v5442_v30 }
 0x1d4   :  { %3497 = vmatpush2.bf16.msra.mxu1 %v5440_v15 }
 0x1d5   :  { %3498 = vmatprep.subr.bf16.mxu1 %v5448_v43 }
 0x1d8   :  { %3499 = vmatpush2.bf16.msra.mxu1 %v5446_v24 }
 0x1d9   :  { %3500 = vmatprep.subr.bf16.mxu1 %v5454_v21 }
 0x1dc   :  { %3501 = vmatpush2.bf16.msra.mxu1 %v5452_v61 }
 0x1dd   :  { %3502 = vmatprep.subr.bf16.mxu1 %v5460_v7 }
 0x1e0   :  { %3503 = vmatpush2.bf16.msra.mxu1 %v5458_v39 }
 0x1e1   :  { %3698 = vmatprep.subr.bf16.mxu1 %v5466_v3 }
 0x1fd   :  { %v1864_v37 = vpop.f32.mrf.mxu0  ;;  %v1977_v17 = vpop.f32.mrf.mxu1 }
 0x1fe   :  { %v1865_v46 = vadd.f32 %v1864_v37, %v6814_v5 }
 0x1ff   :  { %v1866_v11 = vpop.f32.mrf.mxu0  ;;  %v1979_v12 = vpop.f32.mrf.mxu1 }
 0x200   :  { %v1867_v33 = vadd.f32 %v1866_v11, %v6818_v58  ;;  %v1978_v48 = vadd.f32 %v1977_v17, %v1865_v46 }
 0x201   :  { %v1868_v54 = vpop.f32.mrf.mxu0  ;;  %v1981_v52 = vpop.f32.mrf.mxu1 }
 0x202   :  { %v1869_v32 = vadd.f32 %v1868_v54, %v6814_v5  ;;  %v1980_v13 = vadd.f32 %v1979_v12, %v1867_v33 }
 0x203   :  { %v1870_v53 = vpop.f32.mrf.mxu0  ;;  %v1983_v40 = vpop.f32.mrf.mxu1 }
 0x204   :  { %v1982_v59 = vadd.f32 %v1981_v52, %v1869_v32  ;;  %v1871_v0 = vadd.f32 %v1870_v53, %v6818_v58 }
 0x206   :  { %v6824_v23 = vpack.c.bf16 %v1982_v59, %v1978_v48  ;;  %v1984_v9 = vadd.f32 %v1983_v40, %v1871_v0 }
 0x208   :  { %v2314_v10 = vmin.bf16 %v8008_v27, %v6824_v23  ;;  %v6828_v8 = vpack.c.bf16 %v1984_v9, %v1980_v13 }
 0x20a   :  { %v2347_v62 = vmul.bf16 1069105081, %v2314_v10  ;;  %v2315_v36 = vmin.bf16 %v8008_v27, %v6828_v8 }
 0x20c   :  { %5672 = vpow.bf16 %v2347_v62  ;;  %v2350_v20 = vmul.bf16 1069105081, %v2315_v36  ;;  %v1874_v19 = vpop.f32.mrf.mxu0  ;;  %v1987_v1 = vpop.f32.mrf.mxu1 }
 0x20d   :  { %v1875_v56 = vadd.f32 %v1874_v19, %v6814_v5 }
 0x20e   :  { %5674 = vpow.bf16 %v2350_v20  ;;  %v1876_v38 = vpop.f32.mrf.mxu0  ;;  %v1989_v2 = vpop.f32.mrf.mxu1 }
 0x20f   :  { %v1877_v45 = vadd.f32 %v1876_v38, %v6818_v58  ;;  %v1988_v63 = vadd.f32 %v1987_v1, %v1875_v56 }
 0x210   :  { %v1878_v35 = vpop.f32.mrf.mxu0  ;;  %v1991_v31 = vpop.f32.mrf.mxu1 }
 0x211   :  { %v1879_v28 = vadd.f32 %v1878_v35, %v6814_v5  ;;  %v1990_v6 = vadd.f32 %v1989_v2, %v1877_v45 }
 0x212   :  { %v1880_v4 = vpop.f32.mrf.mxu0  ;;  %v1993_v29 = vpop.f32.mrf.mxu1 }
 0x213   :  { %v1992_v49 = vadd.f32 %v1991_v31, %v1879_v28  ;;  %v1881_v42 = vadd.f32 %v1880_v4, %v6818_v58 }
 0x214   :  { %v1884_v34 = vpop.f32.mrf.mxu0 }
 0x215   :  { %v1997_v47 = vpop.f32.mrf.mxu1  ;;  %v6836_v57 = vpack.c.bf16 %v1992_v49, %v1988_v63  ;;  %v1994_v22 = vadd.f32 %v1993_v29, %v1881_v42  ;;  %v1885_v44 = vadd.f32 %v1884_v34, %v6814_v5 }
 0x216   :  { %v1886_v41 = vpop.f32.mrf.mxu0 }
 0x217   :  { %v1999_v60 = vpop.f32.mrf.mxu1  ;;  %v2318_v51 = vmin.bf16 %v8008_v27, %v6836_v57  ;;  %v6841_v50 = vpack.c.bf16 %v1994_v22, %v1990_v6  ;;  %v1887_v37 = vadd.f32 %v1886_v41, %v6818_v58  ;;  %v1998_v11 = vadd.f32 %v1997_v47, %v1885_v44 }
 0x218   :  { %v1888_v16 = vpop.f32.mrf.mxu0 }
 0x219   :  { %v2001_v30 = vpop.f32.mrf.mxu1  ;;  %v2359_v43 = vmul.bf16 1069105081, %v2318_v51  ;;  %v2319_v24 = vmin.bf16 %v8008_v27, %v6841_v50  ;;  %v1889_v17 = vadd.f32 %v1888_v16, %v6814_v5  ;;  %v2000_v48 = vadd.f32 %v1999_v60, %v1887_v37 }
 0x21a   :  { %v5673_v15 = vpop.eup %5672  ;;  %v1890_v12 = vpop.f32.mrf.mxu0 }
 0x21b   :  { %v2442_v21 = vadd.bf16 1065369472, %v5673_v15  ;;  %v2003_v61 = vpop.f32.mrf.mxu1  ;;  %5676 = vpow.bf16 %v2359_v43  ;;  %v2362_v54 = vmul.bf16 1069105081, %v2319_v24  ;;  %v2002_v52 = vadd.f32 %v2001_v30, %v1889_v17 }
 0x21c   :  { %v5675_v46 = vpop.eup %5674  ;;  %v1891_v33 = vadd.f32 %v1890_v12, %v6818_v58  ;;  %v1894_v53 = vpop.f32.mrf.mxu0 }
 0x21d   :  { %v2474_v32 = vmul.bf16 %v2442_v21, %v2442_v21  ;;  %v2443_v7 = vadd.bf16 1065369472, %v5675_v46  ;;  %v2007_v39 = vpop.f32.mrf.mxu1  ;;  %5678 = vpow.bf16 %v2362_v54  ;;  %v6848_v59 = vpack.c.bf16 %v2002_v52, %v1998_v11 }
 0x21e   :  { %v2004_v0 = vadd.f32 %v2003_v61, %v1891_v33  ;;  %v1895_v9 = vadd.f32 %v1894_v53, %v6814_v5  ;;  %v1896_v3 = vpop.f32.mrf.mxu0 }
 0x21f   :  { %v2538_v40 = vadd.bf16 1065369472, %v2474_v32  ;;  %v6850_v13 = vmul.bf16 %v2443_v7, %v2443_v7  ;;  %v2009_v10 = vpop.f32.mrf.mxu1  ;;  %v2322_v62 = vmin.bf16 %v8008_v27, %v6848_v59  ;;  %v1897_v56 = vadd.f32 %v1896_v3, %v6818_v58 }
 0x220   :  { %v6855_v36 = vpack.c.bf16 %v2004_v0, %v2000_v48  ;;  %v1898_v19 = vpop.f32.mrf.mxu0  ;;  %v2008_v31 = vadd.f32 %v2007_v39, %v1895_v9  ;;  %v2506_v7 = vsub.bf16 %v2474_v32, %v8004_v55 }
 0x221   :  { %5680 = vrcp.bf16 %v2538_v40  ;;  %v2539_v20 = vadd.bf16 1065369472, %v6850_v13  ;;  %v2011_v1 = vpop.f32.mrf.mxu1  ;;  %v2371_v38 = vmul.bf16 1069105081, %v2322_v62  ;;  %v1899_v35 = vadd.f32 %v1898_v19, %v6814_v5 }
 0x222   :  { %v2323_v2 = vmin.bf16 %v8008_v27, %v6855_v36  ;;  %v1900_v45 = vpop.f32.mrf.mxu0  ;;  %v2010_v34 = vadd.f32 %v2009_v10, %v1897_v56 }
 0x223   :  { %5682 = vrcp.bf16 %v2539_v20  ;;  %v2013_v28 = vpop.f32.mrf.mxu1  ;;  %v2012_v29 = vadd.f32 %v2011_v1, %v1899_v35  ;;  %v1901_v63 = vadd.f32 %v1900_v45, %v6818_v58 }
 0x224   :  { %5684 = vpow.bf16 %v2371_v38  ;;  %v2374_v4 = vmul.bf16 1069105081, %v2323_v2  ;;  %v1904_v49 = vpop.f32.mrf.mxu0  ;;  %v2507_v2 = vsub.bf16 %v6850_v13, %v8004_v55 }
 0x225   :  { %v2017_v42 = vpop.f32.mrf.mxu1  ;;  %v6863_v47 = vpack.c.bf16 %v2012_v29, %v2008_v31  ;;  %v2014_v6 = vadd.f32 %v2013_v28, %v1901_v63  ;;  %v1905_v22 = vadd.f32 %v1904_v49, %v6814_v5 }
 0x226   :  { %5686 = vpow.bf16 %v2374_v4  ;;  %v1906_v44 = vpop.f32.mrf.mxu0 }
 0x227   :  { %v2019_v41 = vpop.f32.mrf.mxu1  ;;  %v2326_v60 = vmin.bf16 %v8008_v27, %v6863_v47  ;;  %v6868_v51 = vpack.c.bf16 %v2014_v6, %v2010_v34  ;;  %v1907_v16 = vadd.f32 %v1906_v44, %v6818_v58  ;;  %v2018_v11 = vadd.f32 %v2017_v42, %v1905_v22 }
 0x228   :  { %v1908_v30 = vpop.f32.mrf.mxu0 }
 0x229   :  { %v2021_v15 = vpop.f32.mrf.mxu1  ;;  %v5677_v43 = vpop.eup %5676  ;;  %v2383_v24 = vmul.bf16 1069105081, %v2326_v60  ;;  %v2327_v37 = vmin.bf16 %v8008_v27, %v6868_v51  ;;  %v1909_v17 = vadd.f32 %v1908_v30, %v6814_v5  ;;  %v2020_v48 = vadd.f32 %v2019_v41, %v1907_v16 }
 0x22a   :  { %v2446_v21 = vadd.bf16 1065369472, %v5677_v43  ;;  %v1910_v12 = vpop.f32.mrf.mxu0 }
 0x22b   :  { %v2023_v61 = vpop.f32.mrf.mxu1  ;;  %v5679_v46 = vpop.eup %5678  ;;  %5688 = vpow.bf16 %v2383_v24  ;;  %v2386_v54 = vmul.bf16 1069105081, %v2327_v37  ;;  %v2022_v52 = vadd.f32 %v2021_v15, %v1909_v17  ;;  %v1911_v33 = vadd.f32 %v1910_v12, %v6818_v58  ;;  %v5371_v12 = vld [vmem:[#allocation4 + $0xe8] ss:$16 sps:$4 sm:$0xff]  }
 0x22c   :  { %v6876_v53 = vmul.bf16 %v2446_v21, %v2446_v21  ;;  %v2447_v39 = vadd.bf16 1065369472, %v5679_v46  ;;  %v1914_v0 = vpop.f32.mrf.mxu0 }
 0x22d   :  { %v2027_v40 = vpop.f32.mrf.mxu1  ;;  %5690 = vpow.bf16 %v2386_v54  ;;  %v6878_v9 = vpack.c.bf16 %v2022_v52, %v2018_v11  ;;  %v2024_v3 = vadd.f32 %v2023_v61, %v1911_v33  ;;  %v1915_v10 = vadd.f32 %v1914_v0, %v6814_v5 }
 0x22e   :  { %v2542_v20 = vadd.bf16 1065369472, %v6876_v53  ;;  %v6882_v19 = vmul.bf16 %v2447_v39, %v2447_v39  ;;  %v1916_v1 = vpop.f32.mrf.mxu0 }
 0x22f   :  { %v5681_v62 = vpop.eup %5680  ;;  %v2029_v38 = vpop.f32.mrf.mxu1  ;;  %v2330_v56 = vmin.bf16 %v8008_v27, %v6878_v9  ;;  %v6888_v35 = vpack.c.bf16 %v2024_v3, %v2020_v48  ;;  %v2028_v34 = vadd.f32 %v2027_v40, %v1915_v10  ;;  %v1917_v15 = vadd.f32 %v1916_v1, %v6818_v58 }
 0x230   :  { %v2571_v32 = vmul.bf16 %v5681_v62, %v2506_v7  ;;  %5692 = vrcp.bf16 %v2542_v20  ;;  %v2543_v45 = vadd.bf16 1065369472, %v6882_v19  ;;  %v1918_v28 = vpop.f32.mrf.mxu0  ;;  %v5379_v7 = vld [vmem:[#allocation4 + $0xcc] ss:$16 sps:$4 sm:$0xff]  }
 0x231   :  { %v5683_v31 = vpop.eup %5682  ;;  %v2031_v4 = vpop.f32.mrf.mxu1  ;;  %v2395_v49 = vmul.bf16 1069105081, %v2330_v56  ;;  %v2331_v42 = vmin.bf16 %v8008_v27, %v6888_v35  ;;  %v1919_v22 = vadd.f32 %v1918_v28, %v6814_v5  ;;  %v2030_v39 = vadd.f32 %v2029_v38, %v1917_v15 }
 0x232   :  { %v5685_v29 = vpop.eup %5684  ;;  %v2573_v63 = vmul.bf16 %v5683_v31, %v2507_v2  ;;  %v2634_v13 = vmul.bf16 %v2571_v32, %v6824_v23  ;;  %5694 = vrcp.bf16 %v2543_v45  ;;  %v1920_v44 = vpop.f32.mrf.mxu0  ;;  %v5377_v2 = vld [vmem:[#allocation4 + $0xc8] ss:$16 sps:$4 sm:$0xff]  }
 0x233   :  { %v2450_v6 = vadd.bf16 1065369472, %v5685_v29  ;;  %v2033_v41 = vpop.f32.mrf.mxu1  ;;  %5696 = vpow.bf16 %v2395_v49  ;;  %v2398_v30 = vmul.bf16 1069105081, %v2331_v42  ;;  %v2032_v37 = vadd.f32 %v2031_v4, %v1919_v22  ;;  %v5385_v4 = vld [vmem:[#allocation4 + $0xac] ss:$16 sps:$4 sm:$0xff]  }
 0x234   :  { %v5687_v60 = vpop.eup %5686  ;;  %v2635_v16 = vmul.bf16 %v2573_v63, %v6828_v8  ;;  %v1921_v17 = vadd.f32 %v1920_v44, %v6818_v58  ;;  %v1924_v23 = vpop.f32.mrf.mxu0  ;;  %v6904_v61 = vmin.bf16 %v8018_v18, %v2634_v13 }
 0x235   :  { %v6897_v43 = vmul.bf16 %v2450_v6, %v2450_v6  ;;  %v2451_v24 = vadd.bf16 1065369472, %v5687_v60  ;;  %v2037_v21 = vpop.f32.mrf.mxu1  ;;  %5698 = vpow.bf16 %v2398_v30  ;;  %v6909_v54 = vpack.c.bf16 %v2032_v37, %v2028_v34  ;;  %v5383_v37 = vld [vmem:[#allocation4 + $0xa8] ss:$16 sps:$4 sm:$0xff]  }
 0x236   :  { %v6901_v11 = vmin.bf16 %v8018_v18, %v2635_v16  ;;  %v1926_v52 = vpop.f32.mrf.mxu0  ;;  %v2034_v48 = vadd.f32 %v2033_v41, %v1921_v17  ;;  %v1925_v0 = vadd.f32 %v1924_v23, %v6814_v5  ;;  %v8033_v41 = vld [vmem:[#allocation10_spill] sm:$0xff]  ;;  %v2510_v23 = vsub.bf16 %v6876_v53, %v8004_v55 }
 0x237   :  { %v2546_v8 = vadd.bf16 1065369472, %v6897_v43  ;;  %v6907_v46 = vmul.bf16 %v2451_v24, %v2451_v24  ;;  %v2039_v33 = vpop.f32.mrf.mxu1  ;;  %v2334_v3 = vmin.bf16 %v8008_v27, %v6909_v54  ;;  %v1927_v38 = vadd.f32 %v1926_v52, %v6818_v58 }
 0x238   :  { %3391 = vmatprep.mubr.bf16.mxu0 %v6901_v11  ;;  %v1928_v10 = vpop.f32.mrf.mxu0  ;;  %v6917_v1 = vpack.c.bf16 %v2034_v48, %v2030_v39  ;;  %v2038_v49 = vadd.f32 %v2037_v21, %v1925_v0  ;;  %v6928_v60 = vrot.slane %v6810_v14, %v8033_v41  ;;  %v2511_v48 = vsub.bf16 %v6882_v19, %v8004_v55 }
 0x239   :  { %5700 = vrcp.bf16 %v2546_v8  ;;  %v2547_v40 = vadd.bf16 1065369472, %v6907_v46  ;;  %v2041_v62 = vpop.f32.mrf.mxu1  ;;  %3392 = vmatmul.mubr.bf16.vlgmr.msra.gmra.mxu0 %v6904_v61  ;;  %v5689_v20 = vpop.eup %5688  ;;  %v1929_v32 = vadd.f32 %v1928_v10, %v6814_v5  ;;  %v2407_v31 = vmul.bf16 1069105081, %v2334_v3 }
 0x23a   :  { %3586 = vmatpush1.bf16.msra.mxu0 %v5371_v12  ;;  %v2454_v56 = vadd.bf16 1065369472, %v5689_v20  ;;  %v1930_v45 = vpop.f32.mrf.mxu0  ;;  %v2335_v63 = vmin.bf16 %v8008_v27, %v6917_v1  ;;  %v2040_v30 = vadd.f32 %v2039_v33, %v1927_v38  ;;  %v5391_v33 = vld [vmem:[#allocation4 + $0x8c] ss:$16 sps:$4 sm:$0xff]   ;;  %v6949_v3 = vsub.bf16 %v6897_v43, %v8004_v55 }
 0x23b   :  { %5702 = vrcp.bf16 %v2547_v40  ;;  %v2043_v28 = vpop.f32.mrf.mxu1  ;;  %3587 = vmatprep.subr.bf16.mxu0 %v5379_v7  ;;  %v5691_v29 = vpop.eup %5690  ;;  %v2042_v42 = vadd.f32 %v2041_v62, %v1929_v32  ;;  %v1931_v34 = vadd.f32 %v1930_v45, %v6818_v58  ;;  %v8034_v7 = vld [vmem:[#allocation12_spill] sm:$0xff] }
 0x23c   :  { %v6924_v13 = vmul.bf16 %v2454_v56, %v2454_v56  ;;  %v2455_v6 = vadd.bf16 1065369472, %v5691_v29  ;;  %5704 = vpow.bf16 %v2407_v31  ;;  %v1934_v22 = vpop.f32.mrf.mxu0  ;;  %v2410_v16 = vmul.bf16 1069105081, %v2335_v63  ;;  %v5389_v31 = vld [vmem:[#allocation4 + $0x88] ss:$16 sps:$4 sm:$0xff]  }
 0x23d   :  { %v2047_v44 = vpop.f32.mrf.mxu1  ;;  %v6930_v15 = vpack.c.bf16 %v2042_v42, %v2038_v49  ;;  %v2044_v24 = vadd.f32 %v2043_v28, %v1931_v34  ;;  %v6939_v39 = vrot.slane %v6810_v14, %v8034_v7  ;;  %v1935_v10 = vadd.f32 %v1934_v22, %v6814_v5  ;;  %v5397_v63 = vld [vmem:[#allocation4 + $0x6c] ss:$16 sps:$4 sm:$0xff]  }
 0x23e   :  { %3588 = vmatpush1.bf16.msra.mxu0 %v5377_v2  ;;  %v5693_v17 = vpop.eup %5692  ;;  %v2550_v21 = vadd.bf16 1065369472, %v6924_v13  ;;  %v6935_v12 = vmul.bf16 %v2455_v6, %v2455_v6  ;;  %v1936_v8 = vpop.f32.mrf.mxu0  ;;  %5706 = vpow.bf16 %v2410_v16 }
 0x23f   :  { %v2049_v52 = vpop.f32.mrf.mxu1  ;;  %3589 = vmatprep.subr.bf16.mxu0 %v5385_v4  ;;  %v2338_v0 = vmin.bf16 %v8008_v27, %v6930_v15  ;;  %v6945_v53 = vpack.c.bf16 %v2044_v24, %v2040_v30  ;;  %v2579_v19 = vmul.bf16 %v5693_v17, %v2510_v23  ;;  %v1937_v43 = vadd.f32 %v1936_v8, %v6818_v58  ;;  %v5395_v8 = vld [vmem:[#allocation4 + $0x68] ss:$16 sps:$4 sm:$0xff]  }
 0x240   :  { %v5695_v40 = vpop.eup %5694  ;;  %5708 = vrcp.bf16 %v2550_v21  ;;  %v2551_v14 = vadd.bf16 1065369472, %v6935_v12  ;;  %v1938_v62 = vpop.f32.mrf.mxu0  ;;  %v2048_v30 = vadd.f32 %v2047_v44, %v1935_v10 }
 0x241   :  { %v2051_v20 = vpop.f32.mrf.mxu1  ;;  %v5697_v38 = vpop.eup %5696  ;;  %v2581_v32 = vmul.bf16 %v5695_v40, %v2511_v48  ;;  %v2419_v2 = vmul.bf16 1069105081, %v2338_v0  ;;  %v2339_v56 = vmin.bf16 %v8008_v27, %v6945_v53  ;;  %v1939_v28 = vadd.f32 %v1938_v62, %v6814_v5 }
 0x242   :  { %3590 = vmatpush1.bf16.msra.mxu0 %v5383_v37  ;;  %5710 = vrcp.bf16 %v2551_v14  ;;  %v2458_v45 = vadd.bf16 1065369472, %v5697_v38  ;;  %v1940_v4 = vpop.f32.mrf.mxu0  ;;  %v2050_v5 = vadd.f32 %v2049_v52, %v1937_v43  ;;  %v5403_v14 = vld [vmem:[#allocation4 + $0x4c] ss:$16 sps:$4 sm:$0xff]   ;;  %v2515_v52 = vsub.bf16 %v6907_v46, %v8004_v55 }
 0x243   :  { %v2053_v29 = vpop.f32.mrf.mxu1  ;;  %3591 = vmatprep.subr.bf16.mxu0 %v5391_v33  ;;  %v5699_v49 = vpop.eup %5698  ;;  %v2639_v42 = vmul.bf16 %v2581_v32, %v6841_v50  ;;  %5712 = vpow.bf16 %v2419_v2  ;;  %v2422_v34 = vmul.bf16 1069105081, %v2339_v56  ;;  %v1941_v6 = vadd.f32 %v1940_v4, %v6818_v58 }
 0x244   :  { %v6959_v22 = vmul.bf16 %v2458_v45, %v2458_v45  ;;  %v2459_v16 = vadd.bf16 1065369472, %v5699_v49  ;;  %v2052_v24 = vadd.f32 %v2051_v20, %v1939_v28  ;;  %v2090_v37 = vpop.f32.mrf.mxu0  ;;  %v2638_v33 = vmul.bf16 %v2579_v19, %v6836_v57  ;;  %v5401_v45 = vld [vmem:[#allocation4 + $0x48] ss:$16 sps:$4 sm:$0xff]   ;;  %v5409_v49 = vld [vmem:[#allocation4 + $0x2c] ss:$16 sps:$4 sm:$0xff]  }
 0x245   :  { %v2203_v17 = vpop.f32.mrf.mxu1  ;;  %5714 = vpow.bf16 %v2422_v34  ;;  %v2054_v23 = vadd.f32 %v2053_v29, %v1941_v6  ;;  %v6962_v21 = vmin.bf16 %v8018_v18, %v2639_v42  ;;  %v2091_v62 = vadd.f32 %v2090_v37, %v6928_v60 }
 0x246   :  { %3592 = vmatpush1.bf16.msra.mxu0 %v5389_v31  ;;  %v2554_v58 = vadd.bf16 1065369472, %v6959_v22  ;;  %v6966_v48 = vmul.bf16 %v2459_v16, %v2459_v16  ;;  %v6968_v0 = vpack.c.bf16 %v2052_v24, %v2048_v30  ;;  %v2092_v44 = vpop.f32.mrf.mxu0  ;;  %v6985_v4 = vmin.bf16 %v8018_v18, %v2638_v33 }
 0x247   :  { %v5701_v50 = vpop.eup %5700  ;;  %v2205_v40 = vpop.f32.mrf.mxu1  ;;  %3593 = vmatprep.subr.bf16.mxu0 %v5397_v63  ;;  %v6972_v10 = vpack.c.bf16 %v2054_v23, %v2050_v5  ;;  %3401 = vmatprep.mubr.bf16.mxu0 %v6962_v21  ;;  %v2093_v31 = vadd.f32 %v2092_v44, %v6939_v39  ;;  %v2204_v24 = vadd.f32 %v2203_v17, %v2091_v62 }
 0x248   :  { %v2587_v20 = vmul.bf16 %v5701_v50, %v6949_v3  ;;  %5716 = vrcp.bf16 %v2554_v58  ;;  %v2555_v38 = vadd.bf16 1065369472, %v6966_v48  ;;  %v2342_v19 = vmin.bf16 %v8008_v27, %v6968_v0  ;;  %v2094_v32 = vpop.f32.mrf.mxu0  ;;  %3402 = vmatmul.mubr.bf16.gmra.mxu0 %v6985_v4 }
 0x249   :  { %v5703_v57 = vpop.eup %5702  ;;  %v2207_v2 = vpop.f32.mrf.mxu1  ;;  %v2343_v46 = vmin.bf16 %v8008_v27, %v6972_v10  ;;  %v2095_v3 = vadd.f32 %v2094_v32, %v6928_v60  ;;  %v2206_v33 = vadd.f32 %v2205_v40, %v2093_v31  ;;  %v2519_v40 = vsub.bf16 %v6935_v12, %v8004_v55 }
 0x24a   :  { %v2589_v56 = vmul.bf16 %v5703_v57, %v2515_v52  ;;  %3594 = vmatpush1.bf16.msra.mxu0 %v5395_v8  ;;  %v5705_v43 = vpop.eup %5704  ;;  %5718 = vrcp.bf16 %v2555_v38  ;;  %v2431_v28 = vmul.bf16 1069105081, %v2342_v19  ;;  %v2096_v29 = vpop.f32.mrf.mxu0  ;;  %v2642_v30 = vmul.bf16 %v2587_v20, %v6848_v59  ;;  %v5415_v20 = vld [vmem:[#allocation4 + $0xc] ss:$16 sps:$4 sm:$0xff]  }
 0x24b   :  { %v2209_v63 = vpop.f32.mrf.mxu1  ;;  %3595 = vmatprep.subr.bf16.mxu0 %v5403_v14  ;;  %v2462_v34 = vadd.bf16 1065369472, %v5705_v43  ;;  %v2434_v6 = vmul.bf16 1069105081, %v2343_v46  ;;  %v2097_v16 = vadd.f32 %v2096_v29, %v6939_v39  ;;  %v2208_v37 = vadd.f32 %v2207_v2, %v2095_v3  ;;  %v5413_v29 = vld [vmem:[#allocation4 + $0x8] ss:$16 sps:$4 sm:$0xff]  }
 0x24c   :  { %v2643_v42 = vmul.bf16 %v2589_v56, %v6855_v36  ;;  %5720 = vpow.bf16 %v2431_v28  ;;  %v2100_v5 = vpop.f32.mrf.mxu0  ;;  %v5707_v8 = vpop.eup %5706  ;;  %v5407_v36 = vld [vmem:[#allocation4 + $0x28] ss:$16 sps:$4 sm:$0xff]   ;;  %v2518_v38 = vsub.bf16 %v6924_v13, %v8004_v55  ;;  %v7008_v56 = vsub.bf16 %v6959_v22, %v8004_v55 }
 0x24d   :  { %v2213_v23 = vpop.f32.mrf.mxu1  ;;  %v6991_v50 = vmul.bf16 %v2462_v34, %v2462_v34  ;;  %5722 = vpow.bf16 %v2434_v6  ;;  %v2210_v58 = vadd.f32 %v2209_v63, %v2097_v16  ;;  %v2463_v14 = vadd.bf16 1065369472, %v5707_v8  ;;  %v5421_v63 = vld [vmem:[#allocation4 + $0x1ec] ss:$16 sps:$4 sm:$0xff]  }
 0x24e   :  { %3596 = vmatpush1.bf16.msra.mxu0 %v5401_v45  ;;  %v5709_v44 = vpop.eup %5708  ;;  %v6993_v52 = vpack.c.bf16 %v2208_v37, %v2204_v24  ;;  %v2101_v59 = vadd.f32 %v2100_v5, %v6928_v60  ;;  %v2102_v17 = vpop.f32.mrf.mxu0  ;;  %v6997_v57 = vmin.bf16 %v8018_v18, %v2643_v42  ;;  %v7016_v12 = vmin.bf16 %v8018_v18, %v2642_v30 }
 0x24f   :  { %v2215_v62 = vpop.f32.mrf.mxu1  ;;  %3597 = vmatprep.subr.bf16.mxu0 %v5409_v49  ;;  %v2558_v19 = vadd.bf16 1065369472, %v6991_v50  ;;  %v7004_v32 = vpack.c.bf16 %v2210_v58, %v2206_v33  ;;  %v7010_v46 = vmul.bf16 %v2463_v14, %v2463_v14  ;;  %v2595_v28 = vmul.bf16 %v5709_v44, %v2518_v38 }
 0x250   :  { %v5711_v2 = vpop.eup %5710  ;;  %v2316_v31 = vmin.bf16 %v8008_v27, %v6993_v52  ;;  %3411 = vmatprep.mubr.bf16.mxu0 %v6997_v57  ;;  %v2104_v13 = vpop.f32.mrf.mxu0  ;;  %v2214_v6 = vadd.f32 %v2213_v23, %v2101_v59  ;;  %v2103_v8 = vadd.f32 %v2102_v17, %v6939_v39  ;;  %v5419_v17 = vld [vmem:[#allocation4 + $0x1e8] ss:$16 sps:$4 sm:$0xff]  }
 0x251   :  { %v2217_v45 = vpop.f32.mrf.mxu1  ;;  %v5713_v43 = vpop.eup %5712  ;;  %v2597_v3 = vmul.bf16 %v5711_v2, %v2519_v40  ;;  %5724 = vrcp.bf16 %v2558_v19  ;;  %v2317_v22 = vmin.bf16 %v8008_v27, %v7004_v32  ;;  %v2559_v49 = vadd.bf16 1065369472, %v7010_v46  ;;  %3412 = vmatmul.mubr.bf16.gmra.mxu0 %v7016_v12 }
 0x252   :  { %3598 = vmatpush1.bf16.msra.mxu0 %v5407_v36  ;;  %v2466_v42 = vadd.bf16 1065369472, %v5713_v43  ;;  %v2353_v34 = vmul.bf16 1069105081, %v2316_v31  ;;  %v2106_v16 = vpop.f32.mrf.mxu0  ;;  %v2105_v33 = vadd.f32 %v2104_v13, %v6928_v60  ;;  %v2646_v59 = vmul.bf16 %v2595_v28, %v6863_v47  ;;  %v5427_v43 = vld [vmem:[#allocation4 + $0x1cc] ss:$16 sps:$4 sm:$0xff]  }
 0x253   :  { %v2219_v24 = vpop.f32.mrf.mxu1  ;;  %3599 = vmatprep.subr.bf16.mxu0 %v5415_v20  ;;  %v5715_v30 = vpop.eup %5714  ;;  %v2647_v37 = vmul.bf16 %v2597_v3, %v6868_v51  ;;  %v2356_v5 = vmul.bf16 1069105081, %v2317_v22  ;;  %5726 = vrcp.bf16 %v2559_v49  ;;  %v2107_v44 = vadd.f32 %v2106_v16, %v6939_v39 }
 0x254   :  { %v7024_v58 = vmul.bf16 %v2466_v42, %v2466_v42  ;;  %v2467_v36 = vadd.bf16 1065369472, %v5715_v30  ;;  %v2110_v23 = vpop.f32.mrf.mxu0  ;;  %5728 = vpow.bf16 %v2353_v34  ;;  %v2218_v20 = vadd.f32 %v2217_v45, %v2105_v33 }
 0x255   :  { %v2223_v14 = vpop.f32.mrf.mxu1  ;;  %v7030_v51 = vmin.bf16 %v8018_v18, %v2647_v37  ;;  %5730 = vpow.bf16 %v2356_v5  ;;  %v2111_v2 = vadd.f32 %v2110_v23, %v6928_v60  ;;  %v2523_v47 = vsub.bf16 %v6966_v48, %v8004_v55  ;;  %v5425_v48 = vld [vmem:[#allocation4 + $0x1c8] ss:$16 sps:$4 sm:$0xff]  }
 0x256   :  { %3600 = vmatpush1.bf16.msra.mxu0 %v5413_v29  ;;  %v5717_v38 = vpop.eup %5716  ;;  %v2562_v40 = vadd.bf16 1065369472, %v7024_v58  ;;  %v7033_v19 = vmul.bf16 %v2467_v36, %v2467_v36  ;;  %v2112_v31 = vpop.f32.mrf.mxu0  ;;  %v2216_v45 = vadd.f32 %v2215_v62, %v2103_v8  ;;  %v7038_v28 = vpack.c.bf16 %v2218_v20, %v2214_v6 }
 0x257   :  { %v2225_v13 = vpop.f32.mrf.mxu1  ;;  %3601 = vmatprep.subr.bf16.mxu0 %v5421_v63  ;;  %v2220_v3 = vadd.f32 %v2219_v24, %v2107_v44  ;;  %3421 = vmatprep.mubr.bf16.mxu0 %v7030_v51  ;;  %v2603_v34 = vmul.bf16 %v5717_v38, %v7008_v56  ;;  %v2224_v6 = vadd.f32 %v2223_v14, %v2111_v2  ;;  %v5433_v56 = vld [vmem:[#allocation4 + $0x1ac] ss:$16 sps:$4 sm:$0xff]  }
 0x258   :  { %v5719_v22 = vpop.eup %5718  ;;  %5732 = vrcp.bf16 %v2562_v40  ;;  %v2563_v29 = vadd.bf16 1065369472, %v7033_v19  ;;  %v2114_v49 = vpop.f32.mrf.mxu0  ;;  %v2320_v63 = vmin.bf16 %v8008_v27, %v7038_v28  ;;  %v7049_v37 = vmin.bf16 %v8018_v18, %v2646_v59 }
 0x259   :  { %v2227_v42 = vpop.f32.mrf.mxu1  ;;  %v2605_v16 = vmul.bf16 %v5719_v22, %v2523_v47  ;;  %v7045_v30 = vpack.c.bf16 %v2220_v3, %v2216_v45  ;;  %v2115_v24 = vadd.f32 %v2114_v49, %v6928_v60  ;;  %v2113_v20 = vadd.f32 %v2112_v31, %v6939_v39  ;;  %v5431_v31 = vld [vmem:[#allocation4 + $0x1a8] ss:$16 sps:$4 sm:$0xff]  }
 0x25a   :  { %3602 = vmatpush2.bf16.msra.mxu0 %v5419_v17  ;;  %v5721_v62 = vpop.eup %5720  ;;  %5734 = vrcp.bf16 %v2563_v29  ;;  %v2116_v5 = vpop.f32.mrf.mxu0  ;;  %v2365_v23 = vmul.bf16 1069105081, %v2320_v63 }
 0x25b   :  { %v2229_v8 = vpop.f32.mrf.mxu1  ;;  %3603 = vmatprep.subr.bf16.mxu0 %v5427_v43  ;;  %v5723_v33 = vpop.eup %5722  ;;  %v2651_v36 = vmul.bf16 %v2605_v16, %v6888_v35  ;;  %v2470_v44 = vadd.bf16 1065369472, %v5721_v62  ;;  %v2321_v14 = vmin.bf16 %v8008_v27, %v7045_v30  ;;  %v2228_v38 = vadd.f32 %v2227_v42, %v2115_v24  ;;  %3422 = vmatmul.mubr.bf16.gmra.mxu0 %v7049_v37  ;;  %v5439_v16 = vld [vmem:[#allocation4 + $0x18c] ss:$16 sps:$4 sm:$0xff]  }
 0x25c   :  { %v2471_v17 = vadd.bf16 1065369472, %v5723_v33  ;;  %v2117_v59 = vadd.f32 %v2116_v5, %v6939_v39  ;;  %v2120_v40 = vpop.f32.mrf.mxu0  ;;  %v2650_v43 = vmul.bf16 %v2603_v34, %v6878_v9  ;;  %5736 = vpow.bf16 %v2365_v23  ;;  %v5437_v33 = vld [vmem:[#allocation4 + $0x188] ss:$16 sps:$4 sm:$0xff]  }
 0x25d   :  { %v2233_v2 = vpop.f32.mrf.mxu1  ;;  %v7058_v47 = vmul.bf16 %v2470_v44, %v2470_v44  ;;  %v7061_v35 = vmin.bf16 %v8018_v18, %v2651_v36  ;;  %v2368_v3 = vmul.bf16 1069105081, %v2321_v14  ;;  %v7065_v22 = vpack.c.bf16 %v2228_v38, %v2224_v6 }
 0x25e   :  { %3604 = vmatpush2.bf16.msra.mxu0 %v5425_v48  ;;  %v7063_v45 = vmul.bf16 %v2471_v17, %v2471_v17  ;;  %v2230_v29 = vadd.f32 %v2229_v8, %v2117_v59  ;;  %v2122_v49 = vpop.f32.mrf.mxu0  ;;  %v2226_v34 = vadd.f32 %v2225_v13, %v2113_v20  ;;  %v2526_v48 = vsub.bf16 %v6991_v50, %v8004_v55 }
 0x25f   :  { %v2235_v42 = vpop.f32.mrf.mxu1  ;;  %3605 = vmatprep.subr.bf16.mxu0 %v5433_v56  ;;  %v5725_v63 = vpop.eup %5724  ;;  %v2566_v9 = vadd.bf16 1065369472, %v7058_v47  ;;  %3431 = vmatprep.mubr.bf16.mxu0 %v7061_v35  ;;  %5738 = vpow.bf16 %v2368_v3  ;;  %v2121_v6 = vadd.f32 %v2120_v40, %v6928_v60  ;;  %v2527_v8 = vsub.bf16 %v7010_v46, %v8004_v55  ;;  %v5445_v46 = vld [vmem:[#allocation4 + $0x16c] ss:$16 sps:$4 sm:$0xff]  }
 0x260   :  { %v2567_v62 = vadd.bf16 1065369472, %v7063_v45  ;;  %v2124_v24 = vpop.f32.mrf.mxu0  ;;  %v2324_v56 = vmin.bf16 %v8008_v27, %v7065_v22  ;;  %v7077_v13 = vpack.c.bf16 %v2230_v29, %v2226_v34  ;;  %v7080_v50 = vmin.bf16 %v8018_v18, %v2650_v43 }
 0x261   :  { %v2237_v5 = vpop.f32.mrf.mxu1  ;;  %5740 = vrcp.bf16 %v2566_v9  ;;  %v5727_v36 = vpop.eup %5726  ;;  %v2611_v44 = vmul.bf16 %v5725_v63, %v2526_v48  ;;  %v2123_v23 = vadd.f32 %v2122_v49, %v6939_v39  ;;  %v2125_v20 = vadd.f32 %v2124_v24, %v6928_v60  ;;  %v5443_v24 = vld [vmem:[#allocation4 + $0x168] ss:$16 sps:$4 sm:$0xff]  }
 0x262   :  { %3606 = vmatpush2.bf16.msra.mxu0 %v5431_v31  ;;  %v2126_v17 = vpop.f32.mrf.mxu0  ;;  %v5729_v38 = vpop.eup %5728  ;;  %5742 = vrcp.bf16 %v2567_v62  ;;  %v2377_v59 = vmul.bf16 1069105081, %v2324_v56  ;;  %v2325_v40 = vmin.bf16 %v8008_v27, %v7077_v13  ;;  %v2613_v43 = vmul.bf16 %v5727_v36, %v2527_v8  ;;  %v5451_v36 = vld [vmem:[#allocation4 + $0x14c] ss:$16 sps:$4 sm:$0xff]  }
 0x263   :  { %v2239_v14 = vpop.f32.mrf.mxu1  ;;  %3607 = vmatprep.subr.bf16.mxu0 %v5439_v16  ;;  %v2127_v31 = vadd.f32 %v2126_v17, %v6939_v39  ;;  %v5731_v3 = vpop.eup %5730  ;;  %v2444_v29 = vadd.bf16 1065369472, %v5729_v38  ;;  %v2234_v63 = vadd.f32 %v2233_v2, %v2121_v6  ;;  %v2238_v9 = vadd.f32 %v2237_v5, %v2125_v20  ;;  %3432 = vmatmul.mubr.bf16.gmra.mxu0 %v7080_v50 }
 0x264   :  { %v2130_v49 = vpop.f32.mrf.mxu0  ;;  %v2530_v16 = vsub.bf16 %v7024_v58, %v8004_v55  ;;  %v2445_v48 = vadd.bf16 1065369472, %v5731_v3  ;;  %5744 = vpow.bf16 %v2377_v59  ;;  %v2380_v62 = vmul.bf16 1069105081, %v2325_v40  ;;  %v5449_v3 = vld [vmem:[#allocation4 + $0x148] ss:$16 sps:$4 sm:$0xff]  }
 0x265   :  { %v2243_v34 = vpop.f32.mrf.mxu1  ;;  %v7090_v7 = vmul.bf16 %v2444_v29, %v2444_v29  ;;  %v2236_v17 = vadd.f32 %v2235_v42, %v2123_v23  ;;  %v7092_v8 = vpack.c.bf16 %v2238_v9, %v2234_v63  ;;  %v2240_v2 = vadd.f32 %v2239_v14, %v2127_v31 }
 0x266   :  { %3608 = vmatpush2.bf16.msra.mxu0 %v5437_v33  ;;  %v5733_v56 = vpop.eup %5732  ;;  %v2132_v6 = vpop.f32.mrf.mxu0  ;;  %v2654_v20 = vmul.bf16 %v2611_v44, %v6909_v54  ;;  %v2531_v58 = vsub.bf16 %v7033_v19, %v8004_v55  ;;  %v7097_v38 = vmul.bf16 %v2445_v48, %v2445_v48  ;;  %5746 = vpow.bf16 %v2380_v62  ;;  %v5457_v48 = vld [vmem:[#allocation4 + $0x12c] ss:$16 sps:$4 sm:$0xff]  }
 0x267   :  { %v2245_v5 = vpop.f32.mrf.mxu1  ;;  %3609 = vmatprep.subr.bf16.mxu0 %v5445_v46  ;;  %v2655_v59 = vmul.bf16 %v2613_v43, %v6917_v1  ;;  %v2540_v42 = vadd.bf16 1065369472, %v7090_v7  ;;  %v2328_v23 = vmin.bf16 %v8008_v27, %v7092_v8  ;;  %v7103_v14 = vpack.c.bf16 %v2240_v2, %v2236_v17 }
 0x268   :  { %v5735_v33 = vpop.eup %5734  ;;  %v2134_v46 = vpop.f32.mrf.mxu0  ;;  %v2619_v31 = vmul.bf16 %v5733_v56, %v2530_v16  ;;  %v2541_v44 = vadd.bf16 1065369472, %v7097_v38  ;;  %v2131_v19 = vadd.f32 %v2130_v49, %v6928_v60  ;;  %v2133_v43 = vadd.f32 %v2132_v6, %v6939_v39 }
 0x269   :  { %v2247_v40 = vpop.f32.mrf.mxu1  ;;  %v2621_v54 = vmul.bf16 %v5735_v33, %v2531_v58  ;;  %5748 = vrcp.bf16 %v2540_v42  ;;  %v2389_v29 = vmul.bf16 1069105081, %v2328_v23  ;;  %v2329_v1 = vmin.bf16 %v8008_v27, %v7103_v14 }
 0x26a   :  { %3610 = vmatpush2.bf16.msra.mxu0 %v5443_v24  ;;  %v2136_v63 = vpop.f32.mrf.mxu0  ;;  %v5737_v62 = vpop.eup %5736  ;;  %v7111_v16 = vmin.bf16 %v8018_v18, %v2654_v20  ;;  %v7116_v49 = vsub.bf16 %v7058_v47, %v8004_v55  ;;  %5750 = vrcp.bf16 %v2541_v44  ;;  %v7119_v2 = vmin.bf16 %v8018_v18, %v2655_v59  ;;  %v5455_v47 = vld [vmem:[#allocation4 + $0x128] ss:$16 sps:$4 sm:$0xff]  }
 0x26b   :  { %v2249_v9 = vpop.f32.mrf.mxu1  ;;  %3611 = vmatprep.subr.bf16.mxu0 %v5451_v36  ;;  %v2659_v56 = vmul.bf16 %v2621_v54, %v6945_v53  ;;  %v2448_v24 = vadd.bf16 1065369472, %v5737_v62  ;;  %5752 = vpow.bf16 %v2389_v29  ;;  %v2392_v17 = vmul.bf16 1069105081, %v2329_v1 }
 0x26c   :  { %v2140_v6 = vpop.f32.mrf.mxu0  ;;  %v2658_v58 = vmul.bf16 %v2619_v31, %v6930_v15  ;;  %v2135_v20 = vadd.f32 %v2134_v46, %v6928_v60  ;;  %v2137_v33 = vadd.f32 %v2136_v63, %v6939_v39  ;;  %v2244_v54 = vadd.f32 %v2243_v34, %v2131_v19  ;;  %3441 = vmatprep.mubr.bf16.mxu0 %v7119_v2  ;;  %v5463_v15 = vld [vmem:[#allocation4 + $0x10c] ss:$16 sps:$4 sm:$0xff]  }
 0x26d   :  { %v2253_v36 = vpop.f32.mrf.mxu1  ;;  %v7125_v53 = vmin.bf16 %v8018_v18, %v2659_v56  ;;  %v5739_v42 = vpop.eup %5738  ;;  %v7127_v23 = vmul.bf16 %v2448_v24, %v2448_v24  ;;  %5754 = vpow.bf16 %v2392_v17  ;;  %v2246_v59 = vadd.f32 %v2245_v5, %v2133_v43  ;;  %3442 = vmatmul.mubr.bf16.gmra.mxu0 %v7111_v16 }
 0x26e   :  { %3612 = vmatpush2.bf16.msra.mxu0 %v5449_v3  ;;  %v2142_v44 = vpop.f32.mrf.mxu0  ;;  %v2449_v31 = vadd.bf16 1065369472, %v5739_v42  ;;  %v2248_v1 = vadd.f32 %v2247_v40, %v2135_v20  ;;  %v2250_v63 = vadd.f32 %v2249_v9, %v2137_v33  ;;  %v2141_v3 = vadd.f32 %v2140_v6, %v6928_v60 }
 0x26f   :  { %v2255_v29 = vpop.f32.mrf.mxu1  ;;  %3613 = vmatprep.subr.bf16.mxu0 %v5457_v48  ;;  %v5741_v46 = vpop.eup %5740  ;;  %v2535_v62 = vsub.bf16 %v7063_v45, %v8004_v55  ;;  %v7136_v34 = vsub.bf16 %v7090_v7, %v8004_v55  ;;  %v2544_v5 = vadd.bf16 1065369472, %v7127_v23  ;;  %3451 = vmatprep.mubr.bf16.mxu0 %v7125_v53  ;;  %v5461_v45 = vld [vmem:[#allocation4 + $0x108] ss:$16 sps:$4 sm:$0xff]   ;;  %v7148_v7 = vmin.bf16 %v8018_v18, %v2658_v58 }
 0x270   :  { %v2144_v19 = vpop.f32.mrf.mxu0  ;;  %v5743_v48 = vpop.eup %5742  ;;  %v2627_v40 = vmul.bf16 %v5741_v46, %v7116_v49  ;;  %v7141_v56 = vmul.bf16 %v2449_v31, %v2449_v31  ;;  %v7143_v9 = vpack.c.bf16 %v2248_v1, %v2244_v54  ;;  %v7145_v24 = vpack.c.bf16 %v2250_v63, %v2246_v59 }
 0x271   :  { %v2257_v43 = vpop.f32.mrf.mxu1  ;;  %v7152_v17 = vsub.bf16 %v7097_v38, %v8004_v55  ;;  %5756 = vrcp.bf16 %v2544_v5  ;;  %v2145_v6 = vadd.f32 %v2144_v19, %v6928_v60  ;;  %v2254_v54 = vadd.f32 %v2253_v36, %v2141_v3 }
 0x272   :  { %3614 = vmatpush2.bf16.msra.mxu0 %v5455_v47  ;;  %v2146_v20 = vpop.f32.mrf.mxu0  ;;  %v5745_v33 = vpop.eup %5744  ;;  %v2545_v42 = vadd.bf16 1065369472, %v7141_v56  ;;  %v2332_v47 = vmin.bf16 %v8008_v27, %v7143_v9  ;;  %v2143_v58 = vadd.f32 %v2142_v44, %v6939_v39  ;;  %v2629_v59 = vmul.bf16 %v5743_v48, %v2535_v62 }
 0x273   :  { %v2259_v49 = vpop.f32.mrf.mxu1  ;;  %3615 = vmatprep.subr.bf16.mxu0 %v5463_v15  ;;  %v2452_v46 = vadd.bf16 1065369472, %v5745_v33  ;;  %v2333_v38 = vmin.bf16 %v8008_v27, %v7145_v24  ;;  %v2258_v31 = vadd.f32 %v2257_v43, %v2145_v6  ;;  %v2662_v15 = vmul.bf16 %v2627_v40, %v6968_v0 }
 0x274   :  { %v2150_v1 = vpop.f32.mrf.mxu0  ;;  %v5747_v5 = vpop.eup %5746  ;;  %5758 = vrcp.bf16 %v2545_v42  ;;  %v2401_v19 = vmul.bf16 1069105081, %v2332_v47  ;;  %v2147_v41 = vadd.f32 %v2146_v20, %v6939_v39  ;;  %v2256_v43 = vadd.f32 %v2255_v29, %v2143_v58 }
 0x275   :  { %v2263_v63 = vpop.f32.mrf.mxu1  ;;  %v7163_v26 = vmul.bf16 %v2452_v46, %v2452_v46  ;;  %v2453_v36 = vadd.bf16 1065369472, %v5747_v5  ;;  %v2404_v44 = vmul.bf16 1069105081, %v2333_v38  ;;  %v7165_v3 = vpack.c.bf16 %v2258_v31, %v2254_v54  ;;  %3452 = vmatmul.mubr.bf16.gmra.mxu0 %v7148_v7 }
 0x276   :  { %3616 = vmatpush2.bf16.msra.mxu0 %v5461_v45  ;;  %v2152_v62 = vpop.f32.mrf.mxu0  ;;  %5760 = vpow.bf16 %v2401_v19  ;;  %v2260_v6 = vadd.f32 %v2259_v49, %v2147_v41  ;;  %v2151_v0 = vadd.f32 %v2150_v1, %v6928_v60  ;;  %v2663_v33 = vmul.bf16 %v2629_v59, %v6972_v10 }
 0x277   :  { %v2265_v48 = vpop.f32.mrf.mxu1  ;;  %v5749_v40 = vpop.eup %5748  ;;  %v2548_v45 = vadd.bf16 1065369472, %v7163_v26  ;;  %v7171_v20 = vmul.bf16 %v2453_v36, %v2453_v36  ;;  %5762 = vpow.bf16 %v2404_v44  ;;  %v2336_v29 = vmin.bf16 %v8008_v27, %v7165_v3 }
 0x278   :  { %v2154_v42 = vpop.f32.mrf.mxu0  ;;  %v5751_v54 = vpop.eup %5750  ;;  %v2575_v46 = vmul.bf16 %v5749_v40, %v7136_v34  ;;  %v7176_v58 = vpack.c.bf16 %v2260_v6, %v2256_v43  ;;  %v7179_v49 = vmin.bf16 %v8018_v18, %v2662_v15  ;;  %v2264_v19 = vadd.f32 %v2263_v63, %v2151_v0 }
 0x279   :  { %v2267_v47 = vpop.f32.mrf.mxu1  ;;  %v5753_v41 = vpop.eup %5752  ;;  %v2577_v10 = vmul.bf16 %v5751_v54, %v7152_v17  ;;  %5764 = vrcp.bf16 %v2548_v45  ;;  %v2549_v59 = vadd.bf16 1065369472, %v7171_v20  ;;  %v2413_v5 = vmul.bf16 1069105081, %v2336_v29 }
 0x27a   :  { %v2156_v38 = vpop.f32.mrf.mxu0  ;;  %v2456_v1 = vadd.bf16 1065369472, %v5753_v41  ;;  %v2337_v34 = vmin.bf16 %v8008_v27, %v7176_v58  ;;  %v2153_v44 = vadd.f32 %v2152_v62, %v6939_v39  ;;  %v7187_v15 = vmin.bf16 %v8018_v18, %v2663_v33 }
 0x27b   :  { %v2269_v31 = vpop.f32.mrf.mxu1  ;;  %v5755_v36 = vpop.eup %5754  ;;  %5766 = vrcp.bf16 %v2549_v59  ;;  %v2155_v17 = vadd.f32 %v2154_v42, %v6928_v60  ;;  %v2636_v40 = vmul.bf16 %v2575_v46, %v6993_v52  ;;  %v2637_v29 = vmul.bf16 %v2577_v10, %v7004_v32 }
 0x27c   :  { %v2160_v43 = vpop.f32.mrf.mxu0  ;;  %v7191_v45 = vmul.bf16 %v2456_v1, %v2456_v1  ;;  %v2457_v54 = vadd.bf16 1065369472, %v5755_v36  ;;  %5768 = vpow.bf16 %v2413_v5  ;;  %v2416_v63 = vmul.bf16 1069105081, %v2337_v34  ;;  %3461 = vmatprep.mubr.bf16.mxu0 %v7187_v15 }
 0x27d   :  { %v2273_v6 = vpop.f32.mrf.mxu1  ;;  %v2268_v0 = vadd.f32 %v2267_v47, %v2155_v17  ;;  %v2157_v62 = vadd.f32 %v2156_v38, %v6939_v39  ;;  %v2512_v42 = vsub.bf16 %v7127_v23, %v8004_v55  ;;  %v2513_v52 = vsub.bf16 %v7141_v56, %v8004_v55  ;;  %3462 = vmatmul.mubr.bf16.gmra.mxu0 %v7179_v49 }
 0x27e   :  { %v2162_v33 = vpop.f32.mrf.mxu0  ;;  %v2552_v46 = vadd.bf16 1065369472, %v7191_v45  ;;  %v7201_v59 = vmul.bf16 %v2457_v54, %v2457_v54  ;;  %5770 = vpow.bf16 %v2416_v63  ;;  %v2266_v10 = vadd.f32 %v2265_v48, %v2153_v44  ;;  %3617 = vmatprep.mubr.bf16.mxu0 %v6901_v11  ;;  %v5469_v63 = vld [vmem:[#allocation4 + $0x2cc] ss:$16 sps:$4 sm:$0xff]  }
 0x27f   :  { %v2275_v41 = vpop.f32.mrf.mxu1  ;;  %v5757_v32 = vpop.eup %5756  ;;  %v7204_v47 = vpack.c.bf16 %v2268_v0, %v2264_v19  ;;  %v2270_v38 = vadd.f32 %v2269_v31, %v2157_v62  ;;  %v7208_v23 = vmin.bf16 %v8018_v18, %v2636_v40  ;;  %v2161_v34 = vadd.f32 %v2160_v43, %v6928_v60  ;;  %v5464_v31 = vld [vmem:[#allocation4 + $0x2e8] ss:$16 sps:$4 sm:$0xff]  }
 0x280   :  { %v2164_v1 = vpop.f32.mrf.mxu0  ;;  %v2553_v56 = vadd.bf16 1065369472, %v7201_v59  ;;  %v2163_v36 = vadd.f32 %v2162_v33, %v6939_v39  ;;  %5772 = vrcp.bf16 %v2552_v46  ;;  %v7218_v11 = vmin.bf16 %v8018_v18, %v2637_v29 }
 0x281   :  { %v2277_v5 = vpop.f32.mrf.mxu1  ;;  %v2340_v48 = vmin.bf16 %v8008_v27, %v7204_v47  ;;  %v7215_v19 = vpack.c.bf16 %v2270_v38, %v2266_v10  ;;  %v2583_v40 = vmul.bf16 %v5757_v32, %v2512_v42  ;;  %v2165_v54 = vadd.f32 %v2164_v1, %v6928_v60  ;;  %v5467_v1 = vld [vmem:[#allocation4 + $0x2c8] ss:$16 sps:$4 sm:$0xff]  }
 0x282   :  { %v2166_v44 = vpop.f32.mrf.mxu0  ;;  %v5759_v17 = vpop.eup %5758  ;;  %5774 = vrcp.bf16 %v2553_v56  ;;  %3504 = vmatprep.mubr.bf16.mxu1 %v7218_v11  ;;  %v2274_v10 = vadd.f32 %v2273_v6, %v2161_v34  ;;  %v2276_v38 = vadd.f32 %v2275_v41, %v2163_v36  ;;  %v5472_v41 = vld [vmem:[#allocation4 + $0x2ac] ss:$16 sps:$4 sm:$0xff]  }
 0x283   :  { %v2167_v43 = vadd.f32 %v2166_v44, %v6939_v39  ;;  %v2585_v0 = vmul.bf16 %v5759_v17, %v2513_v52  ;;  %v2425_v62 = vmul.bf16 1069105081, %v2340_v48  ;;  %v2341_v33 = vmin.bf16 %v8008_v27, %v7215_v19  ;;  %v2279_v46 = vpop.f32.mrf.mxu1  ;;  %3505 = vmatmul.mubr.bf16.vlgmr.msra.gmra.mxu1 %v7208_v23 }
 0x284   :  { %v5761_v29 = vpop.eup %5760  ;;  %v2278_v25 = vadd.f32 %v2277_v5, %v2165_v54  ;;  %3699 = vmatpush1.bf16.msra.mxu1 %v5464_v31  ;;  %v2640_v56 = vmul.bf16 %v2583_v40, %v7038_v28 }
 0x285   :  { %v2280_v42 = vadd.f32 %v2279_v46, %v2167_v43  ;;  %v5763_v32 = vpop.eup %5762  ;;  %v2641_v60 = vmul.bf16 %v2585_v0, %v7045_v30  ;;  %v2460_v39 = vadd.bf16 1065369472, %v5761_v29  ;;  %5776 = vpow.bf16 %v2425_v62  ;;  %3618 = vmatmul.mubr.bf16.vlgmr.msra.gmra.mxu0 %v6904_v61  ;;  %3700 = vmatprep.subr.bf16.mxu1 %v5469_v63  ;;  %v5475_v0 = vld [vmem:[#allocation4 + $0x28c] ss:$16 sps:$4 sm:$0xff]  }
 0x286   :  { %v2428_v52 = vmul.bf16 1069105081, %v2341_v33  ;;  %v2461_v48 = vadd.bf16 1065369472, %v5763_v32  ;;  %v7228_v44 = vpack.c.bf16 %v2278_v25, %v2274_v10  ;;  %v2516_v30 = vsub.bf16 %v7163_v26, %v8004_v55  ;;  %3627 = vmatprep.mubr.bf16.mxu0 %v6962_v21  ;;  %v5470_v21 = vld [vmem:[#allocation4 + $0x2a8] ss:$16 sps:$4 sm:$0xff]  }
 0x287   :  { %v7231_v6 = vpack.c.bf16 %v2280_v42, %v2276_v38  ;;  %v5765_v5 = vpop.eup %5764  ;;  %v7235_v34 = vmul.bf16 %v2460_v39, %v2460_v39  ;;  %v7239_v28 = vmin.bf16 %v8018_v18, %v2641_v60  ;;  %v2517_v25 = vsub.bf16 %v7171_v20, %v8004_v55  ;;  %v5473_v42 = vld [vmem:[#allocation4 + $0x288] ss:$16 sps:$4 sm:$0xff]  }
 0x288   :  { %5778 = vpow.bf16 %v2428_v52  ;;  %v7243_v61 = vmul.bf16 %v2461_v48, %v2461_v48  ;;  %v2344_v36 = vmin.bf16 %v8008_v27, %v7228_v44  ;;  %3701 = vmatpush1.bf16.msra.mxu1 %v5467_v1  ;;  %v2591_v54 = vmul.bf16 %v5765_v5, %v2516_v30  ;;  %v5476_v5 = vld [vmem:[#allocation4 + $0x268] ss:$16 sps:$4 sm:$0xff]  }
 0x289   :  { %v2345_v31 = vmin.bf16 %v8008_v27, %v7231_v6  ;;  %v5767_v26 = vpop.eup %5766  ;;  %v2556_v17 = vadd.bf16 1065369472, %v7235_v34  ;;  %3514 = vmatprep.mubr.bf16.mxu1 %v7239_v28  ;;  %3702 = vmatprep.subr.bf16.mxu1 %v5472_v41  ;;  %v7253_v63 = vmin.bf16 %v8018_v18, %v2640_v56  ;;  %v2521_v1 = vsub.bf16 %v7201_v59, %v8004_v55 }
 0x28a   :  { %v5769_v40 = vpop.eup %5768  ;;  %v2593_v43 = vmul.bf16 %v5767_v26, %v2517_v25  ;;  %v2557_v20 = vadd.bf16 1065369472, %v7243_v61  ;;  %v2437_v33 = vmul.bf16 1069105081, %v2344_v36  ;;  %v2644_v32 = vmul.bf16 %v2591_v54, %v7065_v22 }
 0x28b   :  { %5780 = vrcp.bf16 %v2556_v17  ;;  %v2464_v62 = vadd.bf16 1065369472, %v5769_v40  ;;  %v2440_v46 = vmul.bf16 1069105081, %v2345_v31  ;;  %3515 = vmatmul.mubr.bf16.gmra.mxu1 %v7253_v63  ;;  %v2520_v22 = vsub.bf16 %v7191_v45, %v8004_v55  ;;  %v5479_v17 = vld [vmem:[#allocation4 + $0x248] ss:$16 sps:$4 sm:$0xff]  }
 0x28c   :  { %v2645_v29 = vmul.bf16 %v2593_v43, %v7077_v13  ;;  %5782 = vrcp.bf16 %v2557_v20  ;;  %v5771_v10 = vpop.eup %5770  ;;  %3703 = vmatpush1.bf16.msra.mxu1 %v5470_v21  ;;  %v5478_v13 = vld [vmem:[#allocation4 + $0x26c] ss:$16 sps:$4 sm:$0xff]   ;;  %v7275_v59 = vmin.bf16 %v8018_v18, %v2644_v32 }
 0x28d   :  { %v7257_v38 = vmul.bf16 %v2464_v62, %v2464_v62  ;;  %5784 = vpow.bf16 %v2437_v33  ;;  %v2465_v60 = vadd.bf16 1065369472, %v5771_v10  ;;  %3628 = vmatmul.mubr.bf16.gmra.mxu0 %v6985_v4  ;;  %3704 = vmatprep.subr.bf16.mxu1 %v5475_v0  ;;  %v5484_v20 = vld [vmem:[#allocation4 + $0x22c] ss:$16 sps:$4 sm:$0xff]  }
 0x28e   :  { %5786 = vpow.bf16 %v2440_v46  ;;  %v7262_v39 = vmin.bf16 %v8018_v18, %v2645_v29  ;;  %v5773_v52 = vpop.eup %5772  ;;  %3637 = vmatprep.mubr.bf16.mxu0 %v6997_v57  ;;  %v5481_v57 = vld [vmem:[#allocation4 + $0x24c] ss:$16 sps:$4 sm:$0xff]   ;;  %v5482_v46 = vld [vmem:[#allocation4 + $0x228] ss:$16 sps:$4 sm:$0xff]  }
 0x28f   :  { %v2560_v56 = vadd.bf16 1065369472, %v7257_v38  ;;  %v7270_v41 = vmul.bf16 %v2465_v60, %v2465_v60  ;;  %v2599_v30 = vmul.bf16 %v5773_v52, %v2520_v22  ;;  %v5490_v22 = vld [vmem:[#allocation4 + $0x3ec] ss:$16 sps:$4 sm:$0xff]  }
 0x290   :  { %v5775_v48 = vpop.eup %5774  ;;  %3524 = vmatprep.mubr.bf16.mxu1 %v7262_v39  ;;  %3705 = vmatpush1.bf16.msra.mxu1 %v5473_v42  ;;  %v5487_v42 = vld [vmem:[#allocation4 + $0x20c] ss:$16 sps:$4 sm:$0xff]  }
 0x291   :  { %v2601_v4 = vmul.bf16 %v5775_v48, %v2521_v1  ;;  %5788 = vrcp.bf16 %v2560_v56  ;;  %v2561_v25 = vadd.bf16 1065369472, %v7270_v41  ;;  %3706 = vmatprep.subr.bf16.mxu1 %v5478_v13  ;;  %v2648_v40 = vmul.bf16 %v2599_v30, %v7092_v8  ;;  %v5485_v1 = vld [vmem:[#allocation4 + $0x208] ss:$16 sps:$4 sm:$0xff]  }
 0x292   :  { %v2525_v8 = vsub.bf16 %v7243_v61, %v8004_v55 }
 0x293   :  { %v5777_v36 = vpop.eup %5776  ;;  %v2649_v31 = vmul.bf16 %v2601_v4, %v7103_v14  ;;  %5790 = vrcp.bf16 %v2561_v25  ;;  %3525 = vmatmul.mubr.bf16.gmra.mxu1 %v7275_v59  ;;  %v2524_v14 = vsub.bf16 %v7235_v34, %v8004_v55 }
 0x294   :  { %v2468_v45 = vadd.bf16 1065369472, %v5777_v36  ;;  %3707 = vmatpush1.bf16.msra.mxu1 %v5476_v5 }
 0x295   :  { %v7280_v21 = vmin.bf16 %v8018_v18, %v2649_v31  ;;  %3638 = vmatmul.mubr.bf16.gmra.mxu0 %v7016_v12  ;;  %3708 = vmatprep.subr.bf16.mxu1 %v5481_v57  ;;  %v2529_v57 = vsub.bf16 %v7270_v41, %v8004_v55  ;;  %v5491_v41 = vld [vmem:[#allocation4 + $0x3c8] ss:$16 sps:$4 sm:$0xff]  }
 0x296   :  { %v5779_v26 = vpop.eup %5778  ;;  %v7283_v54 = vmul.bf16 %v2468_v45, %v2468_v45  ;;  %3647 = vmatprep.mubr.bf16.mxu0 %v7030_v51  ;;  %v7294_v51 = vmin.bf16 %v8018_v18, %v2648_v40  ;;  %v5493_v45 = vld [vmem:[#allocation4 + $0x3cc] ss:$16 sps:$4 sm:$0xff]  }
 0x297   :  { %v2469_v43 = vadd.bf16 1065369472, %v5779_v26  ;;  %3534 = vmatprep.mubr.bf16.mxu1 %v7280_v21  ;;  %v5496_v40 = vld [vmem:[#allocation4 + $0x3ac] ss:$16 sps:$4 sm:$0xff]  }
 0x298   :  { %v2564_v0 = vadd.bf16 1065369472, %v7283_v54  ;;  %3709 = vmatpush1.bf16.msra.mxu1 %v5479_v17 }
 0x299   :  { %v2501_v62 = vmul.bf16 %v2469_v43, %v2469_v43  ;;  %v5781_v33 = vpop.eup %5780  ;;  %3710 = vmatprep.subr.bf16.mxu1 %v5484_v20 }
 0x29a   :  { %v5783_v29 = vpop.eup %5782  ;;  %v2607_v12 = vmul.bf16 %v5781_v33, %v2524_v14  ;;  %5792 = vrcp.bf16 %v2564_v0  ;;  %v2532_v14 = vsub.bf16 %v7283_v54, %v8004_v55  ;;  %v5497_v54 = vld [vmem:[#allocation4 + $0x388] ss:$16 sps:$4 sm:$0xff]  }
 0x29b   :  { %v2565_v10 = vadd.bf16 1065369472, %v2501_v62  ;;  %v5785_v32 = vpop.eup %5784  ;;  %v2609_v34 = vmul.bf16 %v5783_v29, %v2525_v8  ;;  %3535 = vmatmul.mubr.bf16.gmra.mxu1 %v7294_v51  ;;  %v2533_v0 = vsub.bf16 %v2501_v62, %v8004_v55  ;;  %v5502_v29 = vld [vmem:[#allocation4 + $0x36c] ss:$16 sps:$4 sm:$0xff]  }
 0x29c   :  { %v5787_v60 = vpop.eup %5786  ;;  %v2472_v13 = vadd.bf16 1065369472, %v5785_v32  ;;  %3711 = vmatpush1.bf16.msra.mxu1 %v5482_v46  ;;  %v2652_v56 = vmul.bf16 %v2607_v12, %v7143_v9 }
 0x29d   :  { %5794 = vrcp.bf16 %v2565_v10  ;;  %v2653_v61 = vmul.bf16 %v2609_v34, %v7145_v24  ;;  %v2473_v52 = vadd.bf16 1065369472, %v5787_v60  ;;  %3648 = vmatmul.mubr.bf16.gmra.mxu0 %v7049_v37  ;;  %3712 = vmatprep.subr.bf16.mxu1 %v5487_v42  ;;  %v2528_v24 = vsub.bf16 %v7257_v38, %v8004_v55  ;;  %v5488_v37 = vld [vmem:[#allocation4 + $0x3e8] ss:$16 sps:$4 sm:$0xff]  }
 0x29e   :  { %v2504_v48 = vmul.bf16 %v2472_v13, %v2472_v13  ;;  %3657 = vmatprep.mubr.bf16.mxu0 %v7061_v35  ;;  %v7310_v31 = vmin.bf16 %v8018_v18, %v2652_v56  ;;  %v5508_v56 = vld [vmem:[#allocation4 + $0x32c] ss:$16 sps:$4 sm:$0xff]  }
 0x29f   :  { %v5789_v4 = vpop.eup %5788  ;;  %v2505_v5 = vmul.bf16 %v2473_v52, %v2473_v52  ;;  %v7302_v30 = vmin.bf16 %v8018_v18, %v2653_v61 }
 0x2a0   :  { %v2568_v25 = vadd.bf16 1065369472, %v2504_v48  ;;  %3713 = vmatpush1.bf16.msra.mxu1 %v5485_v1  ;;  %v2615_v35 = vmul.bf16 %v5789_v4, %v2528_v24  ;;  %v2536_v42 = vsub.bf16 %v2504_v48, %v8004_v55  ;;  %v5506_v48 = vld [vmem:[#allocation4 + $0x328] ss:$16 sps:$4 sm:$0xff]   ;;  %v5523_v4 = vld [vmem:[#allocation6 + $0x10] sm:$0xff]  }
 0x2a1   :  { %v2569_v9 = vadd.bf16 1065369472, %v2505_v5  ;;  %3544 = vmatprep.mubr.bf16.mxu1 %v7302_v30  ;;  %v5791_v36 = vpop.eup %5790  ;;  %3714 = vmatprep.subr.bf16.mxu1 %v5490_v22  ;;  %v2537_v32 = vsub.bf16 %v2505_v5, %v8004_v55  ;;  %v5524_v5 = vld [vmem:[#allocation6 + $0x48] sm:$0xff]  }
 0x2a2   :  { %5796 = vrcp.bf16 %v2568_v25  ;;  %v2617_v26 = vmul.bf16 %v5791_v36, %v2529_v57  ;;  %v2656_v17 = vmul.bf16 %v2615_v35, %v7165_v3  ;;  %v5526_v25 = vld [vmem:[#allocation6 + $0x40] sm:$0xff]  }
 0x2a3   :  { %5798 = vrcp.bf16 %v2569_v9  ;;  %3545 = vmatmul.mubr.bf16.gmra.mxu1 %v7310_v31  ;;  %v5527_v57 = vld [vmem:[#allocation6] sm:$0xff]  }
 0x2a4   :  { %v2657_v38 = vmul.bf16 %v2617_v26, %v7176_v58  ;;  %3715 = vmatpush2.bf16.msra.mxu1 %v5488_v37  ;;  %v5494_v58 = vld [vmem:[#allocation4 + $0x3a8] ss:$16 sps:$4 sm:$0xff]  }
 0x2a5   :  { %3658 = vmatmul.mubr.bf16.gmra.mxu0 %v7080_v50  ;;  %3716 = vmatprep.subr.bf16.mxu1 %v5493_v45  ;;  %v7325_v50 = vmin.bf16 %v8018_v18, %v2656_v17 }
 0x2a6   :  { %3667 = vmatprep.mubr.bf16.mxu0 %v7119_v2  ;;  %v7318_v43 = vmin.bf16 %v8018_v18, %v2657_v38  ;;  %v5499_v2 = vld [vmem:[#allocation4 + $0x38c] ss:$16 sps:$4 sm:$0xff]  }
 0x2a8   :  { %v5793_v20 = vpop.eup %5792  ;;  %3717 = vmatpush2.bf16.msra.mxu1 %v5491_v41  ;;  %3554 = vmatprep.mubr.bf16.mxu1 %v7318_v43 }
 0x2a9   :  { %v2623_v33 = vmul.bf16 %v5793_v20, %v2532_v14  ;;  %3718 = vmatprep.subr.bf16.mxu1 %v5496_v40 }
 0x2ab   :  { %v5795_v3 = vpop.eup %5794  ;;  %3555 = vmatmul.mubr.bf16.gmra.mxu1 %v7325_v50  ;;  %v2660_v62 = vmul.bf16 %v2623_v33, %v7204_v47  ;;  %v5530_v33 = vld [vmem:[#allocation6 + $0xf0] sm:$0xff]  }
 0x2ac   :  { %v2625_v8 = vmul.bf16 %v5795_v3, %v2533_v0  ;;  %3719 = vmatpush2.bf16.msra.mxu1 %v5494_v58  ;;  %v5528_v0 = vld [vmem:[#allocation6 + $0xf8] sm:$0xff]  }
 0x2ad   :  { %3668 = vmatmul.mubr.bf16.gmra.mxu0 %v7111_v16  ;;  %3720 = vmatprep.subr.bf16.mxu1 %v5499_v2  ;;  %v2692_v60 = vmin.bf16 %v8018_v18, %v2660_v62  ;;  %v5505_v16 = vld [vmem:[#allocation4 + $0x34c] ss:$16 sps:$4 sm:$0xff]   ;;  %v5531_v2 = vld [vmem:[#allocation6 + $0xb0] sm:$0xff]  }
 0x2ae   :  { %v2661_v46 = vmul.bf16 %v2625_v8, %v7215_v19  ;;  %3677 = vmatprep.mubr.bf16.mxu0 %v7125_v53  ;;  %v5500_v19 = vld [vmem:[#allocation4 + $0x368] ss:$16 sps:$4 sm:$0xff]  }
 0x2af   :  { %v5503_v53 = vld [vmem:[#allocation4 + $0x348] ss:$16 sps:$4 sm:$0xff]  }
 0x2b0   :  { %v2693_v12 = vmin.bf16 %v8018_v18, %v2661_v46  ;;  %v5797_v10 = vpop.eup %5796  ;;  %3721 = vmatpush2.bf16.msra.mxu1 %v5497_v54  ;;  %v5529_v58 = vld [vmem:[#allocation6 + $0xb8] sm:$0xff]   ;;  %v5532_v54 = vld [vmem:[#allocation6 + $0xe8] sm:$0xff]  }
 0x2b1   :  { %v5799_v34 = vpop.eup %5798  ;;  %v2631_v47 = vmul.bf16 %v5797_v10, %v2536_v42  ;;  %3722 = vmatprep.subr.bf16.mxu1 %v5502_v29  ;;  %v5533_v62 = vld [vmem:[#allocation6 + $0xa8] sm:$0xff]   ;;  %v5535_v10 = vld [vmem:[#allocation6 + $0xa0] sm:$0xff]  }
 0x2b2   :  { %3564 = vmatprep.mubr.bf16.mxu1 %v2693_v12  ;;  %v2633_v13 = vmul.bf16 %v5799_v34, %v2537_v32  ;;  %v5536_v32 = vld [vmem:[#allocation6 + $0xd8] sm:$0xff]  }
 0x2b3   :  { %3565 = vmatmul.mubr.bf16.gmra.mxu1 %v2692_v60  ;;  %v2664_v52 = vmul.bf16 %v2631_v47, %v7228_v44  ;;  %v5509_v44 = vld [vmem:[#allocation4 + $0x308] ss:$16 sps:$4 sm:$0xff]   ;;  %v5538_v47 = vld [vmem:[#allocation6 + $0xd0] sm:$0xff]  }
 0x2b4   :  { %v2665_v61 = vmul.bf16 %v2633_v13, %v7231_v6  ;;  %3723 = vmatpush2.bf16.msra.mxu1 %v5500_v19  ;;  %v5511_v6 = vld [vmem:[#allocation4 + $0x30c] ss:$16 sps:$4 sm:$0xff]  }
 0x2b5   :  { %3678 = vmatmul.mubr.bf16.gmra.mxu0 %v7148_v7  ;;  %3724 = vmatprep.subr.bf16.mxu1 %v5505_v16  ;;  %v2696_v22 = vmin.bf16 %v8018_v18, %v2664_v52  ;;  %v5512_v7 = vld [vmem:[#allocation6 + $0x78] sm:$0xff]   ;;  %v5539_v16 = vld [vmem:[#allocation6 + $0x90] sm:$0xff]  }
 0x2b6   :  { %v2697_v1 = vmin.bf16 %v8018_v18, %v2665_v61  ;;  %3687 = vmatprep.mubr.bf16.mxu0 %v7187_v15  ;;  %4975 = vmatprep.subr.bf16.mxu0 %v5512_v7  ;;  %v5514_v15 = vld [vmem:[#allocation6 + $0x70] sm:$0xff]   ;;  %v5537_v19 = vld [vmem:[#allocation6 + $0x98] sm:$0xff]   ;;  %v7416_v7 = vld [vmem:[%s7967_s6] sm:$0xf] }
 0x2b8   :  { %3574 = vmatprep.mubr.bf16.mxu1 %v2697_v1  ;;  %3725 = vmatpush2.bf16.msra.mxu1 %v5503_v53  ;;  %v5540_v53 = vld [vmem:[#allocation6 + $0xc8] sm:$0xff]  }
 0x2b9   :  { %3726 = vmatprep.subr.bf16.mxu1 %v5508_v56 }
 0x2bb   :  { %3575 = vmatmul.mubr.bf16.gmra.mxu1 %v2696_v22 }
 0x2bc   :  { %3727 = vmatpush2.bf16.msra.mxu1 %v5506_v48  ;;  %3730 = vmatprep.mubr.bf16.mxu1 %v7218_v11  ;;  %v5516_v11 = vld [vmem:[#allocation6 + $0x68] sm:$0xff]   ;;  %v5542_v48 = vld [vmem:[#allocation6 + $0xc0] sm:$0xff]  }
 0x2bd   :  { %3688 = vmatmul.mubr.bf16.gmra.mxu0 %v7179_v49  ;;  %3728 = vmatprep.subr.bf16.mxu1 %v5511_v6  ;;  %v5513_v49 = vld [vmem:[#allocation6 + $0x38] sm:$0xff]   ;;  %v5543_v6 = vld [vmem:[#allocation6 + $0x80] sm:$0xff]  }
 0x2be   :  { %4976 = vmatpush3.bf16.msra.mxu0 %v5513_v49 }
 0x2bf   :  { %4977 = vmatprep.subr.bf16.mxu0 %v5514_v15 }
 0x2c0   :  { %3729 = vmatpush2.bf16.msra.mxu1 %v5509_v44 }
 0x2c1   :  { %5039 = vmatprep.subr.bf16.mxu1 %v5528_v0 }
 0x2c3   :  { %3731 = vmatmul.mubr.bf16.vlgmr.msra.gmra.mxu1 %v7208_v23  ;;  %v5515_v23 = vld [vmem:[#allocation6 + $0x30] sm:$0xff]  }
 0x2c4   :  { %3740 = vmatprep.mubr.bf16.mxu1 %v7239_v28  ;;  %4978 = vmatpush3.bf16.msra.mxu0 %v5515_v23  ;;  %v5517_v28 = vld [vmem:[#allocation6 + $0x28] sm:$0xff]   ;;  %v8035_v23 = vld [vmem:[#allocation9_spill] sm:$0xff] }
 0x2c5   :  { %4979 = vmatprep.subr.bf16.mxu0 %v5516_v11  ;;  %5040 = vmatpush3.bf16.msra.mxu1 %v5529_v58  ;;  %v7424_v11 = vrot.slane %v7416_v7, %v8035_v23 }
 0x2c6   :  { %5041 = vmatprep.subr.bf16.mxu1 %v5530_v33 }
 0x2c8   :  { %4980 = vmatpush3.bf16.msra.mxu0 %v5517_v28 }
 0x2c9   :  { %5042 = vmatpush3.bf16.msra.mxu1 %v5531_v2 }
 0x2ca   :  { %5043 = vmatprep.subr.bf16.mxu1 %v5532_v54 }
 0x2cb   :  { %3741 = vmatmul.mubr.bf16.gmra.mxu1 %v7253_v63  ;;  %v5518_v63 = vld [vmem:[#allocation6 + $0x60] sm:$0xff]  }
 0x2cc   :  { %3750 = vmatprep.mubr.bf16.mxu1 %v7262_v39  ;;  %v5519_v39 = vld [vmem:[#allocation6 + $0x20] sm:$0xff]   ;;  %4981 = vmatprep.subr.bf16.mxu0 %v5518_v63 }
 0x2cd   :  { %4982 = vmatpush3.bf16.msra.mxu0 %v5519_v39  ;;  %5044 = vmatpush3.bf16.msra.mxu1 %v5533_v62  ;;  %v8036_v39 = vld [vmem:[#allocation11_spill] sm:$0xff] }
 0x2d3   :  { %3751 = vmatmul.mubr.bf16.gmra.mxu1 %v7275_v59  ;;  %v5520_v59 = vld [vmem:[#allocation6 + $0x58] sm:$0xff]  }
 0x2d4   :  { %3760 = vmatprep.mubr.bf16.mxu1 %v7280_v21  ;;  %v5521_v21 = vld [vmem:[#allocation6 + $0x18] sm:$0xff]   ;;  %4983 = vmatprep.subr.bf16.mxu0 %v5520_v59  ;;  %v7430_v59 = vrot.slane %v7416_v7, %v8036_v39 }
 0x2d5   :  { %4984 = vmatpush3.bf16.msra.mxu0 %v5521_v21 }
 0x2db   :  { %3761 = vmatmul.mubr.bf16.gmra.mxu1 %v7294_v51  ;;  %v5522_v51 = vld [vmem:[#allocation6 + $0x50] sm:$0xff]  }
 0x2dc   :  { %3770 = vmatprep.mubr.bf16.mxu1 %v7302_v30  ;;  %4985 = vmatprep.subr.bf16.mxu0 %v5522_v51  ;;  %v5525_v30 = vld [vmem:[#allocation6 + $0x8] sm:$0xff]  }
 0x2dd   :  { %4986 = vmatpush3.bf16.msra.mxu0 %v5523_v4 }
 0x2de   :  { %4987 = vmatprep.subr.bf16.mxu0 %v5524_v5 }
 0x2e1   :  { %4988 = vmatpush3.bf16.msra.mxu0 %v5525_v30 }
 0x2e2   :  { %4989 = vmatprep.subr.bf16.mxu0 %v5526_v25 }
 0x2e3   :  { %3771 = vmatmul.mubr.bf16.gmra.mxu1 %v7310_v31 }
 0x2e4   :  { %3780 = vmatprep.mubr.bf16.mxu1 %v7318_v43 }
 0x2e5   :  { %4990 = vmatpush3.bf16.msra.mxu0 %v5527_v57 }
 0x2eb   :  { %3781 = vmatmul.mubr.bf16.gmra.mxu1 %v7325_v50 }
 0x2ec   :  { %3790 = vmatprep.mubr.bf16.mxu1 %v2693_v12  ;;  %v5534_v12 = vld [vmem:[#allocation6 + $0xe0] sm:$0xff]  }
 0x2ed   :  { %5045 = vmatprep.subr.bf16.mxu1 %v5534_v12 }
 0x2ee   :  { %5046 = vmatpush3.bf16.msra.mxu1 %v5535_v10 }
 0x2ef   :  { %5047 = vmatprep.subr.bf16.mxu1 %v5536_v32 }
 0x2f2   :  { %5048 = vmatpush3.bf16.msra.mxu1 %v5537_v19 }
 0x2f3   :  { %3791 = vmatmul.mubr.bf16.gmra.mxu1 %v2692_v60  ;;  %5049 = vmatprep.subr.bf16.mxu1 %v5538_v47 }
 0x2f4   :  { %3800 = vmatprep.mubr.bf16.mxu1 %v2697_v1  ;;  %v5541_v1 = vld [vmem:[#allocation6 + $0x88] sm:$0xff]  }
 0x2f6   :  { %5050 = vmatpush3.bf16.msra.mxu1 %v5539_v16 }
 0x2f7   :  { %5051 = vmatprep.subr.bf16.mxu1 %v5540_v53 }
 0x2f9   :  { %v7355_v24 = vpop.f32.mrf.mxu0 }
 0x2fa   :  { %5052 = vmatpush3.bf16.msra.mxu1 %v5541_v1  ;;  %v3394_v4 = vadd.f32 %v7355_v24, %v7424_v11 }
 0x2fb   :  { %3801 = vmatmul.mubr.bf16.gmra.mxu1 %v2696_v22  ;;  %v7357_v9 = vpop.f32.mrf.mxu0  ;;  %5053 = vmatprep.subr.bf16.mxu1 %v5542_v48 }
 0x2fc   :  { %v3396_v57 = vadd.f32 %v7357_v9, %v7430_v59 }
 0x2fd   :  { %v7359_v37 = vpop.f32.mrf.mxu0 }
 0x2fe   :  { %5054 = vmatpush3.bf16.msra.mxu1 %v5543_v6  ;;  %v3398_v5 = vadd.f32 %v7359_v37, %v7424_v11 }
 0x2ff   :  { %v7361_v36 = vpop.f32.mrf.mxu0 }
 0x300   :  { %v3400_v0 = vadd.f32 %v7361_v36, %v7430_v59 }
 0x308   :  { %v7363_v31 = vpop.f32.mrf.mxu0 }
 0x309   :  { %v3404_v36 = vadd.f32 %v7363_v31, %v7424_v11 }
 0x30a   :  { %v7365_v35 = vpop.f32.mrf.mxu0 }
 0x30b   :  { %v3406_v1 = vadd.f32 %v7365_v35, %v7430_v59 }
 0x30c   :  { %v7367_v45 = vpop.f32.mrf.mxu0 }
 0x30d   :  { %v3408_v47 = vadd.f32 %v7367_v45, %v7424_v11 }
 0x30e   :  { %v7369_v26 = vpop.f32.mrf.mxu0 }
 0x30f   :  { %v3410_v48 = vadd.f32 %v7369_v26, %v7430_v59 }
 0x311   :  { %v7371_v38 = vpop.f32.mrf.mxu0 }
 0x313   :  { %v7373_v41 = vpop.f32.mrf.mxu0 }
 0x315   :  { %v7375_v17 = vpop.f32.mrf.mxu0 }
 0x317   :  { %v7377_v40 = vpop.f32.mrf.mxu0 }
 0x31b   :  { %v7379_v43 = vpop.f32.mrf.mxu0 }
 0x31d   :  { %v7381_v20 = vpop.f32.mrf.mxu0 }
 0x31f   :  { %v7383_v14 = vpop.f32.mrf.mxu0 }
 0x321   :  { %v7385_v3 = vpop.f32.mrf.mxu0 }
 0x323   :  { %v7387_v50 = vpop.f32.mrf.mxu0 }
 0x325   :  { %v7389_v8 = vpop.f32.mrf.mxu0 }
 0x327   :  { %v7391_v46 = vpop.f32.mrf.mxu0 }
 0x329   :  { %v7393_v29 = vpop.f32.mrf.mxu0 }
 0x32d   :  { %v7395_v42 = vpop.f32.mrf.mxu0 }
 0x32f   :  { %v7397_v34 = vpop.f32.mrf.mxu0 }
 0x331   :  { %v7399_v60 = vpop.f32.mrf.mxu0 }
 0x333   :  { %v7401_v13 = vpop.f32.mrf.mxu0 }
 0x335   :  { %v7403_v61 = vpop.f32.mrf.mxu0 }
 0x337   :  { %v7405_v52 = vpop.f32.mrf.mxu0 }
 0x339   :  { %v7407_v56 = vpop.f32.mrf.mxu0 }
 0x33b   :  { %v7409_v22 = vpop.f32.mrf.mxu0 }
 0x33d   :  { %v7411_v44 = vpop.f32.mrf.mxu0 }
 0x33f   :  { %v7418_v49 = vpop.f32.mrf.mxu0 }
 0x341   :  { %v7420_v15 = vpop.f32.mrf.mxu0 }
 0x343   :  { %v7426_v28 = vpop.f32.mrf.mxu0  ;;  %v3506_v63 = vpop.f32.mrf.mxu1 }
 0x344   :  { %v3507_v58 = vadd.f32 %v3506_v63, %v3394_v4 }
 0x345   :  { %v7432_v21 = vpop.f32.mrf.mxu0  ;;  %v3508_v51 = vpop.f32.mrf.mxu1 }
 0x346   :  { %v3509_v62 = vadd.f32 %v3508_v51, %v3396_v57 }
 0x347   :  { %v7438_v30 = vpop.f32.mrf.mxu0  ;;  %v3510_v25 = vpop.f32.mrf.mxu1 }
 0x348   :  { %v3511_v33 = vadd.f32 %v3510_v25, %v3398_v5 }
 0x349   :  { %v7444_v2 = vpop.f32.mrf.mxu0  ;;  %v3512_v54 = vpop.f32.mrf.mxu1 }
 0x34a   :  { %v7446_v12 = vpack.c.bf16 %v3511_v33, %v3507_v58  ;;  %v3513_v24 = vadd.f32 %v3512_v54, %v3400_v0  ;;  %v3414_v58 = vadd.f32 %v7371_v38, %v7424_v11  ;;  %v3418_v33 = vadd.f32 %v7375_v17, %v7424_v11 }
 0x34b   :  { %v7448_v10 = vpop.f32.mrf.mxu0  ;;  %v3516_v37 = vpop.f32.mrf.mxu1 }
 0x34c   :  { %v3843_v32 = vmin.bf16 %v8008_v27, %v7446_v12  ;;  %v7452_v19 = vpack.c.bf16 %v3513_v24, %v3509_v62  ;;  %v3517_v39 = vadd.f32 %v3516_v37, %v3404_v36  ;;  %v3416_v24 = vadd.f32 %v7373_v41, %v7430_v59 }
 0x34d   :  { %v3518_v9 = vpop.f32.mrf.mxu1  ;;  %v7464_v6 = vpop.f32.mrf.mxu0  ;;  %v3420_v37 = vadd.f32 %v7377_v40, %v7430_v59 }
 0x34e   :  { %v3876_v16 = vmul.bf16 1069105081, %v3843_v32  ;;  %v3844_v53 = vmin.bf16 %v8008_v27, %v7452_v19  ;;  %v3519_v45 = vadd.f32 %v3518_v9, %v3406_v1 }
 0x34f   :  { %v3520_v23 = vpop.f32.mrf.mxu1  ;;  %v7468_v25 = vpop.f32.mrf.mxu0 }
 0x350   :  { %5800 = vpow.bf16 %v3876_v16  ;;  %v3879_v63 = vmul.bf16 1069105081, %v3844_v53  ;;  %v3521_v31 = vadd.f32 %v3520_v23, %v3408_v47 }
 0x351   :  { %v3522_v51 = vpop.f32.mrf.mxu1  ;;  %v7484_v32 = vpop.f32.mrf.mxu0 }
 0x352   :  { %5802 = vpow.bf16 %v3879_v63  ;;  %v7466_v4 = vpack.c.bf16 %v3521_v31, %v3517_v39  ;;  %v3523_v5 = vadd.f32 %v3522_v51, %v3410_v48  ;;  %v3424_v31 = vadd.f32 %v7379_v43, %v7424_v11 }
 0x353   :  { %v3526_v57 = vpop.f32.mrf.mxu1  ;;  %v7488_v48 = vpop.f32.mrf.mxu0  ;;  %v3428_v51 = vadd.f32 %v7383_v14, %v7424_v11 }
 0x354   :  { %v3847_v35 = vmin.bf16 %v8008_v27, %v7466_v4  ;;  %v7472_v26 = vpack.c.bf16 %v3523_v5, %v3519_v45  ;;  %v3527_v47 = vadd.f32 %v3526_v57, %v3414_v58  ;;  %v3426_v57 = vadd.f32 %v7381_v20, %v7430_v59 }
 0x355   :  { %v3528_v0 = vpop.f32.mrf.mxu1  ;;  %v7504_v58 = vpop.f32.mrf.mxu0 }
 0x356   :  { %v3888_v54 = vmul.bf16 1069105081, %v3847_v35  ;;  %v3848_v62 = vmin.bf16 %v8008_v27, %v7472_v26  ;;  %v3529_v17 = vadd.f32 %v3528_v0, %v3416_v24  ;;  %v3430_v35 = vadd.f32 %v7385_v3, %v7430_v59 }
 0x357   :  { %v3530_v9 = vpop.f32.mrf.mxu1 }
 0x358   :  { %5804 = vpow.bf16 %v3888_v54  ;;  %v3891_v36 = vmul.bf16 1069105081, %v3848_v62  ;;  %v3531_v38 = vadd.f32 %v3530_v9, %v3418_v33 }
 0x359   :  { %v3532_v16 = vpop.f32.mrf.mxu1 }
 0x35a   :  { %5806 = vpow.bf16 %v3891_v36  ;;  %v7486_v53 = vpack.c.bf16 %v3531_v38, %v3527_v47  ;;  %v3533_v1 = vadd.f32 %v3532_v16, %v3420_v37  ;;  %v7513_v16 = vpop.f32.mrf.mxu0 }
 0x35b   :  { %v3536_v23 = vpop.f32.mrf.mxu1 }
 0x35c   :  { %v3851_v41 = vmin.bf16 %v8008_v27, %v7486_v53  ;;  %v7492_v40 = vpack.c.bf16 %v3533_v1, %v3529_v17  ;;  %v3537_v62 = vadd.f32 %v3536_v23, %v3424_v31  ;;  %v3434_v31 = vadd.f32 %v7387_v50, %v7424_v11 }
 0x35d   :  { %v3538_v63 = vpop.f32.mrf.mxu1 }
 0x35e   :  { %v5801_v39 = vpop.eup %5800  ;;  %v3900_v45 = vmul.bf16 1069105081, %v3851_v41  ;;  %v3852_v5 = vmin.bf16 %v8008_v27, %v7492_v40  ;;  %v3539_v36 = vadd.f32 %v3538_v63, %v3426_v57  ;;  %v3436_v57 = vadd.f32 %v7389_v8, %v7430_v59 }
 0x35f   :  { %v3971_v0 = vadd.bf16 1065369472, %v5801_v39  ;;  %v3540_v33 = vpop.f32.mrf.mxu1 }
 0x360   :  { %v5803_v54 = vpop.eup %5802  ;;  %5808 = vpow.bf16 %v3900_v45  ;;  %v3903_v43 = vmul.bf16 1069105081, %v3852_v5  ;;  %v3541_v24 = vadd.f32 %v3540_v33, %v3428_v51  ;;  %v3438_v51 = vadd.f32 %v7391_v46, %v7424_v11  ;;  %v7530_v33 = vpop.f32.mrf.mxu0 }
 0x361   :  { %v7506_v14 = vmul.bf16 %v3971_v0, %v3971_v0  ;;  %v3972_v37 = vadd.bf16 1065369472, %v5803_v54  ;;  %v3542_v9 = vpop.f32.mrf.mxu1 }
 0x362   :  { %5810 = vpow.bf16 %v3903_v43  ;;  %v7508_v47 = vpack.c.bf16 %v3541_v24, %v3537_v62  ;;  %v3543_v20 = vadd.f32 %v3542_v9, %v3430_v35  ;;  %v3440_v35 = vadd.f32 %v7393_v29, %v7430_v59 }
 0x363   :  { %v4067_v3 = vadd.bf16 1065369472, %v7506_v14  ;;  %v7511_v38 = vmul.bf16 %v3972_v37, %v3972_v37  ;;  %v3546_v17 = vpop.f32.mrf.mxu1 }
 0x364   :  { %v3855_v1 = vmin.bf16 %v8008_v27, %v7508_v47  ;;  %v7517_v23 = vpack.c.bf16 %v3543_v20, %v3539_v36  ;;  %v3547_v62 = vadd.f32 %v3546_v17, %v3434_v31 }
 0x365   :  { %5812 = vrcp.bf16 %v4067_v3  ;;  %v4068_v41 = vadd.bf16 1065369472, %v7511_v38  ;;  %v3548_v39 = vpop.f32.mrf.mxu1 }
 0x366   :  { %v5805_v63 = vpop.eup %5804  ;;  %v3912_v45 = vmul.bf16 1069105081, %v3855_v1  ;;  %v3856_v5 = vmin.bf16 %v8008_v27, %v7517_v23  ;;  %v3549_v36 = vadd.f32 %v3548_v39, %v3436_v57  ;;  %v7539_v1 = vpop.f32.mrf.mxu0 }
 0x367   :  { %5814 = vrcp.bf16 %v4068_v41  ;;  %v3975_v0 = vadd.bf16 1065369472, %v5805_v63  ;;  %v3550_v54 = vpop.f32.mrf.mxu1 }
 0x368   :  { %v5807_v43 = vpop.eup %5806  ;;  %5816 = vpow.bf16 %v3912_v45  ;;  %v3915_v50 = vmul.bf16 1069105081, %v3856_v5  ;;  %v3551_v46 = vadd.f32 %v3550_v54, %v3438_v51  ;;  %v3444_v45 = vadd.f32 %v7395_v42, %v7424_v11 }
 0x369   :  { %v7532_v24 = vmul.bf16 %v3975_v0, %v3975_v0  ;;  %v3976_v37 = vadd.bf16 1065369472, %v5807_v43  ;;  %v3552_v9 = vpop.f32.mrf.mxu1  ;;  %v3448_v5 = vadd.f32 %v7399_v60, %v7424_v11  ;;  %v3446_v0 = vadd.f32 %v7397_v34, %v7430_v59 }
 0x36a   :  { %5818 = vpow.bf16 %v3915_v50  ;;  %v7534_v8 = vpack.c.bf16 %v3551_v46, %v3547_v62  ;;  %v3553_v20 = vadd.f32 %v3552_v9, %v3440_v35  ;;  %v3450_v54 = vadd.f32 %v7401_v13, %v7430_v59  ;;  %v7556_v50 = vpop.f32.mrf.mxu0  ;;  %v8037_v9 = vld [vmem:[#allocation10_spill] sm:$0xff] }
 0x36b   :  { %v4071_v29 = vadd.bf16 1065369472, %v7532_v24  ;;  %v7537_v3 = vmul.bf16 %v3976_v37, %v3976_v37  ;;  %v3556_v41 = vpop.f32.mrf.mxu1  ;;  %v4035_v34 = vsub.bf16 %v7506_v14, %v8004_v55 }
 0x36c   :  { %v3859_v17 = vmin.bf16 %v8008_v27, %v7534_v8  ;;  %v7543_v63 = vpack.c.bf16 %v3553_v20, %v3549_v36  ;;  %v3557_v37 = vadd.f32 %v3556_v41, %v3444_v45  ;;  %v7560_v36 = vrot.slane %v7416_v7, %v8037_v9  ;;  %v8039_v45 = vld [vmem:[#allocation12_spill] sm:$0xff] }
 0x36d   :  { %5820 = vrcp.bf16 %v4071_v29  ;;  %v4072_v31 = vadd.bf16 1065369472, %v7537_v3  ;;  %v3558_v51 = vpop.f32.mrf.mxu1  ;;  %v3454_v41 = vadd.f32 %v7403_v61, %v7424_v11 }
 0x36e   :  { %v5809_v39 = vpop.eup %5808  ;;  %v3924_v57 = vmul.bf16 1069105081, %v3859_v17  ;;  %v3860_v35 = vmin.bf16 %v8008_v27, %v7543_v63  ;;  %v3559_v17 = vadd.f32 %v3558_v51, %v3446_v0  ;;  %v4036_v51 = vsub.bf16 %v7511_v38, %v8004_v55 }
 0x36f   :  { %5822 = vrcp.bf16 %v4072_v31  ;;  %v3979_v43 = vadd.bf16 1065369472, %v5809_v39  ;;  %v3560_v62 = vpop.f32.mrf.mxu1  ;;  %v3460_v38 = vadd.f32 %v7409_v22, %v7430_v59  ;;  %v4039_v22 = vsub.bf16 %v7532_v24, %v8004_v55 }
 0x370   :  { %v5811_v46 = vpop.eup %5810  ;;  %5824 = vpow.bf16 %v3924_v57  ;;  %v3927_v42 = vmul.bf16 1069105081, %v3860_v35  ;;  %v3561_v60 = vadd.f32 %v3560_v62, %v3448_v5  ;;  %v7572_v5 = vrot.slane %v7416_v7, %v8039_v45 }
 0x371   :  { %v7564_v20 = vmul.bf16 %v3979_v43, %v3979_v43  ;;  %v3980_v13 = vadd.bf16 1065369472, %v5811_v46  ;;  %v3562_v29 = vpop.f32.mrf.mxu1  ;;  %v7577_v43 = vpop.f32.mrf.mxu0  ;;  %v3456_v7 = vadd.f32 %v7405_v52, %v7430_v59 }
 0x372   :  { %5826 = vpow.bf16 %v3927_v42  ;;  %v7566_v31 = vpack.c.bf16 %v3561_v60, %v3557_v37  ;;  %v3563_v39 = vadd.f32 %v3562_v29, %v3450_v54  ;;  %v3458_v42 = vadd.f32 %v7407_v56, %v7424_v11 }
 0x373   :  { %v5813_v57 = vpop.eup %5812  ;;  %v4075_v35 = vadd.bf16 1065369472, %v7564_v20  ;;  %v7575_v14 = vmul.bf16 %v3980_v13, %v3980_v13  ;;  %v3566_v62 = vpop.f32.mrf.mxu1 }
 0x374   :  { %8038 = vst [vmem:[#allocation16_spill] sm:$0xff] %v7566_v31  ;;  %v4100_v46 = vmul.bf16 %v5813_v57, %v4035_v34  ;;  %v3863_v0 = vmin.bf16 %v8008_v27, %v7566_v31  ;;  %v7583_v54 = vpack.c.bf16 %v3563_v39, %v3559_v17  ;;  %v3464_v17 = vadd.f32 %v7411_v44, %v7424_v11  ;;  %v7597_v39 = vpop.f32.mrf.mxu0 }
 0x375   :  { %v5815_v61 = vpop.eup %5814  ;;  %5828 = vrcp.bf16 %v4075_v35  ;;  %v4076_v37 = vadd.bf16 1065369472, %v7575_v14  ;;  %v3568_v60 = vpop.f32.mrf.mxu1  ;;  %8041 = vst [vmem:[#allocation13_spill] sm:$0xff] %v7597_v39 }
 0x376   :  { %8040 = vst [vmem:[#allocation17_spill] sm:$0xff] %v7583_v54  ;;  %v5817_v9 = vpop.eup %5816  ;;  %v4102_v34 = vmul.bf16 %v5815_v61, %v4036_v51  ;;  %v3936_v13 = vmul.bf16 1069105081, %v3863_v0  ;;  %v3864_v29 = vmin.bf16 %v8008_v27, %v7583_v54  ;;  %v4163_v52 = vmul.bf16 %v4100_v46, %v7446_v12  ;;  %v7609_v24 = vpop.f32.mrf.mxu0 }
 0x377   :  { %5830 = vrcp.bf16 %v4076_v37  ;;  %v3983_v56 = vadd.bf16 1065369472, %v5817_v9  ;;  %v3570_v57 = vpop.f32.mrf.mxu1  ;;  %v3567_v54 = vadd.f32 %v3566_v62, %v3454_v41  ;;  %v3569_v12 = vadd.f32 %v3568_v60, %v3456_v7 }
 0x378   :  { %v5819_v45 = vpop.eup %5818  ;;  %v4164_v35 = vmul.bf16 %v4102_v34, %v7452_v19  ;;  %5832 = vpow.bf16 %v3936_v13  ;;  %v3939_v51 = vmul.bf16 1069105081, %v3864_v29  ;;  %v3571_v44 = vadd.f32 %v3570_v57, %v3458_v42 }
 0x379   :  { %v7602_v0 = vmul.bf16 %v3983_v56, %v3983_v56  ;;  %v3984_v61 = vadd.bf16 1065369472, %v5819_v45  ;;  %v3572_v31 = vpop.f32.mrf.mxu1  ;;  %v4195_v39 = vmin.bf16 %v8018_v18, %v4163_v52  ;;  %v3466_v41 = vadd.f32 %v7418_v49, %v7430_v59 }
 0x37a   :  { %5834 = vpow.bf16 %v3939_v51  ;;  %v3573_v46 = vadd.f32 %v3572_v31, %v3460_v38  ;;  %v4196_v37 = vmin.bf16 %v8018_v18, %v4164_v35  ;;  %v7611_v13 = vpack.c.bf16 %v3571_v44, %v3567_v54 }
 0x37b   :  { %v5821_v9 = vpop.eup %5820  ;;  %v4079_v19 = vadd.bf16 1065369472, %v7602_v0  ;;  %v7607_v34 = vmul.bf16 %v3984_v61, %v3984_v61  ;;  %v3576_v29 = vpop.f32.mrf.mxu1  ;;  %v4040_v31 = vsub.bf16 %v7537_v3, %v8004_v55  ;;  %v3468_v60 = vadd.f32 %v7420_v15, %v7424_v11 }
 0x37c   :  { %v4108_v62 = vmul.bf16 %v5821_v9, %v4039_v22  ;;  %v7617_v7 = vpack.c.bf16 %v3573_v46, %v3569_v12  ;;  %4457 = vmatprep.mubr.bf16.mxu0 %v4196_v37  ;;  %v3867_v54 = vmin.bf16 %v8008_v27, %v7611_v13  ;;  %v3470_v56 = vadd.f32 %v7426_v28, %v7430_v59  ;;  %v7631_v11 = vpop.f32.mrf.mxu0 }
 0x37d   :  { %v5823_v42 = vpop.eup %5822  ;;  %5836 = vrcp.bf16 %v4079_v19  ;;  %v4080_v38 = vadd.bf16 1065369472, %v7607_v34  ;;  %v3578_v52 = vpop.f32.mrf.mxu1  ;;  %4458 = vmatmul.mubr.bf16.vlgmr.msra.gmra.mxu0 %v4195_v39  ;;  %v3620_v3 = vadd.f32 %v7432_v21, %v7560_v36  ;;  %v4043_v28 = vsub.bf16 %v7564_v20, %v8004_v55 }
 0x37e   :  { %v5825_v49 = vpop.eup %5824  ;;  %v4110_v57 = vmul.bf16 %v5823_v42, %v4040_v31  ;;  %v3868_v45 = vmin.bf16 %v8008_v27, %v7617_v7  ;;  %v4167_v15 = vmul.bf16 %v4108_v62, %v7466_v4  ;;  %v3948_v22 = vmul.bf16 1069105081, %v3867_v54 }
 0x37f   :  { %5838 = vrcp.bf16 %v4080_v38  ;;  %v3987_v35 = vadd.bf16 1065369472, %v5825_v49  ;;  %v3580_v51 = vpop.f32.mrf.mxu1  ;;  %v3577_v21 = vadd.f32 %v3576_v29, %v3464_v17  ;;  %v3579_v37 = vadd.f32 %v3578_v52, %v3466_v41 }
 0x380   :  { %v5827_v39 = vpop.eup %5826  ;;  %v4168_v61 = vmul.bf16 %v4110_v57, %v7472_v26  ;;  %v3951_v59 = vmul.bf16 1069105081, %v3868_v45  ;;  %5840 = vpow.bf16 %v3948_v22  ;;  %v3581_v46 = vadd.f32 %v3580_v51, %v3468_v60  ;;  %v7640_v26 = vpop.f32.mrf.mxu0 }
 0x381   :  { %v7636_v44 = vmul.bf16 %v3987_v35, %v3987_v35  ;;  %v3988_v12 = vadd.bf16 1065369472, %v5827_v39  ;;  %v3582_v4 = vpop.f32.mrf.mxu1  ;;  %v4199_v31 = vmin.bf16 %v8018_v18, %v4167_v15  ;;  %v3622_v60 = vadd.f32 %v7438_v30, %v7572_v5 }
 0x382   :  { %5842 = vpow.bf16 %v3951_v59  ;;  %v3583_v9 = vadd.f32 %v3582_v4, %v3470_v56  ;;  %v4200_v19 = vmin.bf16 %v8018_v18, %v4168_v61  ;;  %v7645_v17 = vpack.c.bf16 %v3581_v46, %v3577_v21  ;;  %v7665_v51 = vpop.f32.mrf.mxu0 }
 0x383   :  { %v5829_v62 = vpop.eup %5828  ;;  %v4083_v20 = vadd.bf16 1065369472, %v7636_v44  ;;  %v7643_v42 = vmul.bf16 %v3988_v12, %v3988_v12  ;;  %v3732_v29 = vpop.f32.mrf.mxu1  ;;  %v4044_v41 = vsub.bf16 %v7575_v14, %v8004_v55  ;;  %v3624_v49 = vadd.f32 %v7444_v2, %v7560_v36 }
 0x384   :  { %v4116_v38 = vmul.bf16 %v5829_v62, %v4043_v28  ;;  %v7651_v54 = vpack.c.bf16 %v3583_v9, %v3579_v37  ;;  %4465 = vmatprep.mubr.bf16.mxu0 %v4200_v19  ;;  %v3871_v57 = vmin.bf16 %v8008_v27, %v7645_v17  ;;  %v3626_v15 = vadd.f32 %v7448_v10, %v7572_v5 }
 0x385   :  { %v5831_v52 = vpop.eup %5830  ;;  %5844 = vrcp.bf16 %v4083_v20  ;;  %v4084_v56 = vadd.bf16 1065369472, %v7643_v42  ;;  %v3734_v45 = vpop.f32.mrf.mxu1  ;;  %4466 = vmatmul.mubr.bf16.gmra.mxu0 %v4199_v31  ;;  %v4047_v35 = vsub.bf16 %v7602_v0, %v8004_v55  ;;  %v3733_v10 = vadd.f32 %v3732_v29, %v3620_v3 }
 0x386   :  { %v5833_v30 = vpop.eup %5832  ;;  %v4118_v14 = vmul.bf16 %v5831_v52, %v4044_v41  ;;  %v3872_v22 = vmin.bf16 %v8008_v27, %v7651_v54  ;;  %v4171_v2 = vmul.bf16 %v4116_v38, %v7486_v53  ;;  %v3960_v61 = vmul.bf16 1069105081, %v3871_v57  ;;  %v7674_v38 = vpop.f32.mrf.mxu0 }
 0x387   :  { %5846 = vrcp.bf16 %v4084_v56  ;;  %v3991_v39 = vadd.bf16 1065369472, %v5833_v30  ;;  %v3736_v28 = vpop.f32.mrf.mxu1  ;;  %v3735_v37 = vadd.f32 %v3734_v45, %v3622_v60  ;;  %v4048_v60 = vsub.bf16 %v7607_v34, %v8004_v55 }
 0x388   :  { %v5835_v59 = vpop.eup %5834  ;;  %v4172_v21 = vmul.bf16 %v4118_v14, %v7492_v40  ;;  %v3963_v12 = vmul.bf16 1069105081, %v3872_v22  ;;  %v3737_v46 = vadd.f32 %v3736_v28, %v3624_v49  ;;  %5848 = vpow.bf16 %v3960_v61  ;;  %v7699_v61 = vpop.f32.mrf.mxu0 }
 0x389   :  { %v7668_v4 = vmul.bf16 %v3991_v39, %v3991_v39  ;;  %v3992_v0 = vadd.bf16 1065369472, %v5835_v59  ;;  %v3738_v9 = vpop.f32.mrf.mxu1  ;;  %v4203_v20 = vmin.bf16 %v8018_v18, %v4171_v2  ;;  %v3630_v57 = vadd.f32 %v7464_v6, %v7560_v36 }
 0x38a   :  { %5850 = vpow.bf16 %v3963_v12  ;;  %v7670_v53 = vpack.c.bf16 %v3737_v46, %v3733_v10  ;;  %v3739_v19 = vadd.f32 %v3738_v9, %v3626_v15  ;;  %v4204_v62 = vmin.bf16 %v8018_v18, %v4172_v21 }
 0x38b   :  { %v5837_v31 = vpop.eup %5836  ;;  %v4087_v40 = vadd.bf16 1065369472, %v7668_v4  ;;  %v7677_v3 = vmul.bf16 %v3992_v0, %v3992_v0  ;;  %v3742_v29 = vpop.f32.mrf.mxu1  ;;  %v3632_v45 = vadd.f32 %v7468_v25, %v7572_v5  ;;  %v3634_v34 = vadd.f32 %v7484_v32, %v7560_v36 }
 0x38c   :  { %v4124_v41 = vmul.bf16 %v5837_v31, %v4047_v35  ;;  %v3845_v52 = vmin.bf16 %v8008_v27, %v7670_v53  ;;  %v7683_v49 = vpack.c.bf16 %v3739_v19, %v3735_v37  ;;  %4473 = vmatprep.mubr.bf16.mxu0 %v4204_v62  ;;  %v3636_v6 = vadd.f32 %v7488_v48, %v7572_v5 }
 0x38d   :  { %v5839_v56 = vpop.eup %5838  ;;  %5852 = vrcp.bf16 %v4087_v40  ;;  %v4088_v30 = vadd.bf16 1065369472, %v7677_v3  ;;  %v3744_v15 = vpop.f32.mrf.mxu1  ;;  %4474 = vmatmul.mubr.bf16.gmra.mxu0 %v4203_v20  ;;  %v3640_v25 = vadd.f32 %v7504_v58, %v7560_v36  ;;  %v4051_v21 = vsub.bf16 %v7636_v44, %v8004_v55 }
 0x38e   :  { %v4126_v14 = vmul.bf16 %v5839_v56, %v4048_v60  ;;  %v3882_v35 = vmul.bf16 1069105081, %v3845_v52  ;;  %v3846_v22 = vmin.bf16 %v8008_v27, %v7683_v49  ;;  %v5841_v2 = vpop.eup %5840  ;;  %v4175_v39 = vmul.bf16 %v4124_v41, %v7508_v47 }
 0x38f   :  { %5854 = vrcp.bf16 %v4088_v30  ;;  %v3746_v28 = vpop.f32.mrf.mxu1  ;;  %v3995_v12 = vadd.bf16 1065369472, %v5841_v2  ;;  %v3743_v48 = vadd.f32 %v3742_v29, %v3630_v57  ;;  %v3745_v47 = vadd.f32 %v3744_v15, %v3632_v45 }
 0x390   :  { %v5843_v59 = vpop.eup %5842  ;;  %v4176_v32 = vmul.bf16 %v4126_v14, %v7517_v23  ;;  %5856 = vpow.bf16 %v3882_v35  ;;  %v3885_v46 = vmul.bf16 1069105081, %v3846_v22  ;;  %v3747_v0 = vadd.f32 %v3746_v28, %v3634_v34  ;;  %v7708_v23 = vpop.f32.mrf.mxu0 }
 0x391   :  { %v3996_v10 = vadd.bf16 1065369472, %v5843_v59  ;;  %v3748_v37 = vpop.f32.mrf.mxu1  ;;  %v7704_v58 = vmul.bf16 %v3995_v12, %v3995_v12  ;;  %v4207_v31 = vmin.bf16 %v8018_v18, %v4175_v39  ;;  %v4052_v41 = vsub.bf16 %v7643_v42, %v8004_v55 }
 0x392   :  { %v3749_v9 = vadd.f32 %v3748_v37, %v3636_v6  ;;  %v4208_v19 = vmin.bf16 %v8018_v18, %v4176_v32  ;;  %5858 = vpow.bf16 %v3885_v46  ;;  %v7712_v44 = vpack.c.bf16 %v3747_v0, %v3743_v48  ;;  %v7733_v2 = vpop.f32.mrf.mxu0 }
 0x393   :  { %v5845_v62 = vpop.eup %5844  ;;  %v7710_v20 = vmul.bf16 %v3996_v10, %v3996_v10  ;;  %v3752_v40 = vpop.f32.mrf.mxu1  ;;  %v4091_v60 = vadd.bf16 1065369472, %v7704_v58  ;;  %v3642_v57 = vadd.f32 %v7513_v16, %v7572_v5  ;;  %v3644_v45 = vadd.f32 %v7530_v33, %v7560_v36 }
 0x394   :  { %v4132_v29 = vmul.bf16 %v5845_v62, %v4051_v21  ;;  %v7717_v52 = vpack.c.bf16 %v3749_v9, %v3745_v47  ;;  %4481 = vmatprep.mubr.bf16.mxu0 %v4208_v19  ;;  %v3849_v15 = vmin.bf16 %v8008_v27, %v7712_v44  ;;  %v3646_v42 = vadd.f32 %v7539_v1, %v7572_v5  ;;  %v7742_v9 = vpop.f32.mrf.mxu0 }
 0x395   :  { %v5847_v56 = vpop.eup %5846  ;;  %v4092_v30 = vadd.bf16 1065369472, %v7710_v20  ;;  %v3754_v34 = vpop.f32.mrf.mxu1  ;;  %4482 = vmatmul.mubr.bf16.gmra.mxu0 %v4207_v31  ;;  %5860 = vrcp.bf16 %v4091_v60  ;;  %v4055_v33 = vsub.bf16 %v7668_v4, %v8004_v55  ;;  %v3753_v21 = vadd.f32 %v3752_v40, %v3640_v25 }
 0x396   :  { %v4134_v14 = vmul.bf16 %v5847_v56, %v4052_v41  ;;  %v3850_v35 = vmin.bf16 %v8008_v27, %v7717_v52  ;;  %v5849_v22 = vpop.eup %5848  ;;  %v4179_v16 = vmul.bf16 %v4132_v29, %v7534_v8  ;;  %v3894_v6 = vmul.bf16 1069105081, %v3849_v15  ;;  %v8042_v56 = vld [vmem:[#allocation13_spill] sm:$0xff] }
 0x397   :  { %5862 = vrcp.bf16 %v4092_v30  ;;  %v3756_v39 = vpop.f32.mrf.mxu1  ;;  %v3999_v1 = vadd.bf16 1065369472, %v5849_v22  ;;  %v3755_v10 = vadd.f32 %v3754_v34, %v3642_v57  ;;  %v3650_v47 = vadd.f32 %v7556_v50, %v7560_v36 }
 0x398   :  { %v5851_v28 = vpop.eup %5850  ;;  %v4180_v59 = vmul.bf16 %v4134_v14, %v7543_v63  ;;  %v3897_v32 = vmul.bf16 1069105081, %v3850_v35  ;;  %5864 = vpow.bf16 %v3894_v6  ;;  %v3757_v46 = vadd.f32 %v3756_v39, %v3644_v45  ;;  %v8043_v6 = vld [vmem:[#allocation16_spill] sm:$0xff] }
 0x399   :  { %v4000_v12 = vadd.bf16 1065369472, %v5851_v28  ;;  %v3758_v48 = vpop.f32.mrf.mxu1  ;;  %v7736_v8 = vmul.bf16 %v3999_v1, %v3999_v1  ;;  %v4211_v63 = vmin.bf16 %v8018_v18, %v4179_v16  ;;  %v4056_v40 = vsub.bf16 %v7677_v3, %v8004_v55  ;;  %v8044_v28 = vld [vmem:[#allocation17_spill] sm:$0xff] }
 0x39a   :  { %5866 = vpow.bf16 %v3897_v32  ;;  %v3759_v4 = vadd.f32 %v3758_v48, %v3646_v42  ;;  %v4212_v0 = vmin.bf16 %v8018_v18, %v4180_v59  ;;  %v7746_v19 = vpack.c.bf16 %v3757_v46, %v3753_v21 }
 0x39b   :  { %v5853_v37 = vpop.eup %5852  ;;  %v7744_v25 = vmul.bf16 %v4000_v12, %v4000_v12  ;;  %v3762_v62 = vpop.f32.mrf.mxu1  ;;  %v4095_v29 = vadd.bf16 1065369472, %v7736_v8  ;;  %v3652_v50 = vadd.f32 %v7577_v43, %v7572_v5  ;;  %v3654_v57 = vadd.f32 %v8042_v56, %v7560_v36 }
 0x39c   :  { %v4140_v31 = vmul.bf16 %v5853_v37, %v4055_v33  ;;  %v7751_v41 = vpack.c.bf16 %v3759_v4, %v3755_v10  ;;  %4489 = vmatprep.mubr.bf16.mxu0 %v4212_v0  ;;  %v3853_v30 = vmin.bf16 %v8008_v27, %v7746_v19  ;;  %v3656_v34 = vadd.f32 %v7609_v24, %v7572_v5  ;;  %v7764_v43 = vpop.f32.mrf.mxu0 }
 0x39d   :  { %v5855_v60 = vpop.eup %5854  ;;  %v4096_v45 = vadd.bf16 1065369472, %v7744_v25  ;;  %v3764_v15 = vpop.f32.mrf.mxu1  ;;  %4490 = vmatmul.mubr.bf16.gmra.mxu0 %v4211_v63  ;;  %5868 = vrcp.bf16 %v4095_v29  ;;  %v3763_v16 = vadd.f32 %v3762_v62, %v3650_v47  ;;  %v3660_v24 = vadd.f32 %v7631_v11, %v7560_v36 }
 0x39e   :  { %v5857_v3 = vpop.eup %5856  ;;  %v4142_v42 = vmul.bf16 %v5855_v60, %v4056_v40  ;;  %v3854_v14 = vmin.bf16 %v8008_v27, %v7751_v41  ;;  %v3906_v22 = vmul.bf16 1069105081, %v3853_v30  ;;  %v4183_v39 = vmul.bf16 %v4140_v31, %v8043_v6  ;;  %v7774_v37 = vpop.f32.mrf.mxu0 }
 0x39f   :  { %5870 = vrcp.bf16 %v4096_v45  ;;  %v3973_v35 = vadd.bf16 1065369472, %v5857_v3  ;;  %v3766_v33 = vpop.f32.mrf.mxu1  ;;  %v3765_v10 = vadd.f32 %v3764_v15, %v3652_v50  ;;  %v4059_v47 = vsub.bf16 %v7704_v58, %v8004_v55 }
 0x3a0   :  { %v4184_v59 = vmul.bf16 %v4142_v42, %v8044_v28  ;;  %v3909_v1 = vmul.bf16 1069105081, %v3854_v14  ;;  %v3767_v32 = vadd.f32 %v3766_v33, %v3654_v57  ;;  %v5859_v21 = vpop.eup %5858  ;;  %5872 = vpow.bf16 %v3906_v22  ;;  %v7799_v22 = vpop.f32.mrf.mxu0 }
 0x3a1   :  { %v7770_v12 = vmul.bf16 %v3973_v35, %v3973_v35  ;;  %v3768_v46 = vpop.f32.mrf.mxu1  ;;  %v3974_v48 = vadd.bf16 1065369472, %v5859_v21  ;;  %v4060_v63 = vsub.bf16 %v7710_v20, %v8004_v55  ;;  %v4215_v29 = vmin.bf16 %v8018_v18, %v4183_v39 }
 0x3a2   :  { %5874 = vpow.bf16 %v3909_v1  ;;  %v7772_v4 = vpack.c.bf16 %v3767_v32, %v3763_v16  ;;  %v3769_v0 = vadd.f32 %v3768_v46, %v3656_v34  ;;  %v4216_v31 = vmin.bf16 %v8018_v18, %v4184_v59 }
 0x3a3   :  { %v4069_v11 = vadd.bf16 1065369472, %v7770_v12  ;;  %v3772_v62 = vpop.f32.mrf.mxu1  ;;  %v5861_v40 = vpop.eup %5860  ;;  %v7783_v60 = vmul.bf16 %v3974_v48, %v3974_v48  ;;  %v3662_v58 = vadd.f32 %v7640_v26, %v7572_v5  ;;  %v3664_v20 = vadd.f32 %v7665_v51, %v7560_v36 }
 0x3a4   :  { %v3857_v50 = vmin.bf16 %v8008_v27, %v7772_v4  ;;  %v7787_v56 = vpack.c.bf16 %v3769_v0, %v3765_v10  ;;  %v4148_v45 = vmul.bf16 %v5861_v40, %v4059_v47  ;;  %4497 = vmatprep.mubr.bf16.mxu0 %v4216_v31  ;;  %v3666_v15 = vadd.f32 %v7674_v38, %v7572_v5 }
 0x3a5   :  { %v5863_v57 = vpop.eup %5862  ;;  %5876 = vrcp.bf16 %v4069_v11  ;;  %v3774_v30 = vpop.f32.mrf.mxu1  ;;  %v4070_v34 = vadd.bf16 1065369472, %v7783_v60  ;;  %4498 = vmatmul.mubr.bf16.gmra.mxu0 %v4215_v29  ;;  %v3670_v35 = vadd.f32 %v7699_v61, %v7560_v36  ;;  %v3773_v16 = vadd.f32 %v3772_v62, %v3660_v24 }
 0x3a6   :  { %v4150_v3 = vmul.bf16 %v5863_v57, %v4060_v63  ;;  %v3918_v42 = vmul.bf16 1069105081, %v3857_v50  ;;  %v5865_v14 = vpop.eup %5864  ;;  %v4187_v26 = vmul.bf16 %v4148_v45, %v7611_v13  ;;  %v3858_v51 = vmin.bf16 %v8008_v27, %v7787_v56  ;;  %v3685_v24 = vpop.f32.mrf.mxu0 }
 0x3a7   :  { %v3776_v33 = vpop.f32.mrf.mxu1  ;;  %5878 = vrcp.bf16 %v4070_v34  ;;  %v3977_v39 = vadd.bf16 1065369472, %v5865_v14  ;;  %v3775_v32 = vadd.f32 %v3774_v30, %v3662_v58  ;;  %v4063_v48 = vsub.bf16 %v7736_v8, %v8004_v55 }
 0x3a8   :  { %v5867_v6 = vpop.eup %5866  ;;  %v4188_v38 = vmul.bf16 %v4150_v3, %v7617_v7  ;;  %v3777_v28 = vadd.f32 %v3776_v33, %v3664_v20  ;;  %5880 = vpow.bf16 %v3918_v42  ;;  %v3921_v1 = vmul.bf16 1069105081, %v3858_v51  ;;  %v3689_v34 = vpop.f32.mrf.mxu0 }
 0x3a9   :  { %v3978_v59 = vadd.bf16 1065369472, %v5867_v6  ;;  %v3778_v61 = vpop.f32.mrf.mxu1  ;;  %v7804_v21 = vmul.bf16 %v3977_v39, %v3977_v39  ;;  %v4064_v7 = vsub.bf16 %v7744_v25, %v8004_v55  ;;  %v4219_v11 = vmin.bf16 %v8018_v18, %v4187_v26 }
 0x3aa   :  { %v7806_v13 = vpack.c.bf16 %v3777_v28, %v3773_v16  ;;  %v3779_v10 = vadd.f32 %v3778_v61, %v3666_v15  ;;  %v4220_v46 = vmin.bf16 %v8018_v18, %v4188_v38  ;;  %5882 = vpow.bf16 %v3921_v1 }
 0x3ab   :  { %v7813_v0 = vmul.bf16 %v3978_v59, %v3978_v59  ;;  %v3782_v47 = vpop.f32.mrf.mxu1  ;;  %v5869_v63 = vpop.eup %5868  ;;  %v4073_v62 = vadd.bf16 1065369472, %v7804_v21  ;;  %v3672_v8 = vadd.f32 %v7708_v23, %v7572_v5  ;;  %v3674_v25 = vadd.f32 %v7733_v2, %v7560_v36 }
 0x3ac   :  { %v3861_v31 = vmin.bf16 %v8008_v27, %v7806_v13  ;;  %v7819_v40 = vpack.c.bf16 %v3779_v10, %v3775_v32  ;;  %4505 = vmatprep.mubr.bf16.mxu0 %v4220_v46  ;;  %v4156_v50 = vmul.bf16 %v5869_v63, %v4063_v48  ;;  %v3676_v3 = vadd.f32 %v7742_v9, %v7572_v5  ;;  %v3691_v32 = vpop.f32.mrf.mxu0 }
 0x3ad   :  { %v5871_v29 = vpop.eup %5870  ;;  %v4074_v57 = vadd.bf16 1065369472, %v7813_v0  ;;  %v3784_v58 = vpop.f32.mrf.mxu1  ;;  %5884 = vrcp.bf16 %v4073_v62  ;;  %4506 = vmatmul.mubr.bf16.gmra.mxu0 %v4219_v11  ;;  %v4037_v2 = vsub.bf16 %v7770_v12, %v8004_v55  ;;  %v3783_v6 = vadd.f32 %v3782_v47, %v3670_v35 }
 0x3ae   :  { %v4158_v20 = vmul.bf16 %v5871_v29, %v4064_v7  ;;  %v3930_v45 = vmul.bf16 1069105081, %v3861_v31  ;;  %v3862_v30 = vmin.bf16 %v8008_v27, %v7819_v40  ;;  %v5873_v15 = vpop.eup %5872  ;;  %v4191_v23 = vmul.bf16 %v4156_v50, %v7645_v17  ;;  %v3693_v50 = vpop.f32.mrf.mxu0 }
 0x3af   :  { %5886 = vrcp.bf16 %v4074_v57  ;;  %v3786_v42 = vpop.f32.mrf.mxu1  ;;  %v3981_v51 = vadd.bf16 1065369472, %v5873_v15  ;;  %v3785_v38 = vadd.f32 %v3784_v58, %v3672_v8  ;;  %v3680_v1 = vadd.f32 %v7764_v43, %v7560_v36 }
 0x3b0   :  { %v5875_v14 = vpop.eup %5874  ;;  %v4192_v26 = vmul.bf16 %v4158_v20, %v7651_v54  ;;  %5888 = vpow.bf16 %v3930_v45  ;;  %v3933_v16 = vmul.bf16 1069105081, %v3862_v30  ;;  %v3787_v39 = vadd.f32 %v3786_v42, %v3674_v25 }
 0x3b1   :  { %v3982_v33 = vadd.bf16 1065369472, %v5875_v14  ;;  %v3788_v28 = vpop.f32.mrf.mxu1  ;;  %v7834_v9 = vmul.bf16 %v3981_v51, %v3981_v51  ;;  %v4223_v35 = vmin.bf16 %v8018_v18, %v4191_v23  ;;  %v3682_v47 = vadd.f32 %v7774_v37, %v7572_v5 }
 0x3b2   :  { %5890 = vpow.bf16 %v3933_v16  ;;  %v3789_v17 = vadd.f32 %v3788_v28, %v3676_v3  ;;  %v4224_v59 = vmin.bf16 %v8018_v18, %v4192_v26  ;;  %v7841_v61 = vpack.c.bf16 %v3787_v39, %v3783_v6 }
 0x3b3   :  { %v5877_v12 = vpop.eup %5876  ;;  %v7839_v54 = vmul.bf16 %v3982_v33, %v3982_v33  ;;  %v3792_v10 = vpop.f32.mrf.mxu1  ;;  %v4077_v48 = vadd.bf16 1065369472, %v7834_v9  ;;  %v4038_v43 = vsub.bf16 %v7783_v60, %v8004_v55  ;;  %v3684_v29 = vadd.f32 %v7799_v22, %v7560_v36 }
 0x3b4   :  { %v4104_v46 = vmul.bf16 %v5877_v12, %v4037_v2  ;;  %v7845_v7 = vpack.c.bf16 %v3789_v17, %v3785_v38  ;;  %4513 = vmatprep.mubr.bf16.mxu0 %v4224_v59  ;;  %v3865_v11 = vmin.bf16 %v8008_v27, %v7841_v61  ;;  %v3686_v8 = vadd.f32 %v3685_v24, %v7572_v5 }
 0x3b5   :  { %v4078_v63 = vadd.bf16 1065369472, %v7839_v54  ;;  %v3794_v62 = vpop.f32.mrf.mxu1  ;;  %v5879_v31 = vpop.eup %5878  ;;  %5892 = vrcp.bf16 %v4077_v48  ;;  %4514 = vmatmul.mubr.bf16.gmra.mxu0 %v4223_v35  ;;  %v3793_v58 = vadd.f32 %v3792_v10, %v3680_v1  ;;  %v3690_v24 = vadd.f32 %v3689_v34, %v7560_v36 }
 0x3b6   :  { %v3866_v25 = vmin.bf16 %v8008_v27, %v7845_v7  ;;  %v5881_v37 = vpop.eup %5880  ;;  %v4106_v60 = vmul.bf16 %v5879_v31, %v4038_v43  ;;  %v3942_v57 = vmul.bf16 1069105081, %v3865_v11  ;;  %v4165_v45 = vmul.bf16 %v4104_v46, %v7670_v53  ;;  %v3695_v53 = vpop.f32.mrf.mxu0 }
 0x3b7   :  { %5894 = vrcp.bf16 %v4078_v63  ;;  %v3796_v20 = vpop.f32.mrf.mxu1  ;;  %v3985_v30 = vadd.bf16 1065369472, %v5881_v37  ;;  %v4041_v2 = vsub.bf16 %v7804_v21, %v8004_v55  ;;  %v4042_v16 = vsub.bf16 %v7813_v0, %v8004_v55 }
 0x3b8   :  { %v3945_v15 = vmul.bf16 1069105081, %v3866_v25  ;;  %v3797_v3 = vadd.f32 %v3796_v20, %v3684_v29  ;;  %v5883_v22 = vpop.eup %5882  ;;  %v4166_v23 = vmul.bf16 %v4106_v60, %v7683_v49  ;;  %5896 = vpow.bf16 %v3942_v57 }
 0x3b9   :  { %v3798_v42 = vpop.f32.mrf.mxu1  ;;  %v7864_v14 = vmul.bf16 %v3985_v30, %v3985_v30  ;;  %v3986_v26 = vadd.bf16 1065369472, %v5883_v22  ;;  %v3795_v33 = vadd.f32 %v3794_v62, %v3682_v47  ;;  %v4197_v21 = vmin.bf16 %v8018_v18, %v4165_v45 }
 0x3ba   :  { %5898 = vpow.bf16 %v3945_v15  ;;  %v7866_v51 = vpack.c.bf16 %v3797_v3, %v3793_v58  ;;  %v3799_v6 = vadd.f32 %v3798_v42, %v3686_v8  ;;  %v4198_v49 = vmin.bf16 %v8018_v18, %v4166_v23 }
 0x3bb   :  { %v3802_v34 = vpop.f32.mrf.mxu1  ;;  %v5885_v38 = vpop.eup %5884  ;;  %v4081_v39 = vadd.bf16 1065369472, %v7864_v14  ;;  %v7873_v28 = vmul.bf16 %v3986_v26, %v3986_v26  ;;  %v3692_v12 = vadd.f32 %v3691_v32, %v7572_v5  ;;  %v3694_v0 = vadd.f32 %v3693_v50, %v7560_v36 }
 0x3bc   :  { %v3869_v17 = vmin.bf16 %v8008_v27, %v7866_v51  ;;  %v4112_v1 = vmul.bf16 %v5885_v38, %v4041_v2  ;;  %v7879_v10 = vpack.c.bf16 %v3799_v6, %v3795_v33  ;;  %4554 = vmatprep.mubr.bf16.mxu1 %v4198_v49  ;;  %v3696_v48 = vadd.f32 %v3695_v53, %v7572_v5 }
 0x3bd   :  { %v5887_v59 = vpop.eup %5886  ;;  %v3804_v35 = vpop.f32.mrf.mxu1  ;;  %5900 = vrcp.bf16 %v4081_v39  ;;  %v4082_v43 = vadd.bf16 1065369472, %v7873_v28  ;;  %4555 = vmatmul.mubr.bf16.vlgmr.msra.gmra.mxu1 %v4197_v21  ;;  %v3803_v62 = vadd.f32 %v3802_v34, %v3690_v24  ;;  %v4045_v30 = vsub.bf16 %v7834_v9, %v8004_v55 }
 0x3be   :  { %v5889_v46 = vpop.eup %5888  ;;  %v4114_v47 = vmul.bf16 %v5887_v59, %v4042_v16  ;;  %v3954_v11 = vmul.bf16 1069105081, %v3869_v17  ;;  %v3870_v32 = vmin.bf16 %v8008_v27, %v7879_v10  ;;  %v4169_v29 = vmul.bf16 %v4112_v1, %v7712_v44 }
 0x3bf   :  { %v3989_v63 = vadd.bf16 1065369472, %v5889_v46  ;;  %v3806_v36 = vpop.f32.mrf.mxu1  ;;  %5902 = vrcp.bf16 %v4082_v43  ;;  %v3805_v50 = vadd.f32 %v3804_v35, %v3692_v12  ;;  %v4046_v44 = vsub.bf16 %v7839_v54, %v8004_v55 }
 0x3c0   :  { %v5891_v31 = vpop.eup %5890  ;;  %v4170_v8 = vmul.bf16 %v4114_v47, %v7717_v52  ;;  %v3807_v25 = vadd.f32 %v3806_v36, %v3694_v0  ;;  %5904 = vpow.bf16 %v3954_v11  ;;  %v3957_v57 = vmul.bf16 1069105081, %v3870_v32 }
 0x3c1   :  { %v4021_v5 = vmul.bf16 %v3989_v63, %v3989_v63  ;;  %v3990_v37 = vadd.bf16 1065369472, %v5891_v31  ;;  %v3808_v60 = vpop.f32.mrf.mxu1  ;;  %v4201_v22 = vmin.bf16 %v8018_v18, %v4169_v29  ;;  %v4049_v59 = vsub.bf16 %v7864_v14, %v8004_v55 }
 0x3c2   :  { %v7887_v58 = vpack.c.bf16 %v3807_v25, %v3803_v62  ;;  %v3809_v20 = vadd.f32 %v3808_v60, %v3696_v48  ;;  %v4202_v45 = vmin.bf16 %v8018_v18, %v4170_v8  ;;  %5906 = vpow.bf16 %v3957_v57 }
 0x3c3   :  { %v4085_v52 = vadd.bf16 1065369472, %v4021_v5  ;;  %v4022_v15 = vmul.bf16 %v3990_v37, %v3990_v37  ;;  %v5893_v3 = vpop.eup %5892  ;;  %v4053_v32 = vsub.bf16 %v4021_v5, %v8004_v55 }
 0x3c4   :  { %v3873_v24 = vmin.bf16 %v8008_v27, %v7887_v58  ;;  %v7897_v23 = vpack.c.bf16 %v3809_v20, %v3805_v50  ;;  %4562 = vmatprep.mubr.bf16.mxu1 %v4202_v45  ;;  %v4120_v42 = vmul.bf16 %v5893_v3, %v4045_v30 }
 0x3c5   :  { %v5895_v2 = vpop.eup %5894  ;;  %5908 = vrcp.bf16 %v4085_v52  ;;  %v4086_v26 = vadd.bf16 1065369472, %v4022_v15  ;;  %4563 = vmatmul.mubr.bf16.gmra.mxu1 %v4201_v22  ;;  %v4054_v25 = vsub.bf16 %v4022_v15, %v8004_v55 }
 0x3c6   :  { %v4122_v9 = vmul.bf16 %v5895_v2, %v4046_v44  ;;  %v3966_v53 = vmul.bf16 1069105081, %v3873_v24  ;;  %v3874_v54 = vmin.bf16 %v8008_v27, %v7897_v23  ;;  %v5897_v16 = vpop.eup %5896  ;;  %v4173_v33 = vmul.bf16 %v4120_v42, %v7746_v19 }
 0x3c7   :  { %5910 = vrcp.bf16 %v4086_v26  ;;  %v3993_v49 = vadd.bf16 1065369472, %v5897_v16 }
 0x3c8   :  { %v5899_v6 = vpop.eup %5898  ;;  %v4174_v34 = vmul.bf16 %v4122_v9, %v7751_v41  ;;  %5912 = vpow.bf16 %v3966_v53  ;;  %v3969_v38 = vmul.bf16 1069105081, %v3874_v54  ;;  %v4205_v0 = vmin.bf16 %v8018_v18, %v4173_v33 }
 0x3c9   :  { %v3994_v21 = vadd.bf16 1065369472, %v5899_v6  ;;  %v4025_v39 = vmul.bf16 %v3993_v49, %v3993_v49  ;;  %v4050_v41 = vsub.bf16 %v7873_v28, %v8004_v55 }
 0x3ca   :  { %5914 = vpow.bf16 %v3969_v38  ;;  %v4206_v17 = vmin.bf16 %v8018_v18, %v4174_v34 }
 0x3cb   :  { %v4026_v27 = vmul.bf16 %v3994_v21, %v3994_v21  ;;  %v5901_v12 = vpop.eup %5900  ;;  %v4089_v19 = vadd.bf16 1065369472, %v4025_v39  ;;  %v4057_v3 = vsub.bf16 %v4025_v39, %v8004_v55 }
 0x3cc   :  { %4570 = vmatprep.mubr.bf16.mxu1 %v4206_v17  ;;  %v4128_v1 = vmul.bf16 %v5901_v12, %v4049_v59 }
 0x3cd   :  { %v4090_v35 = vadd.bf16 1065369472, %v4026_v27  ;;  %v5903_v46 = vpop.eup %5902  ;;  %5916 = vrcp.bf16 %v4089_v19  ;;  %4571 = vmatmul.mubr.bf16.gmra.mxu1 %v4205_v0  ;;  %v4058_v26 = vsub.bf16 %v4026_v27, %v8004_v55 }
 0x3ce   :  { %v5905_v48 = vpop.eup %5904  ;;  %v4130_v47 = vmul.bf16 %v5903_v46, %v4050_v41  ;;  %v4177_v43 = vmul.bf16 %v4128_v1, %v7772_v4 }
 0x3cf   :  { %5918 = vrcp.bf16 %v4090_v35  ;;  %v3997_v14 = vadd.bf16 1065369472, %v5905_v48 }
 0x3d0   :  { %v4178_v63 = vmul.bf16 %v4130_v47, %v7787_v56  ;;  %v5907_v11 = vpop.eup %5906  ;;  %v4209_v29 = vmin.bf16 %v8018_v18, %v4177_v43 }
 0x3d1   :  { %v4029_v62 = vmul.bf16 %v3997_v14, %v3997_v14  ;;  %v3998_v31 = vadd.bf16 1065369472, %v5907_v11 }
 0x3d2   :  { %v4210_v28 = vmin.bf16 %v8018_v18, %v4178_v63 }
 0x3d3   :  { %v5909_v36 = vpop.eup %5908  ;;  %v4093_v37 = vadd.bf16 1065369472, %v4029_v62  ;;  %v4030_v60 = vmul.bf16 %v3998_v31, %v3998_v31  ;;  %v4061_v6 = vsub.bf16 %v4029_v62, %v8004_v55 }
 0x3d4   :  { %v4136_v8 = vmul.bf16 %v5909_v36, %v4053_v32  ;;  %4578 = vmatprep.mubr.bf16.mxu1 %v4210_v28 }
 0x3d5   :  { %v5911_v50 = vpop.eup %5910  ;;  %5920 = vrcp.bf16 %v4093_v37  ;;  %4579 = vmatmul.mubr.bf16.gmra.mxu1 %v4209_v29  ;;  %v4094_v56 = vadd.bf16 1065369472, %v4030_v60  ;;  %v4062_v21 = vsub.bf16 %v4030_v60, %v8004_v55 }
 0x3d6   :  { %v5913_v4 = vpop.eup %5912  ;;  %v4138_v57 = vmul.bf16 %v5911_v50, %v4054_v25  ;;  %v4181_v45 = vmul.bf16 %v4136_v8, %v7806_v13 }
 0x3d7   :  { %v4001_v5 = vadd.bf16 1065369472, %v5913_v4  ;;  %5922 = vrcp.bf16 %v4094_v56 }
 0x3d8   :  { %v5915_v20 = vpop.eup %5914  ;;  %v4182_v30 = vmul.bf16 %v4138_v57, %v7819_v40  ;;  %v4213_v42 = vmin.bf16 %v8018_v18, %v4181_v45 }
 0x3d9   :  { %v4033_v44 = vmul.bf16 %v4001_v5, %v4001_v5  ;;  %v4002_v52 = vadd.bf16 1065369472, %v5915_v20 }
 0x3da   :  { %v4214_v15 = vmin.bf16 %v8018_v18, %v4182_v30 }
 0x3db   :  { %v4097_v22 = vadd.bf16 1065369472, %v4033_v44  ;;  %v4034_v24 = vmul.bf16 %v4002_v52, %v4002_v52  ;;  %v5917_v2 = vpop.eup %5916 }
 0x3dc   :  { %4586 = vmatprep.mubr.bf16.mxu1 %v4214_v15  ;;  %v4144_v53 = vmul.bf16 %v5917_v2, %v4057_v3 }
 0x3dd   :  { %v5919_v9 = vpop.eup %5918  ;;  %5924 = vrcp.bf16 %v4097_v22  ;;  %v4098_v13 = vadd.bf16 1065369472, %v4034_v24  ;;  %4587 = vmatmul.mubr.bf16.gmra.mxu1 %v4213_v42  ;;  %v4066_v12 = vsub.bf16 %v4034_v24, %v8004_v55 }
 0x3de   :  { %v4146_v40 = vmul.bf16 %v5919_v9, %v4058_v26  ;;  %v4185_v54 = vmul.bf16 %v4144_v53, %v7841_v61 }
 0x3df   :  { %5926 = vrcp.bf16 %v4098_v13 }
 0x3e0   :  { %v4186_v16 = vmul.bf16 %v4146_v40, %v7845_v7  ;;  %v4217_v49 = vmin.bf16 %v8018_v18, %v4185_v54  ;;  %v4065_v7 = vsub.bf16 %v4033_v44, %v8004_v55 }
 0x3e2   :  { %v4218_v33 = vmin.bf16 %v8018_v18, %v4186_v16 }
 0x3e3   :  { %v5921_v34 = vpop.eup %5920 }
 0x3e4   :  { %4594 = vmatprep.mubr.bf16.mxu1 %v4218_v33  ;;  %v4152_v38 = vmul.bf16 %v5921_v34, %v4061_v6 }
 0x3e5   :  { %4595 = vmatmul.mubr.bf16.gmra.mxu1 %v4217_v49  ;;  %v5923_v39 = vpop.eup %5922 }
 0x3e6   :  { %v4154_v17 = vmul.bf16 %v5923_v39, %v4062_v21  ;;  %v4189_v59 = vmul.bf16 %v4152_v38, %v7866_v51 }
 0x3e8   :  { %v4190_v61 = vmul.bf16 %v4154_v17, %v7879_v10  ;;  %v4221_v1 = vmin.bf16 %v8018_v18, %v4189_v59 }
 0x3ea   :  { %v4222_v0 = vmin.bf16 %v8018_v18, %v4190_v61 }
 0x3eb   :  { %v5925_v27 = vpop.eup %5924 }
 0x3ec   :  { %v4160_v41 = vmul.bf16 %v5925_v27, %v4065_v7  ;;  %4602 = vmatprep.mubr.bf16.mxu1 %v4222_v0 }
 0x3ed   :  { %v5927_v19 = vpop.eup %5926  ;;  %4603 = vmatmul.mubr.bf16.gmra.mxu1 %v4221_v1 }
 0x3ee   :  { %v4162_v35 = vmul.bf16 %v5927_v19, %v4066_v12  ;;  %v4193_v51 = vmul.bf16 %v4160_v41, %v7887_v58 }
 0x3f0   :  { %v4194_v46 = vmul.bf16 %v4162_v35, %v7897_v23  ;;  %v4225_v48 = vmin.bf16 %v8018_v18, %v4193_v51 }
 0x3f2   :  { %v4226_v10 = vmin.bf16 %v8018_v18, %v4194_v46  ;;  %v7940_v18 = vld [vmem:[%s7969_s8] ss:$0 sm:$0xff] }
 0x3f4   :  { %4610 = vmatprep.mubr.bf16.mxu1 %v4226_v10 }
 0x3f5   :  { %4611 = vmatmul.mubr.bf16.gmra.mxu1 %v4225_v48 }
 0x43d   :  { %v4991_v55 = vpop.f32.mrf.mxu0 }
 0x43f   :  { %v4992_v47 = vpop.f32.mrf.mxu0 }
 0x440   :  { %v4993_v50 = vadd.f32 %v4992_v47, %v4991_v55 }
 0x441   :  { %v4994_v43 = vpop.f32.mrf.mxu0 }
 0x442   :  { %v4460_v20 = vadd.f32 %v4993_v50, %v7940_v18 }
 0x443   :  { %v4995_v14 = vpop.f32.mrf.mxu0 }
 0x444   :  { %v4996_v56 = vadd.f32 %v4995_v14, %v4994_v43 }
 0x445   :  { %v4997_v63 = vpop.f32.mrf.mxu0 }
 0x446   :  { %v4463_v15 = vadd.f32 %v4996_v56, %v7940_v18 }
 0x447   :  { %v4998_v11 = vpop.f32.mrf.mxu0 }
 0x448   :  { %v4999_v3 = vadd.f32 %v4998_v11, %v4997_v63 }
 0x449   :  { %v5000_v32 = vpop.f32.mrf.mxu0 }
 0x44a   :  { %v4468_v9 = vadd.f32 %v4999_v3, %v7940_v18 }
 0x44b   :  { %v5001_v62 = vpop.f32.mrf.mxu0 }
 0x44c   :  { %v5002_v53 = vadd.f32 %v5001_v62, %v5000_v32 }
 0x44d   :  { %v5003_v36 = vpop.f32.mrf.mxu0 }
 0x44e   :  { %v4471_v6 = vadd.f32 %v5002_v53, %v7940_v18 }
 0x44f   :  { %v5004_v31 = vpop.f32.mrf.mxu0 }
 0x450   :  { %v5005_v34 = vadd.f32 %v5004_v31, %v5003_v36 }
 0x451   :  { %v5006_v28 = vpop.f32.mrf.mxu0 }
 0x452   :  { %v4476_v59 = vadd.f32 %v5005_v34, %v7940_v18 }
 0x453   :  { %v5007_v23 = vpop.f32.mrf.mxu0 }
 0x454   :  { %v5008_v61 = vadd.f32 %v5007_v23, %v5006_v28 }
 0x455   :  { %v5009_v29 = vpop.f32.mrf.mxu0 }
 0x456   :  { %v4479_v1 = vadd.f32 %v5008_v61, %v7940_v18 }
 0x457   :  { %v5010_v58 = vpop.f32.mrf.mxu0 }
 0x458   :  { %v5011_v41 = vadd.f32 %v5010_v58, %v5009_v29 }
 0x459   :  { %v5012_v8 = vpop.f32.mrf.mxu0 }
 0x45a   :  { %v4484_v55 = vadd.f32 %v5011_v41, %v7940_v18 }
 0x45b   :  { %v5013_v25 = vpop.f32.mrf.mxu0 }
 0x45c   :  { %v5014_v47 = vadd.f32 %v5013_v25, %v5012_v8 }
 0x45d   :  { %v5015_v37 = vpop.f32.mrf.mxu0 }
 0x45e   :  { %v4487_v62 = vadd.f32 %v5014_v47, %v7940_v18 }
 0x45f   :  { %v5016_v4 = vpop.f32.mrf.mxu0 }
 0x460   :  { %v5017_v36 = vadd.f32 %v5016_v4, %v5015_v37 }
 0x461   :  { %v5018_v30 = vpop.f32.mrf.mxu0 }
 0x462   :  { %v4492_v50 = vadd.f32 %v5017_v36, %v7940_v18 }
 0x463   :  { %v5019_v2 = vpop.f32.mrf.mxu0 }
 0x465   :  { %v5021_v54 = vpop.f32.mrf.mxu0 }
 0x467   :  { %v5022_v21 = vpop.f32.mrf.mxu0 }
 0x469   :  { %v5024_v12 = vpop.f32.mrf.mxu0 }
 0x46b   :  { %v5025_v51 = vpop.f32.mrf.mxu0 }
 0x46d   :  { %v5027_v63 = vpop.f32.mrf.mxu0 }
 0x46f   :  { %v5028_v23 = vpop.f32.mrf.mxu0 }
 0x471   :  { %v5030_v25 = vpop.f32.mrf.mxu0 }
 0x473   :  { %v5031_v4 = vpop.f32.mrf.mxu0 }
 0x474   :  { %v5032_v34 = vadd.f32 %v5031_v4, %v5030_v25 }
 0x47d   :  { %v5055_v60 = vpop.f32.mrf.mxu1 }
 0x47f   :  { %v5056_v57 = vpop.f32.mrf.mxu1 }
 0x480   :  { %v5057_v5 = vadd.f32 %v5056_v57, %v5055_v60  ;;  %v5020_v60 = vadd.f32 %v5019_v2, %v5018_v30  ;;  %v5033_v2 = vpop.f32.mrf.mxu0 }
 0x481   :  { %v5058_v45 = vpop.f32.mrf.mxu1 }
 0x482   :  { %v4557_v44 = vadd.f32 %v5057_v5, %v4460_v20  ;;  %v4495_v20 = vadd.f32 %v5020_v60, %v7940_v18 }
 0x483   :  { %v5059_v52 = vpop.f32.mrf.mxu1 }
 0x484   :  { %v5060_v22 = vadd.f32 %v5059_v52, %v5058_v45  ;;  %4619 = vxpose.xlu0.b32.start [1/16] (narrow) %v4557_v44, 8  ;;  %v5023_v45 = vadd.f32 %v5022_v21, %v5021_v54 }
 0x485   :  { %v5061_v24 = vpop.f32.mrf.mxu1 }
 0x486   :  { %v4560_v42 = vadd.f32 %v5060_v22, %v4463_v15  ;;  %v4500_v3 = vadd.f32 %v5023_v45, %v7940_v18  ;;  %v5026_v22 = vadd.f32 %v5025_v51, %v5024_v12 }
 0x487   :  { %v5062_v26 = vpop.f32.mrf.mxu1 }
 0x488   :  { %v5063_v13 = vadd.f32 %v5062_v26, %v5061_v24  ;;  %4620 = vxpose.xlu0.b32.cont [2/16] (narrow) %v4560_v42, 8 }
 0x489   :  { %v5064_v40 = vpop.f32.mrf.mxu1 }
 0x48a   :  { %v4565_v16 = vadd.f32 %v5063_v13, %v4468_v9  ;;  %v4503_v9 = vadd.f32 %v5026_v22, %v7940_v18  ;;  %v5029_v13 = vadd.f32 %v5028_v23, %v5027_v63 }
 0x48b   :  { %v5065_v33 = vpop.f32.mrf.mxu1 }
 0x48c   :  { %v5066_v49 = vadd.f32 %v5065_v33, %v5064_v40  ;;  %4621 = vxpose.xlu0.b32.cont [3/16] (narrow) %v4565_v16, 8  ;;  %v5034_v40 = vpop.f32.mrf.mxu0 }
 0x48d   :  { %v5067_v38 = vpop.f32.mrf.mxu1  ;;  %v5035_v61 = vadd.f32 %v5034_v40, %v5033_v2 }
 0x48e   :  { %v4568_v39 = vadd.f32 %v5066_v49, %v4471_v6  ;;  %v4508_v6 = vadd.f32 %v5029_v13, %v7940_v18 }
 0x48f   :  { %v5068_v17 = vpop.f32.mrf.mxu1 }
 0x490   :  { %v5069_v27 = vadd.f32 %v5068_v17, %v5067_v38  ;;  %4622 = vxpose.xlu0.b32.cont [4/16] (narrow) %v4568_v39, 8  ;;  %v5036_v38 = vpop.f32.mrf.mxu0 }
 0x491   :  { %v5070_v7 = vpop.f32.mrf.mxu1 }
 0x492   :  { %v4573_v0 = vadd.f32 %v5069_v27, %v4476_v59  ;;  %v4511_v59 = vadd.f32 %v5032_v34, %v7940_v18 }
 0x493   :  { %v5071_v19 = vpop.f32.mrf.mxu1 }
 0x494   :  { %v5072_v35 = vadd.f32 %v5071_v19, %v5070_v7  ;;  %4623 = vxpose.xlu0.b32.cont [5/16] (narrow) %v4573_v0, 8  ;;  %v5037_v7 = vpop.f32.mrf.mxu0 }
 0x495   :  { %v5073_v46 = vpop.f32.mrf.mxu1  ;;  %v5038_v41 = vadd.f32 %v5037_v7, %v5036_v38 }
 0x496   :  { %v4576_v10 = vadd.f32 %v5072_v35, %v4479_v1  ;;  %v4516_v1 = vadd.f32 %v5035_v61, %v7940_v18 }
 0x497   :  { %v5074_v48 = vpop.f32.mrf.mxu1 }
 0x498   :  { %v5075_v43 = vadd.f32 %v5074_v48, %v5073_v46  ;;  %4624 = vxpose.xlu0.b32.cont [6/16] (narrow) %v4576_v10, 8  ;;  %v4519_v48 = vadd.f32 %v5038_v41, %v7940_v18 }
 0x499   :  { %v5076_v14 = vpop.f32.mrf.mxu1 }
 0x49a   :  { %v4581_v11 = vadd.f32 %v5075_v43, %v4484_v55 }
 0x49b   :  { %v5077_v32 = vpop.f32.mrf.mxu1 }
 0x49c   :  { %v5078_v31 = vadd.f32 %v5077_v32, %v5076_v14  ;;  %4625 = vxpose.xlu0.b32.cont [7/16] (narrow) %v4581_v11, 8 }
 0x49d   :  { %v5079_v28 = vpop.f32.mrf.mxu1 }
 0x49e   :  { %v4584_v29 = vadd.f32 %v5078_v31, %v4487_v62 }
 0x49f   :  { %v5080_v58 = vpop.f32.mrf.mxu1 }
 0x4a0   :  { %v5081_v57 = vadd.f32 %v5080_v58, %v5079_v28  ;;  %4626 = vxpose.xlu0.b32.cont [8/16] (narrow) %v4584_v29, 8 }
 0x4a1   :  { %v5082_v8 = vpop.f32.mrf.mxu1 }
 0x4a2   :  { %v4589_v56 = vadd.f32 %v5081_v57, %v4492_v50 }
 0x4a3   :  { %v5083_v5 = vpop.f32.mrf.mxu1 }
 0x4a4   :  { %v5084_v44 = vadd.f32 %v5083_v5, %v5082_v8  ;;  %4627 = vxpose.xlu0.b32.cont [9/16] (narrow) %v4589_v56, 8 }
 0x4a5   :  { %v5085_v37 = vpop.f32.mrf.mxu1 }
 0x4a6   :  { %v4592_v52 = vadd.f32 %v5084_v44, %v4495_v20 }
 0x4a7   :  { %v5086_v15 = vpop.f32.mrf.mxu1 }
 0x4a8   :  { %v5087_v24 = vadd.f32 %v5086_v15, %v5085_v37  ;;  %4628 = vxpose.xlu0.b32.cont [10/16] (narrow) %v4592_v52, 8 }
 0x4a9   :  { %v5088_v30 = vpop.f32.mrf.mxu1 }
 0x4aa   :  { %v4597_v42 = vadd.f32 %v5087_v24, %v4500_v3 }
 0x4ab   :  { %v5089_v26 = vpop.f32.mrf.mxu1 }
 0x4ac   :  { %v5090_v53 = vadd.f32 %v5089_v26, %v5088_v30  ;;  %4629 = vxpose.xlu0.b32.cont [11/16] (narrow) %v4597_v42, 8 }
 0x4ad   :  { %v5091_v54 = vpop.f32.mrf.mxu1 }
 0x4ae   :  { %v4600_v16 = vadd.f32 %v5090_v53, %v4503_v9 }
 0x4af   :  { %v5092_v33 = vpop.f32.mrf.mxu1 }
 0x4b0   :  { %4630 = vxpose.xlu0.b32.cont [12/16] (narrow) %v4600_v16, 8  ;;  %v5093_v49 = vadd.f32 %v5092_v33, %v5091_v54 }
 0x4b1   :  { %v5094_v21 = vpop.f32.mrf.mxu1 }
 0x4b2   :  { %v4605_v39 = vadd.f32 %v5093_v49, %v4508_v6 }
 0x4b3   :  { %v5095_v17 = vpop.f32.mrf.mxu1 }
 0x4b4   :  { %v5096_v27 = vadd.f32 %v5095_v17, %v5094_v21  ;;  %4631 = vxpose.xlu0.b32.cont [13/16] (narrow) %v4605_v39, 8 }
 0x4b5   :  { %v5097_v12 = vpop.f32.mrf.mxu1 }
 0x4b6   :  { %v4608_v0 = vadd.f32 %v5096_v27, %v4511_v59 }
 0x4b7   :  { %v5098_v19 = vpop.f32.mrf.mxu1 }
 0x4b8   :  { %v5099_v35 = vadd.f32 %v5098_v19, %v5097_v12  ;;  %4632 = vxpose.xlu0.b32.cont [14/16] (narrow) %v4608_v0, 8 }
 0x4b9   :  { %v5100_v46 = vpop.f32.mrf.mxu1 }
 0x4ba   :  { %v4613_v51 = vadd.f32 %v5099_v35, %v4516_v1 }
 0x4bb   :  { %v5101_v10 = vpop.f32.mrf.mxu1 }
 0x4bc   :  { %v5102_v55 = vadd.f32 %v5101_v10, %v5100_v46  ;;  %4633 = vxpose.xlu0.b32.cont [15/16] (narrow) %v4613_v51, 8 }
 0x4be   :  { %v4616_v47 = vadd.f32 %v5102_v55, %v4519_v48 }
 0x4c0   :  { %4634 = vxpose.xlu0.b32.end [16/16] (narrow) %v4616_v47, 8 }
 0x500   :  { %v4635_v43 = vpop.trf.xlu0 }
 0x501   :  { %4651 = vst [vmem:[%s7970_s9] sm:$0xff] %v4635_v43 }
 0x502   :  { %4656 = vsyncpa [#allocation3], 1 }
 0x503   :  { %4657 = vsyncpa [#allocation5], 1 }

</bundles_post_ra>
